<compile_context>
chip_gen: v7x
topology: tpu7x:2x2x1
jax: 0.10.0
libtpu: 0.0.40
codegen_flags: <defaults>
</compile_context>

<pallas_src>
import jax
import jax.numpy as jnp
from jax.experimental import pallas as pl
from jax.experimental.pallas import tpu as pltpu

IN_FEATS = 128
H0, H1, H2 = 256, 512, 1024
OUT_FEATS = 784          # 28 * 28


def generator_mlp_kernel(x_ref,
                         w0_ref, b0_ref,
                         w1_ref, b1_ref,
                         w2_ref, b2_ref,
                         w3_ref, b3_ref,
                         o_ref):
    # Fused 4-layer MLP for one batch tile.  Matmul operands are bf16 (MXU
    # fast path); accumulate + bias + ReLU + Tanh in f32.
    h = x_ref[...].astype(jnp.bfloat16)

    h = jnp.dot(h, w0_ref[...], preferred_element_type=jnp.float32) + b0_ref[...]
    h = jnp.maximum(h, 0.0).astype(jnp.bfloat16)            # ReLU

    h = jnp.dot(h, w1_ref[...], preferred_element_type=jnp.float32) + b1_ref[...]
    h = jnp.maximum(h, 0.0).astype(jnp.bfloat16)            # ReLU

    h = jnp.dot(h, w2_ref[...], preferred_element_type=jnp.float32) + b2_ref[...]
    h = jnp.maximum(h, 0.0).astype(jnp.bfloat16)            # ReLU

    h = jnp.dot(h, w3_ref[...], preferred_element_type=jnp.float32) + b3_ref[...]
    o_ref[...] = jnp.tanh(h).astype(o_ref.dtype)            # Tanh


def _pick_batch_tile(B):
    """Adaptive batch tile: small batches run un-padded (multiple of 8),
    large batches use 128..512-row MXU-shaped tiles with >= 2 grid steps
    whenever possible (v7x megacore)."""
    if B < 128:
        return max(8, ((B + 7) // 8) * 8)
    half_rounded = (B // 2 // 128) * 128
    return int(min(512, max(128, half_rounded)))


def generator_forward(x, packed_params, *, batch_tile=None):
    """x: (B, 128) f32, packed_params from pack_params() -> (B, 1, 28, 28) f32."""
    (w0, b0), (w1, b1), (w2, b2), (w3, b3) = packed_params
    B = x.shape[0]
    if batch_tile is None:
        batch_tile = _pick_batch_tile(B)
    n_tiles = pl.cdiv(B, batch_tile)
    B_pad = n_tiles * batch_tile
    x_in = x if B_pad == B else jnp.pad(x, ((0, B_pad - B), (0, 0)))

    # Grid-invariant operands: resident in VMEM, single-buffered (index_map is
    # constant across the grid, so double buffering would only waste VMEM).
    def resident(arr):
        return pl.BlockSpec(arr.shape, lambda i: (0, 0),
                            pipeline_mode=pl.Buffered(1))

    flops = 2 * B_pad * (IN_FEATS * H0 + H0 * H1 + H1 * H2 + H2 * OUT_FEATS)
    bytes_accessed = (
        x_in.size * x_in.dtype.itemsize
        + sum(a.size * a.dtype.itemsize for pair in packed_params for a in pair)
        + B_pad * OUT_FEATS * 4)

    out_flat = pl.pallas_call(
        generator_mlp_kernel,
        out_shape=jax.ShapeDtypeStruct((B_pad, OUT_FEATS), jnp.float32),
        grid_spec=pltpu.PrefetchScalarGridSpec(
            num_scalar_prefetch=0,
            grid=(n_tiles,),   # >= 2 steps at realistic B -> v7x megacore split
            in_specs=[
                pl.BlockSpec((batch_tile, IN_FEATS), lambda i: (i, 0)),
                resident(w0), resident(b0),
                resident(w1), resident(b1),
                resident(w2), resident(b2),
                resident(w3), resident(b3),
            ],
            # Last dim = full array extent (784) -> lane-dense, direct 784-wide
            # output; no post-kernel slice/copy needed.
            out_specs=pl.BlockSpec((batch_tile, OUT_FEATS), lambda i: (i, 0)),
        ),
        compiler_params=pltpu.CompilerParams(
            dimension_semantics=("parallel",),
            vmem_limit_bytes=32 * 1024 * 1024,
        ),
        cost_estimate=pl.CostEstimate(
            flops=flops,
            transcendentals=B_pad * OUT_FEATS,
            bytes_accessed=bytes_accessed,
        ),
    )(x_in, w0, b0, w1, b1, w2, b2, w3, b3)

    # Drop batch padding (no-op when B_pad == B), then x.view(-1, 1, 28, 28).
    if B_pad != B:
        out_flat = out_flat[:B]
    return out_flat.reshape(-1, 1, 28, 28)


def init_params(key):
    """Deterministic init mimicking PyTorch nn.Linear default
    (uniform(-1/sqrt(fan_in), 1/sqrt(fan_in))).  Weights stored as (in, out),
    biases as (out,), all f32 (canonical / reference layout)."""
    dims = [(IN_FEATS, H0), (H0, H1), (H1, H2), (H2, OUT_FEATS)]
    params = []
    for fan_in, fan_out in dims:
        key, kw, kb = jax.random.split(key, 3)
        bound = 1.0 / jnp.sqrt(jnp.float32(fan_in))
        w = jax.random.uniform(kw, (fan_in, fan_out), jnp.float32, -bound, bound)
        b = jax.random.uniform(kb, (fan_out,), jnp.float32, -bound, bound)
        params.append((w, b))
    return params


def pack_params(params):
    """Convert reference f32 params to the kernel layout: bf16 weights,
    (1, out) f32 biases.  No lane padding needed (output is stored 784 wide)."""
    packed = []
    for w, b in params:
        packed.append((w.astype(jnp.bfloat16),
                       b.reshape(1, -1).astype(jnp.float32)))
    return packed


def generator_ref(x, params):
    """Pure-JAX reference using the same bf16-operand / f32-accumulate math."""
    def dense(h, w, b):
        return jnp.dot(h.astype(jnp.bfloat16), w.astype(jnp.bfloat16),
                       preferred_element_type=jnp.float32) + b

    (w0, b0), (w1, b1), (w2, b2), (w3, b3) = params
    h = jnp.maximum(dense(x, w0, b0), 0.0)
    h = jnp.maximum(dense(h, w1, b1), 0.0)
    h = jnp.maximum(dense(h, w2, b2), 0.0)
    h = jnp.tanh(dense(h, w3, b3))
    return h.reshape(-1, 1, 28, 28)


if __name__ == "__main__":
    key = jax.random.PRNGKey(0)
    key, kx = jax.random.split(key)

    B = 8  # small batch; small-batch fast path uses an 8-row tile (no padding)
    x = jax.random.normal(kx, (B, IN_FEATS), jnp.float32)

    params = init_params(key)          # f32 reference params
    packed = pack_params(params)       # kernel layout (bf16 weights, 2-D biases)

    out = generator_forward(x, packed)
    out = jax.block_until_ready(out)
    assert out.shape == (B, 1, 28, 28), out.shape

    ref = generator_ref(x, params)
    err = float(jnp.max(jnp.abs(out - ref)))
    assert err < 2e-3, f"max abs err {err}"

    print("KERNEL_OK")
</pallas_src>

<mosaic_0001>
module attributes {stable_mosaic.version = 11 : i64} {
  func.func @generator_mlp_kernel(%arg0: i32, %arg1: memref<8x128xf32, #tpu.memory_space<vmem>>, %arg2: memref<128x256xbf16, #tpu.memory_space<vmem>>, %arg3: memref<1x256xf32, #tpu.memory_space<vmem>>, %arg4: memref<256x512xbf16, #tpu.memory_space<vmem>>, %arg5: memref<1x512xf32, #tpu.memory_space<vmem>>, %arg6: memref<512x1024xbf16, #tpu.memory_space<vmem>>, %arg7: memref<1x1024xf32, #tpu.memory_space<vmem>>, %arg8: memref<1024x784xbf16, #tpu.memory_space<vmem>>, %arg9: memref<1x784xf32, #tpu.memory_space<vmem>>, %arg10: memref<8x784xf32, #tpu.memory_space<vmem>>) attributes {dimension_semantics = [#tpu.dimension_semantics<parallel>], iteration_bounds = array<i64: 1>, scalar_prefetch = 0 : i64, scratch_operands = 0 : i64, tpu.core_type = #tpu.core_type<tc>, window_params = [{transform_indices = @transform_0, window_bounds = array<i64: 8, 128>}, {pipeline_mode = #tpu.pipeline_mode<synchronous>, transform_indices = @transform_1, window_bounds = array<i64: 128, 256>}, {pipeline_mode = #tpu.pipeline_mode<synchronous>, transform_indices = @transform_2, window_bounds = array<i64: 1, 256>}, {pipeline_mode = #tpu.pipeline_mode<synchronous>, transform_indices = @transform_3, window_bounds = array<i64: 256, 512>}, {pipeline_mode = #tpu.pipeline_mode<synchronous>, transform_indices = @transform_4, window_bounds = array<i64: 1, 512>}, {pipeline_mode = #tpu.pipeline_mode<synchronous>, transform_indices = @transform_5, window_bounds = array<i64: 512, 1024>}, {pipeline_mode = #tpu.pipeline_mode<synchronous>, transform_indices = @transform_6, window_bounds = array<i64: 1, 1024>}, {pipeline_mode = #tpu.pipeline_mode<synchronous>, transform_indices = @transform_7, window_bounds = array<i64: 1024, 784>}, {pipeline_mode = #tpu.pipeline_mode<synchronous>, transform_indices = @transform_8, window_bounds = array<i64: 1, 784>}, {transform_indices = @transform_9, window_bounds = array<i64: 8, 784>}]} {
    %c0 = arith.constant 0 : index
    %c0_0 = arith.constant 0 : index
    %0 = vector.load %arg1[%c0, %c0_0] : memref<8x128xf32, #tpu.memory_space<vmem>>, vector<8x128xf32>
    %1 = arith.truncf %0 : vector<8x128xf32> to vector<8x128xbf16>
    %c0_1 = arith.constant 0 : index
    %c0_2 = arith.constant 0 : index
    %2 = vector.load %arg2[%c0_1, %c0_2] : memref<128x256xbf16, #tpu.memory_space<vmem>>, vector<128x256xbf16>
    %cst = arith.constant dense<0.000000e+00> : vector<8x256xf32>
    %3 = tpu.matmul %1, %2, %cst {dimension_numbers = #tpu.dot_dimension_numbers<[1], [0], [0], [1], [0, 0, 1, 1], [], []>} : vector<8x128xbf16>, vector<128x256xbf16>, vector<8x256xf32> -> vector<8x256xf32>
    %c0_3 = arith.constant 0 : index
    %c0_4 = arith.constant 0 : index
    %4 = vector.load %arg3[%c0_3, %c0_4] : memref<1x256xf32, #tpu.memory_space<vmem>>, vector<1x256xf32>
    %5 = vector.broadcast %4 : vector<1x256xf32> to vector<8x256xf32>
    %6 = arith.addf %3, %5 : vector<8x256xf32>
    %cst_5 = arith.constant 0.000000e+00 : f32
    %7 = vector.broadcast %cst_5 : f32 to vector<8x256xf32>
    %8 = arith.maximumf %6, %7 : vector<8x256xf32>
    %9 = arith.truncf %8 : vector<8x256xf32> to vector<8x256xbf16>
    %c0_6 = arith.constant 0 : index
    %c0_7 = arith.constant 0 : index
    %10 = vector.load %arg4[%c0_6, %c0_7] : memref<256x512xbf16, #tpu.memory_space<vmem>>, vector<256x512xbf16>
    %cst_8 = arith.constant dense<0.000000e+00> : vector<8x512xf32>
    %11 = tpu.matmul %9, %10, %cst_8 {dimension_numbers = #tpu.dot_dimension_numbers<[1], [0], [0], [1], [0, 0, 1, 1], [], []>} : vector<8x256xbf16>, vector<256x512xbf16>, vector<8x512xf32> -> vector<8x512xf32>
    %c0_9 = arith.constant 0 : index
    %c0_10 = arith.constant 0 : index
    %12 = vector.load %arg5[%c0_9, %c0_10] : memref<1x512xf32, #tpu.memory_space<vmem>>, vector<1x512xf32>
    %13 = vector.broadcast %12 : vector<1x512xf32> to vector<8x512xf32>
    %14 = arith.addf %11, %13 : vector<8x512xf32>
    %cst_11 = arith.constant 0.000000e+00 : f32
    %15 = vector.broadcast %cst_11 : f32 to vector<8x512xf32>
    %16 = arith.maximumf %14, %15 : vector<8x512xf32>
    %17 = arith.truncf %16 : vector<8x512xf32> to vector<8x512xbf16>
    %c0_12 = arith.constant 0 : index
    %c0_13 = arith.constant 0 : index
    %18 = vector.load %arg6[%c0_12, %c0_13] : memref<512x1024xbf16, #tpu.memory_space<vmem>>, vector<512x1024xbf16>
    %cst_14 = arith.constant dense<0.000000e+00> : vector<8x1024xf32>
    %19 = tpu.matmul %17, %18, %cst_14 {dimension_numbers = #tpu.dot_dimension_numbers<[1], [0], [0], [1], [0, 0, 1, 1], [], []>} : vector<8x512xbf16>, vector<512x1024xbf16>, vector<8x1024xf32> -> vector<8x1024xf32>
    %c0_15 = arith.constant 0 : index
    %c0_16 = arith.constant 0 : index
    %20 = vector.load %arg7[%c0_15, %c0_16] : memref<1x1024xf32, #tpu.memory_space<vmem>>, vector<1x1024xf32>
    %21 = vector.broadcast %20 : vector<1x1024xf32> to vector<8x1024xf32>
    %22 = arith.addf %19, %21 : vector<8x1024xf32>
    %cst_17 = arith.constant 0.000000e+00 : f32
    %23 = vector.broadcast %cst_17 : f32 to vector<8x1024xf32>
    %24 = arith.maximumf %22, %23 : vector<8x1024xf32>
    %25 = arith.truncf %24 : vector<8x1024xf32> to vector<8x1024xbf16>
    %c0_18 = arith.constant 0 : index
    %c0_19 = arith.constant 0 : index
    %26 = vector.load %arg8[%c0_18, %c0_19] : memref<1024x784xbf16, #tpu.memory_space<vmem>>, vector<1024x784xbf16>
    %cst_20 = arith.constant dense<0.000000e+00> : vector<8x784xf32>
    %27 = tpu.matmul %25, %26, %cst_20 {dimension_numbers = #tpu.dot_dimension_numbers<[1], [0], [0], [1], [0, 0, 1, 1], [], []>} : vector<8x1024xbf16>, vector<1024x784xbf16>, vector<8x784xf32> -> vector<8x784xf32>
    %c0_21 = arith.constant 0 : index
    %c0_22 = arith.constant 0 : index
    %28 = vector.load %arg9[%c0_21, %c0_22] : memref<1x784xf32, #tpu.memory_space<vmem>>, vector<1x784xf32>
    %29 = vector.broadcast %28 : vector<1x784xf32> to vector<8x784xf32>
    %30 = arith.addf %27, %29 : vector<8x784xf32>
    %31 = math.tanh %30 : vector<8x784xf32>
    %c0_23 = arith.constant 0 : index
    %c0_24 = arith.constant 0 : index
    %32 = vector.load %arg10[%c0_23, %c0_24] : memref<8x784xf32, #tpu.memory_space<vmem>>, vector<8x784xf32>
    tpu.vector_store %arg10[%c0_23, %c0_24], %31 {strides = array<i32>} : memref<8x784xf32, #tpu.memory_space<vmem>>, vector<8x784xf32>,
    return
  }
  func.func @transform_0(%arg0: i32) -> (i32, i32) {
    %c0_i32 = arith.constant 0 : i32
    %c0_i32_0 = arith.constant 0 : i32
    return %arg0, %c0_i32 : i32, i32
  }
  func.func @transform_1(%arg0: i32) -> (i32, i32) {
    %c0_i32 = arith.constant 0 : i32
    %c0_i32_0 = arith.constant 0 : i32
    %c0_i32_1 = arith.constant 0 : i32
    return %c0_i32, %c0_i32_0 : i32, i32
  }
  func.func @transform_2(%arg0: i32) -> (i32, i32) {
    %c0_i32 = arith.constant 0 : i32
    %c0_i32_0 = arith.constant 0 : i32
    %c0_i32_1 = arith.constant 0 : i32
    return %c0_i32, %c0_i32_0 : i32, i32
  }
  func.func @transform_3(%arg0: i32) -> (i32, i32) {
    %c0_i32 = arith.constant 0 : i32
    %c0_i32_0 = arith.constant 0 : i32
    %c0_i32_1 = arith.constant 0 : i32
    return %c0_i32, %c0_i32_0 : i32, i32
  }
  func.func @transform_4(%arg0: i32) -> (i32, i32) {
    %c0_i32 = arith.constant 0 : i32
    %c0_i32_0 = arith.constant 0 : i32
    %c0_i32_1 = arith.constant 0 : i32
    return %c0_i32, %c0_i32_0 : i32, i32
  }
  func.func @transform_5(%arg0: i32) -> (i32, i32) {
    %c0_i32 = arith.constant 0 : i32
    %c0_i32_0 = arith.constant 0 : i32
    %c0_i32_1 = arith.constant 0 : i32
    return %c0_i32, %c0_i32_0 : i32, i32
  }
  func.func @transform_6(%arg0: i32) -> (i32, i32) {
    %c0_i32 = arith.constant 0 : i32
    %c0_i32_0 = arith.constant 0 : i32
    %c0_i32_1 = arith.constant 0 : i32
    return %c0_i32, %c0_i32_0 : i32, i32
  }
  func.func @transform_7(%arg0: i32) -> (i32, i32) {
    %c0_i32 = arith.constant 0 : i32
    %c0_i32_0 = arith.constant 0 : i32
    %c0_i32_1 = arith.constant 0 : i32
    return %c0_i32, %c0_i32_0 : i32, i32
  }
  func.func @transform_8(%arg0: i32) -> (i32, i32) {
    %c0_i32 = arith.constant 0 : i32
    %c0_i32_0 = arith.constant 0 : i32
    %c0_i32_1 = arith.constant 0 : i32
    return %c0_i32, %c0_i32_0 : i32, i32
  }
  func.func @transform_9(%arg0: i32) -> (i32, i32) {
    %c0_i32 = arith.constant 0 : i32
    %c0_i32_0 = arith.constant 0 : i32
    return %arg0, %c0_i32 : i32, i32
  }
}

</mosaic_0001>

<bundles_post_ra>
// kernel: tpu_custom_call.1
= control target key start
LH: loop header
LB: loop body
LE: loop exit
PB: predicated region body
PF: predicated region fallthrough
CT: control target
= control target key end

     0   :  { %v7879_v2 = vmov 0   ;;  %s10483_s0 = inlined_call_operand.vmem [shape: f32[8,128], index: 0, kind: input, shape index: {}]   ;;  %s10484_s1 = inlined_call_operand.vmem [shape: bf16[128,256], index: 1, kind: input, shape index: {}]   ;;  %s10485_s2 = inlined_call_operand.vmem [shape: f32[1,256], index: 2, kind: input, shape index: {}]   ;;  %s10486_s3 = inlined_call_operand.vmem [shape: bf16[256,512], index: 3, kind: input, shape index: {}]   ;;  %s10487_s4 = inlined_call_operand.vmem [shape: f32[1,512], index: 4, kind: input, shape index: {}]   ;;  %s10488_s5 = inlined_call_operand.vmem [shape: bf16[512,1024], index: 5, kind: input, shape index: {}]   ;;  %s10489_s6 = inlined_call_operand.vmem [shape: f32[1,1024], index: 6, kind: input, shape index: {}]   ;;  %s10490_s7 = inlined_call_operand.vmem [shape: bf16[1024,784], index: 7, kind: input, shape index: {}]   ;;  %s10491_s8 = inlined_call_operand.vmem [shape: f32[1,784], index: 8, kind: input, shape index: {}]   ;;  %s10492_s9 = inlined_call_operand.hbm [shape: f32[8,784], index: 9, kind: output, shape index: {}]  }
   0x1   :  { %v7081_v0 = vld [vmem:[%s10484_s1 + $0x4] ss:$8 sps:$4 sm:$0xff]   ;;  %v7083_v1 = vld [vmem:[%s10484_s1] ss:$8 sps:$4 sm:$0xff]   ;;  %176 = vmatprep.mubr.bf16.mxu0 %v7879_v2  ;;  %v7084_v3 = vld [vmem:[%s10484_s1 + $0x14] ss:$8 sps:$4 sm:$0xff]  }
   0x2   :  { %144 = vmatprep.subr.bf16.mxu0 %v7081_v0  ;;  %v7086_v4 = vld [vmem:[%s10484_s1 + $0x10] ss:$8 sps:$4 sm:$0xff]   ;;  %v7087_v5 = vld [vmem:[%s10484_s1 + $0x24] ss:$8 sps:$4 sm:$0xff]   ;;  %v7089_v6 = vld [vmem:[%s10484_s1 + $0x20] ss:$8 sps:$4 sm:$0xff]  }
   0x3   :  { %145 = vmatpush1.bf16.msra.mxu0 %v7083_v1  ;;  %v7090_v7 = vld [vmem:[%s10484_s1 + $0x34] ss:$8 sps:$4 sm:$0xff]   ;;  %v7092_v8 = vld [vmem:[%s10484_s1 + $0x30] ss:$8 sps:$4 sm:$0xff]   ;;  %v7093_v9 = vld [vmem:[%s10484_s1 + $0x44] ss:$8 sps:$4 sm:$0xff]  }
   0x4   :  { %146 = vmatprep.subr.bf16.mxu0 %v7084_v3  ;;  %v7095_v10 = vld [vmem:[%s10484_s1 + $0x40] ss:$8 sps:$4 sm:$0xff]   ;;  %v7096_v11 = vld [vmem:[%s10484_s1 + $0x54] ss:$8 sps:$4 sm:$0xff]   ;;  %v7098_v12 = vld [vmem:[%s10484_s1 + $0x50] ss:$8 sps:$4 sm:$0xff]  }
   0x5   :  { %v7099_v13 = vld [vmem:[%s10484_s1 + $0x64] ss:$8 sps:$4 sm:$0xff]   ;;  %v7101_v14 = vld [vmem:[%s10484_s1 + $0x60] ss:$8 sps:$4 sm:$0xff]   ;;  %v7102_v15 = vld [vmem:[%s10484_s1 + $0x74] ss:$8 sps:$4 sm:$0xff]  }
   0x6   :  { %v7104_v16 = vld [vmem:[%s10484_s1 + $0x70] ss:$8 sps:$4 sm:$0xff]   ;;  %v34_v17 = vld [vmem:[%s10483_s0] sm:$0xff]  ;;  %v7155_v51 = vld [vmem:[%s10486_s3 + $0xc] ss:$16 sps:$4 sm:$0xff]  }
   0x7   :  { %147 = vmatpush1.bf16.msra.mxu0 %v7086_v4  ;;  %v7107_v18 = vld [vmem:[%s10486_s3 + $0x4] ss:$16 sps:$4 sm:$0xff]   ;;  %v7105_v19 = vld [vmem:[%s10486_s3] ss:$16 sps:$4 sm:$0xff]   ;;  %v35_v20 = vpack.c.bf16 %v34_v17, %v34_v17 }
   0x8   :  { %148 = vmatprep.subr.bf16.mxu0 %v7087_v5  ;;  %v7110_v21 = vld [vmem:[%s10486_s3 + $0x24] ss:$16 sps:$4 sm:$0xff]   ;;  %v7108_v22 = vld [vmem:[%s10486_s3 + $0x20] ss:$16 sps:$4 sm:$0xff]  }
   0x9   :  { %v7113_v23 = vld [vmem:[%s10486_s3 + $0x44] ss:$16 sps:$4 sm:$0xff]   ;;  %v7111_v24 = vld [vmem:[%s10486_s3 + $0x40] ss:$16 sps:$4 sm:$0xff]  }
   0xa   :  { %v7116_v25 = vld [vmem:[%s10486_s3 + $0x64] ss:$16 sps:$4 sm:$0xff]   ;;  %v7114_v26 = vld [vmem:[%s10486_s3 + $0x60] ss:$16 sps:$4 sm:$0xff]  }
   0xb   :  { %149 = vmatpush1.bf16.msra.mxu0 %v7089_v6  ;;  %v7119_v27 = vld [vmem:[%s10486_s3 + $0x84] ss:$16 sps:$4 sm:$0xff]   ;;  %v7117_v28 = vld [vmem:[%s10486_s3 + $0x80] ss:$16 sps:$4 sm:$0xff]  }
   0xc   :  { %150 = vmatprep.subr.bf16.mxu0 %v7090_v7  ;;  %v7122_v29 = vld [vmem:[%s10486_s3 + $0xa4] ss:$16 sps:$4 sm:$0xff]   ;;  %v7120_v30 = vld [vmem:[%s10486_s3 + $0xa0] ss:$16 sps:$4 sm:$0xff]  }
   0xd   :  { %v7125_v31 = vld [vmem:[%s10486_s3 + $0xc4] ss:$16 sps:$4 sm:$0xff]   ;;  %v7123_v32 = vld [vmem:[%s10486_s3 + $0xc0] ss:$16 sps:$4 sm:$0xff]  }
   0xe   :  { %v7128_v33 = vld [vmem:[%s10486_s3 + $0xe4] ss:$16 sps:$4 sm:$0xff]   ;;  %v7126_v34 = vld [vmem:[%s10486_s3 + $0xe0] ss:$16 sps:$4 sm:$0xff]  }
   0xf   :  { %151 = vmatpush1.bf16.msra.mxu0 %v7092_v8  ;;  %v7131_v35 = vld [vmem:[%s10486_s3 + $0x104] ss:$16 sps:$4 sm:$0xff]   ;;  %v7129_v36 = vld [vmem:[%s10486_s3 + $0x100] ss:$16 sps:$4 sm:$0xff]  }
  0x10   :  { %152 = vmatprep.subr.bf16.mxu0 %v7093_v9  ;;  %v7134_v37 = vld [vmem:[%s10486_s3 + $0x124] ss:$16 sps:$4 sm:$0xff]   ;;  %v7132_v38 = vld [vmem:[%s10486_s3 + $0x120] ss:$16 sps:$4 sm:$0xff]  }
  0x11   :  { %v7137_v39 = vld [vmem:[%s10486_s3 + $0x144] ss:$16 sps:$4 sm:$0xff]   ;;  %v7135_v40 = vld [vmem:[%s10486_s3 + $0x140] ss:$16 sps:$4 sm:$0xff]  }
  0x12   :  { %v7140_v41 = vld [vmem:[%s10486_s3 + $0x164] ss:$16 sps:$4 sm:$0xff]   ;;  %v7138_v42 = vld [vmem:[%s10486_s3 + $0x160] ss:$16 sps:$4 sm:$0xff]  }
  0x13   :  { %153 = vmatpush1.bf16.msra.mxu0 %v7095_v10  ;;  %v7143_v43 = vld [vmem:[%s10486_s3 + $0x184] ss:$16 sps:$4 sm:$0xff]   ;;  %v7141_v44 = vld [vmem:[%s10486_s3 + $0x180] ss:$16 sps:$4 sm:$0xff]  }
  0x14   :  { %154 = vmatprep.subr.bf16.mxu0 %v7096_v11  ;;  %v7146_v45 = vld [vmem:[%s10486_s3 + $0x1a4] ss:$16 sps:$4 sm:$0xff]   ;;  %v7144_v46 = vld [vmem:[%s10486_s3 + $0x1a0] ss:$16 sps:$4 sm:$0xff]  }
  0x15   :  { %v7149_v47 = vld [vmem:[%s10486_s3 + $0x1c4] ss:$16 sps:$4 sm:$0xff]   ;;  %v7147_v48 = vld [vmem:[%s10486_s3 + $0x1c0] ss:$16 sps:$4 sm:$0xff]  }
  0x16   :  { %v7152_v49 = vld [vmem:[%s10486_s3 + $0x1e4] ss:$16 sps:$4 sm:$0xff]   ;;  %v7150_v50 = vld [vmem:[%s10486_s3 + $0x1e0] ss:$16 sps:$4 sm:$0xff]  }
  0x17   :  { %155 = vmatpush1.bf16.msra.mxu0 %v7098_v12  ;;  %v685_v52 = vld [vmem:[%s10488_s5] sm:$0xff] }
  0x18   :  { %156 = vmatprep.subr.bf16.mxu0 %v7099_v13  ;;  %v689_v53 = vld [vmem:[%s10488_s5 + $0x20] sm:$0xff] }
  0x19   :  { %v6222_v54 = vcombine.high %v685_v52, %v689_v53  ;;  %v6221_v55 = vcombine.low %v685_v52, %v689_v53  ;;  %v693_v56 = vld [vmem:[%s10488_s5 + $0x40] sm:$0xff] }
  0x1a   :  { %v697_v57 = vld [vmem:[%s10488_s5 + $0x60] sm:$0xff] }
  0x1b   :  { %157 = vmatpush1.bf16.msra.mxu0 %v7101_v14  ;;  %v6230_v58 = vcombine.high %v693_v56, %v697_v57  ;;  %2263 = vmatprep.subr.bf16.mxu1 %v6222_v54  ;;  %v6229_v59 = vcombine.low %v693_v56, %v697_v57  ;;  %v701_v60 = vld [vmem:[%s10488_s5 + $0x80] sm:$0xff] }
  0x1c   :  { %158 = vmatprep.subr.bf16.mxu0 %v7102_v15  ;;  %2264 = vmatpush1.bf16.msra.mxu1 %v6221_v55  ;;  %v705_v61 = vld [vmem:[%s10488_s5 + $0xa0] sm:$0xff] }
  0x1d   :  { %2265 = vmatprep.subr.bf16.mxu1 %v6230_v58  ;;  %v6238_v62 = vcombine.high %v701_v60, %v705_v61  ;;  %v6237_v63 = vcombine.low %v701_v60, %v705_v61  ;;  %v709_v0 = vld [vmem:[%s10488_s5 + $0xc0] sm:$0xff] }
  0x1e   :  { %v713_v1 = vld [vmem:[%s10488_s5 + $0xe0] sm:$0xff] }
  0x1f   :  { %159 = vmatpush1.bf16.msra.mxu0 %v7104_v16  ;;  %v6246_v2 = vcombine.high %v709_v0, %v713_v1  ;;  %v6245_v3 = vcombine.low %v709_v0, %v713_v1  ;;  %v717_v4 = vld [vmem:[%s10488_s5 + $0x100] sm:$0xff] }
  0x20   :  { %595 = vmatprep.subr.bf16.mxu0 %v7107_v18  ;;  %2266 = vmatpush1.bf16.msra.mxu1 %v6229_v59  ;;  %v721_v5 = vld [vmem:[%s10488_s5 + $0x120] sm:$0xff] }
  0x21   :  { %2267 = vmatprep.subr.bf16.mxu1 %v6238_v62  ;;  %v6254_v6 = vcombine.high %v717_v4, %v721_v5  ;;  %v6253_v7 = vcombine.low %v717_v4, %v721_v5  ;;  %v725_v8 = vld [vmem:[%s10488_s5 + $0x140] sm:$0xff] }
  0x22   :  { %177 = vmatmul.mubr.bf16.vlgmr.msra.gmra.mrb[0].mxu0 %v35_v20  ;;  %v729_v9 = vld [vmem:[%s10488_s5 + $0x160] sm:$0xff] }
  0x23   :  { %596 = vmatpush1.bf16.msra.mxu0 %v7105_v19  ;;  %v6262_v10 = vcombine.high %v725_v8, %v729_v9  ;;  %v6261_v11 = vcombine.low %v725_v8, %v729_v9  ;;  %v733_v12 = vld [vmem:[%s10488_s5 + $0x180] sm:$0xff] }
  0x24   :  { %597 = vmatprep.subr.bf16.mxu0 %v7110_v21  ;;  %2268 = vmatpush1.bf16.msra.mxu1 %v6237_v63  ;;  %v737_v13 = vld [vmem:[%s10488_s5 + $0x1a0] sm:$0xff] }
  0x25   :  { %2269 = vmatprep.subr.bf16.mxu1 %v6246_v2  ;;  %v6270_v14 = vcombine.high %v733_v12, %v737_v13  ;;  %v6269_v15 = vcombine.low %v733_v12, %v737_v13  ;;  %v741_v16 = vld [vmem:[%s10488_s5 + $0x1c0] sm:$0xff] }
  0x26   :  { %v745_v17 = vld [vmem:[%s10488_s5 + $0x1e0] sm:$0xff] }
  0x27   :  { %598 = vmatpush1.bf16.msra.mxu0 %v7108_v22  ;;  %v6278_v18 = vcombine.high %v741_v16, %v745_v17  ;;  %v6277_v19 = vcombine.low %v741_v16, %v745_v17  ;;  %v749_v20 = vld [vmem:[%s10488_s5 + $0x200] sm:$0xff] }
  0x28   :  { %599 = vmatprep.subr.bf16.mxu0 %v7113_v23  ;;  %2270 = vmatpush1.bf16.msra.mxu1 %v6245_v3  ;;  %v753_v21 = vld [vmem:[%s10488_s5 + $0x220] sm:$0xff] }
  0x29   :  { %2271 = vmatprep.subr.bf16.mxu1 %v6254_v6  ;;  %v6286_v22 = vcombine.high %v749_v20, %v753_v21  ;;  %v6285_v23 = vcombine.low %v749_v20, %v753_v21 }
  0x2b   :  { %600 = vmatpush1.bf16.msra.mxu0 %v7111_v24  ;;  %v757_v24 = vld [vmem:[%s10488_s5 + $0x240] sm:$0xff] }
  0x2c   :  { %601 = vmatprep.subr.bf16.mxu0 %v7116_v25  ;;  %2272 = vmatpush1.bf16.msra.mxu1 %v6253_v7  ;;  %v761_v25 = vld [vmem:[%s10488_s5 + $0x260] sm:$0xff] }
  0x2d   :  { %2273 = vmatprep.subr.bf16.mxu1 %v6262_v10 }
  0x2f   :  { %602 = vmatpush1.bf16.msra.mxu0 %v7114_v26  ;;  %v6294_v26 = vcombine.high %v757_v24, %v761_v25 }
  0x30   :  { %603 = vmatprep.subr.bf16.mxu0 %v7119_v27  ;;  %2274 = vmatpush1.bf16.msra.mxu1 %v6261_v11  ;;  %v6293_v27 = vcombine.low %v757_v24, %v761_v25 }
  0x31   :  { %2275 = vmatprep.subr.bf16.mxu1 %v6270_v14 }
  0x33   :  { %604 = vmatpush1.bf16.msra.mxu0 %v7117_v28  ;;  %v765_v28 = vld [vmem:[%s10488_s5 + $0x280] sm:$0xff] }
  0x34   :  { %605 = vmatprep.subr.bf16.mxu0 %v7122_v29  ;;  %2276 = vmatpush1.bf16.msra.mxu1 %v6269_v15  ;;  %v769_v29 = vld [vmem:[%s10488_s5 + $0x2a0] sm:$0xff] }
  0x35   :  { %2277 = vmatprep.subr.bf16.mxu1 %v6278_v18 }
  0x37   :  { %606 = vmatpush1.bf16.msra.mxu0 %v7120_v30  ;;  %v6302_v30 = vcombine.high %v765_v28, %v769_v29 }
  0x38   :  { %607 = vmatprep.subr.bf16.mxu0 %v7125_v31  ;;  %2278 = vmatpush1.bf16.msra.mxu1 %v6277_v19  ;;  %v54_v31 = vlaneseq }
  0x39   :  { %2279 = vmatprep.subr.bf16.mxu1 %v6286_v22 }
  0x3b   :  { %608 = vmatpush1.bf16.msra.mxu0 %v7123_v32  ;;  %v6301_v32 = vcombine.low %v765_v28, %v769_v29 }
  0x3c   :  { %609 = vmatprep.subr.bf16.mxu0 %v7128_v33  ;;  %2280 = vmatpush1.bf16.msra.mxu1 %v6285_v23  ;;  %v773_v33 = vld [vmem:[%s10488_s5 + $0x2c0] sm:$0xff] }
  0x3d   :  { %2281 = vmatprep.subr.bf16.mxu1 %v6294_v26 }
  0x3f   :  { %610 = vmatpush1.bf16.msra.mxu0 %v7126_v34  ;;  %v777_v34 = vld [vmem:[%s10488_s5 + $0x2e0] sm:$0xff] }
  0x40   :  { %611 = vmatprep.subr.bf16.mxu0 %v7131_v35  ;;  %2282 = vmatpush1.bf16.msra.mxu1 %v6293_v27  ;;  %v6310_v35 = vcombine.high %v773_v33, %v777_v34 }
  0x41   :  { %2283 = vmatprep.subr.bf16.mxu1 %v6302_v30 }
  0x43   :  { %612 = vmatpush1.bf16.msra.mxu0 %v7129_v36  ;;  %v8153_v36 = vshrl.u32 %v54_v31, 7 }
  0x44   :  { %613 = vmatprep.subr.bf16.mxu0 %v7134_v37  ;;  %2284 = vmatpush1.bf16.msra.mxu1 %v6301_v32  ;;  %v6309_v37 = vcombine.low %v773_v33, %v777_v34 }
  0x45   :  { %2285 = vmatprep.subr.bf16.mxu1 %v6310_v35 }
  0x47   :  { %614 = vmatpush1.bf16.msra.mxu0 %v7132_v38  ;;  %v781_v38 = vld [vmem:[%s10488_s5 + $0x300] sm:$0xff] }
  0x48   :  { %615 = vmatprep.subr.bf16.mxu0 %v7137_v39  ;;  %v785_v39 = vld [vmem:[%s10488_s5 + $0x320] sm:$0xff]  ;;  %2286 = vmatpush1.bf16.msra.mxu1 %v6309_v37 }
  0x4b   :  { %616 = vmatpush1.bf16.msra.mxu0 %v7135_v40  ;;  %v6318_v40 = vcombine.high %v781_v38, %v785_v39 }
  0x4c   :  { %617 = vmatprep.subr.bf16.mxu0 %v7140_v41  ;;  %v8162_v41 = vsub.s32 0, %v8153_v36 }
  0x4d   :  { %2287 = vmatprep.subr.bf16.mxu1 %v6318_v40 }
  0x4f   :  { %618 = vmatpush1.bf16.msra.mxu0 %v7138_v42  ;;  %v6317_v42 = vcombine.low %v781_v38, %v785_v39 }
  0x50   :  { %619 = vmatprep.subr.bf16.mxu0 %v7143_v43  ;;  %v52_v43 = vld [vmem:[%s10485_s2] sm:$0x3] }
  0x51   :  { %2288 = vmatpush1.bf16.msra.mxu1 %v6317_v42 }
  0x53   :  { %620 = vmatpush1.bf16.msra.mxu0 %v7141_v44  ;;  %v8168_v44 = vsub.s32 1, %v8153_v36 }
  0x54   :  { %621 = vmatprep.subr.bf16.mxu0 %v7146_v45  ;;  %v789_v45 = vld [vmem:[%s10488_s5 + $0x340] sm:$0xff] }
  0x57   :  { %622 = vmatpush1.bf16.msra.mxu0 %v7144_v46  ;;  %v793_v46 = vld [vmem:[%s10488_s5 + $0x360] sm:$0xff] }
  0x58   :  { %623 = vmatprep.subr.bf16.mxu0 %v7149_v47  ;;  %v6326_v47 = vcombine.high %v789_v45, %v793_v46 }
  0x5a   :  { %2289 = vmatprep.subr.bf16.mxu1 %v6326_v47 }
  0x5b   :  { %624 = vmatpush1.bf16.msra.mxu0 %v7147_v48  ;;  %v57_v48 = vrot.slane %v52_v43, %v8162_v41 }
  0x5c   :  { %625 = vmatprep.subr.bf16.mxu0 %v7152_v49  ;;  %v6325_v49 = vcombine.low %v789_v45, %v793_v46 }
  0x5f   :  { %626 = vmatpush1.bf16.msra.mxu0 %v7150_v50  ;;  %v61_v50 = vrot.slane %v52_v43, %v8168_v44 }
  0x60   :  { %636 = vmatprep.subr.bf16.mxu0 %v7155_v51 }
  0x61   :  { %14 = vsyncpa [#allocation3], 0  ;;  %2290 = vmatpush1.bf16.msra.mxu1 %v6325_v49  ;;  %v7153_v60 = vld [vmem:[%s10486_s3 + $0x8] ss:$16 sps:$4 sm:$0xff]   ;;  %v7158_v62 = vld [vmem:[%s10486_s3 + $0x2c] ss:$16 sps:$4 sm:$0xff]  }
  0x62   :  { %v7156_v63 = vld [vmem:[%s10486_s3 + $0x28] ss:$16 sps:$4 sm:$0xff]   ;;  %v7161_v0 = vld [vmem:[%s10486_s3 + $0x4c] ss:$16 sps:$4 sm:$0xff]   ;;  %vm6125_vm0 = vcmask 130048  }
  0x63   :  { %v7159_v1 = vld [vmem:[%s10486_s3 + $0x48] ss:$16 sps:$4 sm:$0xff]   ;;  %v7164_v2 = vld [vmem:[%s10486_s3 + $0x6c] ss:$16 sps:$4 sm:$0xff]  }
  0x64   :  { %v7162_v3 = vld [vmem:[%s10486_s3 + $0x68] ss:$16 sps:$4 sm:$0xff]   ;;  %v7167_v4 = vld [vmem:[%s10486_s3 + $0x8c] ss:$16 sps:$4 sm:$0xff]  }
  0x65   :  { %v7165_v5 = vld [vmem:[%s10486_s3 + $0x88] ss:$16 sps:$4 sm:$0xff]   ;;  %v7170_v6 = vld [vmem:[%s10486_s3 + $0xac] ss:$16 sps:$4 sm:$0xff]  }
  0x66   :  { %v7168_v7 = vld [vmem:[%s10486_s3 + $0xa8] ss:$16 sps:$4 sm:$0xff]   ;;  %v7173_v8 = vld [vmem:[%s10486_s3 + $0xcc] ss:$16 sps:$4 sm:$0xff]  }
  0x67   :  { %v7171_v9 = vld [vmem:[%s10486_s3 + $0xc8] ss:$16 sps:$4 sm:$0xff]   ;;  %v7176_v10 = vld [vmem:[%s10486_s3 + $0xec] ss:$16 sps:$4 sm:$0xff]  }
  0x68   :  { %v7174_v11 = vld [vmem:[%s10486_s3 + $0xe8] ss:$16 sps:$4 sm:$0xff]   ;;  %v7179_v12 = vld [vmem:[%s10486_s3 + $0x10c] ss:$16 sps:$4 sm:$0xff]  }
  0x69   :  { %v7177_v13 = vld [vmem:[%s10486_s3 + $0x108] ss:$16 sps:$4 sm:$0xff]   ;;  %v7182_v14 = vld [vmem:[%s10486_s3 + $0x12c] ss:$16 sps:$4 sm:$0xff]  }
  0x6a   :  { %v7180_v15 = vld [vmem:[%s10486_s3 + $0x128] ss:$16 sps:$4 sm:$0xff]   ;;  %v7185_v16 = vld [vmem:[%s10486_s3 + $0x14c] ss:$16 sps:$4 sm:$0xff]  }
  0x6b   :  { %v7183_v17 = vld [vmem:[%s10486_s3 + $0x148] ss:$16 sps:$4 sm:$0xff]   ;;  %v7188_v18 = vld [vmem:[%s10486_s3 + $0x16c] ss:$16 sps:$4 sm:$0xff]  }
  0x6c   :  { %v7186_v19 = vld [vmem:[%s10486_s3 + $0x168] ss:$16 sps:$4 sm:$0xff]   ;;  %v7191_v20 = vld [vmem:[%s10486_s3 + $0x18c] ss:$16 sps:$4 sm:$0xff]  }
  0x6d   :  { %v7189_v21 = vld [vmem:[%s10486_s3 + $0x188] ss:$16 sps:$4 sm:$0xff]   ;;  %v7194_v22 = vld [vmem:[%s10486_s3 + $0x1ac] ss:$16 sps:$4 sm:$0xff]  }
  0x6e   :  { %v7192_v23 = vld [vmem:[%s10486_s3 + $0x1a8] ss:$16 sps:$4 sm:$0xff]   ;;  %v7197_v24 = vld [vmem:[%s10486_s3 + $0x1cc] ss:$16 sps:$4 sm:$0xff]  }
  0x6f   :  { %v7195_v25 = vld [vmem:[%s10486_s3 + $0x1c8] ss:$16 sps:$4 sm:$0xff]   ;;  %v7200_v26 = vld [vmem:[%s10486_s3 + $0x1ec] ss:$16 sps:$4 sm:$0xff]  }
  0x70   :  { %v686_v27 = vld [vmem:[%s10488_s5 + $0x8] sm:$0xff] }
  0x71   :  { %v690_v28 = vld [vmem:[%s10488_s5 + $0x28] sm:$0xff] }
  0x72   :  { %v7198_v29 = vld [vmem:[%s10486_s3 + $0x1e8] ss:$16 sps:$4 sm:$0xff]   ;;  %v6224_v30 = vcombine.high %v686_v27, %v690_v28  ;;  %v6223_v33 = vcombine.low %v686_v27, %v690_v28 }
  0x73   :  { %v694_v31 = vld [vmem:[%s10488_s5 + $0x48] sm:$0xff] }
  0x74   :  { %v698_v32 = vld [vmem:[%s10488_s5 + $0x68] sm:$0xff] }
  0x75   :  { %v6232_v34 = vcombine.high %v694_v31, %v698_v32  ;;  %v702_v35 = vld [vmem:[%s10488_s5 + $0x88] sm:$0xff]  ;;  %v6231_v38 = vcombine.low %v694_v31, %v698_v32 }
  0x76   :  { %v706_v37 = vld [vmem:[%s10488_s5 + $0xa8] sm:$0xff] }
  0x77   :  { %v6240_v39 = vcombine.high %v702_v35, %v706_v37  ;;  %v710_v40 = vld [vmem:[%s10488_s5 + $0xc8] sm:$0xff]  ;;  %v6239_v43 = vcombine.low %v702_v35, %v706_v37 }
  0x78   :  { %v714_v42 = vld [vmem:[%s10488_s5 + $0xe8] sm:$0xff] }
  0x79   :  { %v6248_v45 = vcombine.high %v710_v40, %v714_v42  ;;  %v718_v46 = vld [vmem:[%s10488_s5 + $0x108] sm:$0xff] }
  0x7a   :  { %v722_v47 = vld [vmem:[%s10488_s5 + $0x128] sm:$0xff] }
  0x7b   :  { %v6256_v49 = vcombine.high %v718_v46, %v722_v47 }
  0xf5   :  { %v178_v51 = vpop.f32.mrb[0].mxu0 }
  0xf6   :  { %v179_v52 = vadd.f32 %v178_v51, %v57_v48  ;;  %v180_v53 = vpop.f32.mrb[1].mxu0  ;;  %v6247_v48 = vcombine.low %v710_v40, %v714_v42  ;;  %v730_v51 = vld [vmem:[%s10488_s5 + $0x168] sm:$0xff] }
  0xf7   :  { %v181_v54 = vadd.f32 %v180_v53, %v61_v50  ;;  %v182_v55 = vpop.f32.mrb[2].mxu0  ;;  %v726_v50 = vld [vmem:[%s10488_s5 + $0x148] sm:$0xff] }
  0xf8   :  { %v185_v56 = vmax.f32 %v179_v52, 0.0  ;;  %v183_v57 = vpop.f32.mrb[3].mxu0  ;;  %v6255_v52 = vcombine.low %v718_v46, %v722_v47  ;;  %v6264_v53 = vcombine.high %v726_v50, %v730_v51  ;;  %v738_v55 = vld [vmem:[%s10488_s5 + $0x1a8] sm:$0xff] }
  0xf9   :  { %v186_v58 = vmax.f32 %v181_v54, 0.0  ;;  %v734_v54 = vld [vmem:[%s10488_s5 + $0x188] sm:$0xff]  ;;  %v797_v57 = vld [vmem:[%s10488_s5 + $0x380] sm:$0xff] }
  0xfa   :  { %v8181_v61 = vpack.c.bf16 %v185_v56, %v185_v56  ;;  %v6263_v56 = vcombine.low %v726_v50, %v730_v51  ;;  %v8414_v50 = vld [vmem:[%s10487_s4] sm:$0xf] }
  0xfb   :  { %v188_v59 = vpack.c.bf16 %v186_v58, %v186_v58  ;;  %v801_v58 = vld [vmem:[%s10488_s5 + $0x3a0] sm:$0xff]  ;;  %v258_v51 = vrot.slane %v8414_v50, %v8162_v41 }
  0xfd   :  { %627 = vmatprep.mubr.bf16.mxu0 %v188_v59 }
  0xfe   :  { %628 = vmatmul.mubr.bf16.vlgmr.msra.gmra.mrb[4].mxu0 %v8181_v61 }
  0xff   :  { %637 = vmatpush1.bf16.msra.mxu0 %v7153_v60  ;;  %668 = vmatprep.mubr.bf16.mxu0 %v188_v59  ;;  %v6272_v59 = vcombine.high %v734_v54, %v738_v55  ;;  %v6334_v60 = vcombine.high %v797_v57, %v801_v58 }
 0x100   :  { %638 = vmatprep.subr.bf16.mxu0 %v7158_v62  ;;  %v746_v62 = vld [vmem:[%s10488_s5 + $0x1e8] sm:$0xff] }
 0x101   :  { %2291 = vmatprep.subr.bf16.mxu1 %v6334_v60  ;;  %v821_v60 = vld [vmem:[%s10488_s5 + $0x440] sm:$0xff] }
 0x103   :  { %639 = vmatpush1.bf16.msra.mxu0 %v7156_v63  ;;  %v6333_v63 = vcombine.low %v797_v57, %v801_v58 }
 0x104   :  { %640 = vmatprep.subr.bf16.mxu0 %v7161_v0  ;;  %v6271_v0 = vcombine.low %v734_v54, %v738_v55 }
 0x105   :  { %2292 = vmatpush1.bf16.msra.mxu1 %v6333_v63  ;;  %v822_v63 = vld [vmem:[%s10488_s5 + $0x448] sm:$0xff] }
 0x107   :  { %641 = vmatpush1.bf16.msra.mxu0 %v7159_v1  ;;  %v805_v1 = vld [vmem:[%s10488_s5 + $0x3c0] sm:$0xff] }
 0x108   :  { %642 = vmatprep.subr.bf16.mxu0 %v7164_v2  ;;  %v809_v2 = vld [vmem:[%s10488_s5 + $0x3e0] sm:$0xff] }
 0x10b   :  { %643 = vmatpush1.bf16.msra.mxu0 %v7162_v3 }
 0x10c   :  { %644 = vmatprep.subr.bf16.mxu0 %v7167_v4  ;;  %v6342_v4 = vcombine.high %v805_v1, %v809_v2 }
 0x10e   :  { %2293 = vmatprep.subr.bf16.mxu1 %v6342_v4 }
 0x10f   :  { %645 = vmatpush1.bf16.msra.mxu0 %v7165_v5  ;;  %v750_v5 = vld [vmem:[%s10488_s5 + $0x208] sm:$0xff] }
 0x110   :  { %646 = vmatprep.subr.bf16.mxu0 %v7170_v6  ;;  %v754_v6 = vld [vmem:[%s10488_s5 + $0x228] sm:$0xff] }
 0x113   :  { %647 = vmatpush1.bf16.msra.mxu0 %v7168_v7  ;;  %v6341_v7 = vcombine.low %v805_v1, %v809_v2 }
 0x114   :  { %648 = vmatprep.subr.bf16.mxu0 %v7173_v8 }
 0x115   :  { %2294 = vmatpush1.bf16.msra.mxu1 %v6341_v7  ;;  %v830_v7 = vld [vmem:[%s10488_s5 + $0x488] sm:$0xff] }
 0x117   :  { %649 = vmatpush1.bf16.msra.mxu0 %v7171_v9  ;;  %v8344_v9 = vld [vmem:[%s10488_s5 + $0x400] sm:$0xff] }
 0x118   :  { %650 = vmatprep.subr.bf16.mxu0 %v7176_v10  ;;  %v8349_v10 = vld [vmem:[%s10488_s5 + $0x420] sm:$0xff] }
 0x11b   :  { %651 = vmatpush1.bf16.msra.mxu0 %v7174_v11  ;;  %v8354_v11 = vld [vmem:[%s10488_s5 + $0x408] sm:$0xff] }
 0x11c   :  { %652 = vmatprep.subr.bf16.mxu0 %v7179_v12  ;;  %v6288_v12 = vcombine.high %v750_v5, %v754_v6 }
 0x11f   :  { %653 = vmatpush1.bf16.msra.mxu0 %v7177_v13  ;;  %v6350_v13 = vcombine.high %v8344_v9, %v8349_v10 }
 0x120   :  { %654 = vmatprep.subr.bf16.mxu0 %v7182_v14  ;;  %v8361_v14 = vld [vmem:[%s10488_s5 + $0x428] sm:$0xff] }
 0x121   :  { %2304 = vmatprep.subr.bf16.mxu1 %v6350_v13 }
 0x123   :  { %655 = vmatpush1.bf16.msra.mxu0 %v7180_v15  ;;  %v758_v15 = vld [vmem:[%s10488_s5 + $0x248] sm:$0xff] }
 0x124   :  { %656 = vmatprep.subr.bf16.mxu0 %v7185_v16  ;;  %v762_v16 = vld [vmem:[%s10488_s5 + $0x268] sm:$0xff] }
 0x127   :  { %657 = vmatpush1.bf16.msra.mxu0 %v7183_v17  ;;  %v6349_v17 = vcombine.low %v8344_v9, %v8349_v10  ;;  %v838_v9 = vld [vmem:[%s10488_s5 + $0x4c8] sm:$0xff] }
 0x128   :  { %658 = vmatprep.subr.bf16.mxu0 %v7188_v18  ;;  %v6351_v18 = vcombine.low %v8354_v11, %v8361_v14  ;;  %v842_v10 = vld [vmem:[%s10488_s5 + $0x4e8] sm:$0xff] }
 0x12b   :  { %659 = vmatpush1.bf16.msra.mxu0 %v7186_v19  ;;  %v6287_v19 = vcombine.low %v750_v5, %v754_v6  ;;  %v829_v5 = vld [vmem:[%s10488_s5 + $0x480] sm:$0xff] }
 0x12c   :  { %660 = vmatprep.subr.bf16.mxu0 %v7191_v20  ;;  %v6296_v20 = vcombine.high %v758_v15, %v762_v16  ;;  %v833_v6 = vld [vmem:[%s10488_s5 + $0x4a0] sm:$0xff] }
 0x12f   :  { %661 = vmatpush1.bf16.msra.mxu0 %v7189_v21  ;;  %v766_v21 = vld [vmem:[%s10488_s5 + $0x288] sm:$0xff] }
 0x130   :  { %662 = vmatprep.subr.bf16.mxu0 %v7194_v22  ;;  %v770_v22 = vld [vmem:[%s10488_s5 + $0x2a8] sm:$0xff] }
 0x131   :  { %v6303_v27 = vcombine.low %v766_v21, %v770_v22 }
 0x133   :  { %663 = vmatpush1.bf16.msra.mxu0 %v7192_v23  ;;  %v6295_v23 = vcombine.low %v758_v15, %v762_v16  ;;  %v6366_v15 = vcombine.high %v829_v5, %v833_v6 }
 0x134   :  { %664 = vmatprep.subr.bf16.mxu0 %v7197_v24  ;;  %v6304_v24 = vcombine.high %v766_v21, %v770_v22  ;;  %v845_v21 = vld [vmem:[%s10488_s5 + $0x500] sm:$0xff] }
 0x135   :  { %v849_v22 = vld [vmem:[%s10488_s5 + $0x520] sm:$0xff] }
 0x137   :  { %665 = vmatpush1.bf16.msra.mxu0 %v7195_v25  ;;  %v774_v25 = vld [vmem:[%s10488_s5 + $0x2c8] sm:$0xff] }
 0x138   :  { %666 = vmatprep.subr.bf16.mxu0 %v7200_v26  ;;  %v778_v26 = vld [vmem:[%s10488_s5 + $0x2e8] sm:$0xff] }
 0x139   :  { %v6312_v28 = vcombine.high %v774_v25, %v778_v26  ;;  %v6311_v31 = vcombine.low %v774_v25, %v778_v26  ;;  %v6375_v26 = vcombine.low %v838_v9, %v842_v10 }
 0x13b   :  { %667 = vmatpush1.bf16.msra.mxu0 %v7198_v29  ;;  %v782_v29 = vld [vmem:[%s10488_s5 + $0x308] sm:$0xff] }
 0x13c   :  { %2345 = vmatprep.subr.bf16.mxu0 %v6224_v30  ;;  %v786_v30 = vld [vmem:[%s10488_s5 + $0x328] sm:$0xff] }
 0x13d   :  { %v6320_v32 = vcombine.high %v782_v29, %v786_v30  ;;  %v6319_v35 = vcombine.low %v782_v29, %v786_v30  ;;  %v853_v29 = vld [vmem:[%s10488_s5 + $0x540] sm:$0xff] }
 0x13e   :  { %669 = vmatmul.mubr.bf16.vlgmr.msra.gmra.mrb[8].mxu0 %v8181_v61  ;;  %v742_v61 = vld [vmem:[%s10488_s5 + $0x1c8] sm:$0xff]  ;;  %v857_v30 = vld [vmem:[%s10488_s5 + $0x560] sm:$0xff] }
 0x13f   :  { %2346 = vmatpush1.bf16.msra.mxu0 %v6223_v33  ;;  %v6280_v3 = vcombine.high %v742_v61, %v746_v62  ;;  %v6279_v8 = vcombine.low %v742_v61, %v746_v62  ;;  %v790_v33 = vld [vmem:[%s10488_s5 + $0x348] sm:$0xff]  ;;  %v825_v62 = vld [vmem:[%s10488_s5 + $0x460] sm:$0xff] }
 0x140   :  { %2347 = vmatprep.subr.bf16.mxu0 %v6232_v34  ;;  %v794_v34 = vld [vmem:[%s10488_s5 + $0x368] sm:$0xff] }
 0x141   :  { %v6328_v37 = vcombine.high %v790_v33, %v794_v34  ;;  %v6327_v40 = vcombine.low %v790_v33, %v794_v34  ;;  %v6381_v33 = vcombine.low %v845_v21, %v849_v22 }
 0x143   :  { %2348 = vmatpush1.bf16.msra.mxu0 %v6231_v38  ;;  %v798_v38 = vld [vmem:[%s10488_s5 + $0x388] sm:$0xff] }
 0x144   :  { %2349 = vmatprep.subr.bf16.mxu0 %v6240_v39  ;;  %v802_v39 = vld [vmem:[%s10488_s5 + $0x3a8] sm:$0xff] }
 0x145   :  { %v6336_v42 = vcombine.high %v798_v38, %v802_v39  ;;  %v6335_v46 = vcombine.low %v798_v38, %v802_v39  ;;  %v861_v38 = vld [vmem:[%s10488_s5 + $0x580] sm:$0xff] }
 0x146   :  { %v865_v39 = vld [vmem:[%s10488_s5 + $0x5a0] sm:$0xff] }
 0x147   :  { %2350 = vmatpush1.bf16.msra.mxu0 %v6239_v43  ;;  %v806_v43 = vld [vmem:[%s10488_s5 + $0x3c8] sm:$0xff] }
 0x148   :  { %2351 = vmatprep.subr.bf16.mxu0 %v6248_v45  ;;  %v810_v45 = vld [vmem:[%s10488_s5 + $0x3e8] sm:$0xff] }
 0x149   :  { %v6344_v47 = vcombine.high %v806_v43, %v810_v45 }
 0x14b   :  { %2352 = vmatpush1.bf16.msra.mxu0 %v6247_v48  ;;  %v6343_v48 = vcombine.low %v806_v43, %v810_v45  ;;  %v6389_v43 = vcombine.low %v853_v29, %v857_v30 }
 0x14c   :  { %2353 = vmatprep.subr.bf16.mxu0 %v6256_v49  ;;  %v6352_v49 = vcombine.high %v8354_v11, %v8361_v14  ;;  %v6365_v11 = vcombine.low %v829_v5, %v833_v6  ;;  %v886_v5 = vld [vmem:[%s10488_s5 + $0x648] sm:$0xff] }
 0x14d   :  { %v890_v6 = vld [vmem:[%s10488_s5 + $0x668] sm:$0xff] }
 0x14f   :  { %2354 = vmatpush1.bf16.msra.mxu0 %v6255_v52  ;;  %v262_v52 = vrot.slane %v8414_v50, %v8168_v44 }
 0x150   :  { %2355 = vmatprep.subr.bf16.mxu0 %v6264_v53 }
 0x153   :  { %2356 = vmatpush1.bf16.msra.mxu0 %v6263_v56 }
 0x154   :  { %2357 = vmatprep.subr.bf16.mxu0 %v6272_v59 }
 0x157   :  { %2358 = vmatpush1.bf16.msra.mxu0 %v6271_v0  ;;  %v826_v0 = vld [vmem:[%s10488_s5 + $0x468] sm:$0xff] }
 0x158   :  { %2359 = vmatprep.subr.bf16.mxu0 %v6280_v3  ;;  %v6358_v3 = vcombine.high %v821_v60, %v825_v62  ;;  %v6360_v4 = vcombine.high %v822_v63, %v826_v0  ;;  %v6359_v13 = vcombine.low %v822_v63, %v826_v0 }
 0x15b   :  { %2360 = vmatpush1.bf16.msra.mxu0 %v6279_v8  ;;  %v834_v8 = vld [vmem:[%s10488_s5 + $0x4a8] sm:$0xff] }
 0x15c   :  { %2361 = vmatprep.subr.bf16.mxu0 %v6288_v12  ;;  %v6357_v12 = vcombine.low %v821_v60, %v825_v62  ;;  %v6368_v16 = vcombine.high %v830_v7, %v834_v8  ;;  %v6367_v14 = vcombine.low %v830_v7, %v834_v8  ;;  %v882_v60 = vld [vmem:[%s10488_s5 + $0x628] sm:$0xff] }
 0x15f   :  { %2362 = vmatpush1.bf16.msra.mxu0 %v6287_v19  ;;  %v837_v19 = vld [vmem:[%s10488_s5 + $0x4c0] sm:$0xff] }
 0x160   :  { %2363 = vmatprep.subr.bf16.mxu0 %v6296_v20  ;;  %v841_v20 = vld [vmem:[%s10488_s5 + $0x4e0] sm:$0xff] }
 0x161   :  { %v6373_v25 = vcombine.low %v837_v19, %v841_v20 }
 0x163   :  { %2364 = vmatpush1.bf16.msra.mxu0 %v6295_v23  ;;  %v846_v23 = vld [vmem:[%s10488_s5 + $0x508] sm:$0xff] }
 0x164   :  { %2365 = vmatprep.subr.bf16.mxu0 %v6304_v24  ;;  %v850_v24 = vld [vmem:[%s10488_s5 + $0x528] sm:$0xff] }
 0x165   :  { %v6383_v34 = vcombine.low %v846_v23, %v850_v24 }
 0x167   :  { %2366 = vmatpush1.bf16.msra.mxu0 %v6303_v27  ;;  %v6382_v27 = vcombine.high %v845_v21, %v849_v22  ;;  %v902_v21 = vld [vmem:[%s10488_s5 + $0x6c8] sm:$0xff] }
 0x168   :  { %2367 = vmatprep.subr.bf16.mxu0 %v6312_v28  ;;  %v6384_v28 = vcombine.high %v846_v23, %v850_v24  ;;  %v906_v22 = vld [vmem:[%s10488_s5 + $0x6e8] sm:$0xff] }
 0x16b   :  { %2368 = vmatpush1.bf16.msra.mxu0 %v6311_v31  ;;  %v854_v31 = vld [vmem:[%s10488_s5 + $0x548] sm:$0xff] }
 0x16c   :  { %2369 = vmatprep.subr.bf16.mxu0 %v6320_v32  ;;  %v858_v32 = vld [vmem:[%s10488_s5 + $0x568] sm:$0xff] }
 0x16d   :  { %v6391_v45 = vcombine.low %v854_v31, %v858_v32 }
 0x16f   :  { %2370 = vmatpush1.bf16.msra.mxu0 %v6319_v35  ;;  %v6390_v35 = vcombine.high %v853_v29, %v857_v30  ;;  %v910_v29 = vld [vmem:[%s10488_s5 + $0x708] sm:$0xff] }
 0x170   :  { %2371 = vmatprep.subr.bf16.mxu0 %v6328_v37  ;;  %v6392_v37 = vcombine.high %v854_v31, %v858_v32  ;;  %v914_v30 = vld [vmem:[%s10488_s5 + $0x728] sm:$0xff]  ;;  %v6439_v32 = vcombine.low %v902_v21, %v906_v22 }
 0x173   :  { %2372 = vmatpush1.bf16.msra.mxu0 %v6327_v40  ;;  %v862_v40 = vld [vmem:[%s10488_s5 + $0x588] sm:$0xff] }
 0x174   :  { %2373 = vmatprep.subr.bf16.mxu0 %v6336_v42  ;;  %v866_v42 = vld [vmem:[%s10488_s5 + $0x5a8] sm:$0xff] }
 0x177   :  { %2374 = vmatpush1.bf16.msra.mxu0 %v6335_v46  ;;  %v6398_v46 = vcombine.high %v861_v38, %v865_v39 }
 0x178   :  { %2375 = vmatprep.subr.bf16.mxu0 %v6344_v47  ;;  %v6400_v47 = vcombine.high %v862_v40, %v866_v42 }
 0x17b   :  { %2376 = vmatpush1.bf16.msra.mxu0 %v6343_v48  ;;  %v869_v48 = vld [vmem:[%s10488_s5 + $0x5c0] sm:$0xff] }
 0x17c   :  { %2386 = vmatprep.subr.bf16.mxu0 %v6352_v49  ;;  %v873_v49 = vld [vmem:[%s10488_s5 + $0x5e0] sm:$0xff] }
 0x1d1   :  { %v629_v53 = vpop.f32.mrb[4].mxu0 }
 0x1d2   :  { %v630_v54 = vadd.f32 %v629_v53, %v258_v51  ;;  %v631_v55 = vpop.f32.mrb[5].mxu0  ;;  %v870_v51 = vld [vmem:[%s10488_s5 + $0x5c8] sm:$0xff]  ;;  %v6397_v53 = vcombine.low %v861_v38, %v865_v39 }
 0x1d3   :  { %v632_v56 = vadd.f32 %v631_v55, %v262_v52  ;;  %v633_v57 = vpop.f32.mrb[6].mxu0  ;;  %v874_v52 = vld [vmem:[%s10488_s5 + $0x5e8] sm:$0xff]  ;;  %v6406_v55 = vcombine.high %v869_v48, %v873_v49 }
 0x1d4   :  { %v677_v58 = vmax.f32 %v630_v54, 0.0  ;;  %v634_v59 = vpop.f32.mrb[7].mxu0  ;;  %v6399_v54 = vcombine.low %v862_v40, %v866_v42  ;;  %v877_v57 = vld [vmem:[%s10488_s5 + $0x600] sm:$0xff]  ;;  %v6407_v62 = vcombine.low %v870_v51, %v874_v52  ;;  %v918_v38 = vld [vmem:[%s10488_s5 + $0x748] sm:$0xff]  ;;  %v6447_v42 = vcombine.low %v910_v29, %v914_v30 }
 0x1d5   :  { %v678_v61 = vmax.f32 %v632_v56, 0.0  ;;  %v6408_v56 = vcombine.high %v870_v51, %v874_v52  ;;  %v878_v59 = vld [vmem:[%s10488_s5 + $0x608] sm:$0xff]  ;;  %v8603_v51 = vsub.s32 2, %v8153_v36 }
 0x1d6   :  { %v8434_v2 = vpack.c.bf16 %v677_v58, %v677_v58  ;;  %v881_v58 = vld [vmem:[%s10488_s5 + $0x620] sm:$0xff]  ;;  %v6416_v0 = vcombine.high %v878_v59, %v882_v60  ;;  %v6415_v8 = vcombine.low %v878_v59, %v882_v60  ;;  %v922_v39 = vld [vmem:[%s10488_s5 + $0x768] sm:$0xff] }
 0x1d7   :  { %v8432_v1 = vpack.c.bf16 %v678_v61, %v678_v61  ;;  %v6405_v61 = vcombine.low %v869_v48, %v873_v49  ;;  %v6414_v63 = vcombine.high %v877_v57, %v881_v58  ;;  %v6413_v7 = vcombine.low %v877_v57, %v881_v58  ;;  %v926_v48 = vld [vmem:[%s10488_s5 + $0x788] sm:$0xff]  ;;  %v933_v57 = vld [vmem:[%s10488_s5 + $0x7c0] sm:$0xff] }
 0x1d8   :  { %v930_v49 = vld [vmem:[%s10488_s5 + $0x7a8] sm:$0xff]  ;;  %v937_v58 = vld [vmem:[%s10488_s5 + $0x7e0] sm:$0xff] }
 0x1d9   :  { %2295 = vmatprep.mubr.bf16.mxu1 %v8432_v1  ;;  %2377 = vmatprep.mubr.bf16.mxu0 %v8432_v1  ;;  %v934_v59 = vld [vmem:[%s10488_s5 + $0x7c8] sm:$0xff] }
 0x1da   :  { %2296 = vmatmul.mubr.bf16.vlgmr.msra.gmra.mrb[0].mxu1 %v8434_v2  ;;  %2378 = vmatmul.mubr.bf16.vlgmr.msra.gmra.mrb[12].mxu0 %v8434_v2  ;;  %v938_v60 = vld [vmem:[%s10488_s5 + $0x7e8] sm:$0xff] }
 0x1db   :  { %2305 = vmatpush1.bf16.msra.mxu1 %v6349_v17  ;;  %2387 = vmatpush1.bf16.msra.mxu0 %v6351_v18  ;;  %v6374_v17 = vcombine.high %v837_v19, %v841_v20  ;;  %v6376_v18 = vcombine.high %v838_v9, %v842_v10  ;;  %v894_v19 = vld [vmem:[%s10488_s5 + $0x688] sm:$0xff]  ;;  %v6423_v10 = vcombine.low %v886_v5, %v890_v6 }
 0x1dc   :  { %2306 = vmatprep.subr.bf16.mxu1 %v6358_v3  ;;  %2388 = vmatprep.subr.bf16.mxu0 %v6360_v4  ;;  %v885_v3 = vld [vmem:[%s10488_s5 + $0x640] sm:$0xff]  ;;  %v898_v20 = vld [vmem:[%s10488_s5 + $0x6a8] sm:$0xff] }
 0x1dd   :  { %v889_v4 = vld [vmem:[%s10488_s5 + $0x660] sm:$0xff]  ;;  %v6431_v24 = vcombine.low %v894_v19, %v898_v20 }
 0x1de   :  { %v6421_v9 = vcombine.low %v885_v3, %v889_v4 }
 0x1df   :  { %2307 = vmatpush1.bf16.msra.mxu1 %v6357_v12  ;;  %2389 = vmatpush1.bf16.msra.mxu0 %v6359_v13  ;;  %v6422_v12 = vcombine.high %v885_v3, %v889_v4  ;;  %v6424_v13 = vcombine.high %v886_v5, %v890_v6  ;;  %v6470_v3 = vcombine.high %v933_v57, %v937_v58  ;;  %v687_v5 = vld [vmem:[%s10488_s5 + $0x10] sm:$0xff] }
 0x1e0   :  { %2308 = vmatprep.subr.bf16.mxu1 %v6366_v15  ;;  %2390 = vmatprep.subr.bf16.mxu0 %v6368_v16  ;;  %v893_v15 = vld [vmem:[%s10488_s5 + $0x680] sm:$0xff]  ;;  %v6472_v4 = vcombine.high %v934_v59, %v938_v60 }
 0x1e1   :  { %v897_v16 = vld [vmem:[%s10488_s5 + $0x6a0] sm:$0xff] }
 0x1e2   :  { %v6429_v23 = vcombine.low %v893_v15, %v897_v16 }
 0x1e3   :  { %2309 = vmatpush1.bf16.msra.mxu1 %v6365_v11  ;;  %2391 = vmatpush1.bf16.msra.mxu0 %v6367_v14  ;;  %v6430_v11 = vcombine.high %v893_v15, %v897_v16  ;;  %v6432_v14 = vcombine.high %v894_v19, %v898_v20  ;;  %v6469_v19 = vcombine.low %v933_v57, %v937_v58 }
 0x1e4   :  { %2310 = vmatprep.subr.bf16.mxu1 %v6374_v17  ;;  %2392 = vmatprep.subr.bf16.mxu0 %v6376_v18  ;;  %v901_v17 = vld [vmem:[%s10488_s5 + $0x6c0] sm:$0xff]  ;;  %v6471_v20 = vcombine.low %v934_v59, %v938_v60  ;;  %v727_v59 = vld [vmem:[%s10488_s5 + $0x150] sm:$0xff] }
 0x1e5   :  { %v905_v18 = vld [vmem:[%s10488_s5 + $0x6e0] sm:$0xff]  ;;  %v731_v60 = vld [vmem:[%s10488_s5 + $0x170] sm:$0xff] }
 0x1e6   :  { %v6437_v31 = vcombine.low %v901_v17, %v905_v18 }
 0x1e7   :  { %2311 = vmatpush1.bf16.msra.mxu1 %v6373_v25  ;;  %2393 = vmatpush1.bf16.msra.mxu0 %v6375_v26  ;;  %v6438_v25 = vcombine.high %v901_v17, %v905_v18  ;;  %v6440_v26 = vcombine.high %v902_v21, %v906_v22  ;;  %v695_v18 = vld [vmem:[%s10488_s5 + $0x50] sm:$0xff]  ;;  %v696_v22 = vld [vmem:[%s10488_s5 + $0x58] sm:$0xff] }
 0x1e8   :  { %2312 = vmatprep.subr.bf16.mxu1 %v6382_v27  ;;  %2394 = vmatprep.subr.bf16.mxu0 %v6384_v28  ;;  %v909_v27 = vld [vmem:[%s10488_s5 + $0x700] sm:$0xff]  ;;  %v699_v21 = vld [vmem:[%s10488_s5 + $0x70] sm:$0xff] }
 0x1e9   :  { %v913_v28 = vld [vmem:[%s10488_s5 + $0x720] sm:$0xff] }
 0x1ea   :  { %v6445_v40 = vcombine.low %v909_v27, %v913_v28 }
 0x1eb   :  { %2313 = vmatpush1.bf16.msra.mxu1 %v6381_v33  ;;  %2395 = vmatpush1.bf16.msra.mxu0 %v6383_v34  ;;  %v6446_v33 = vcombine.high %v909_v27, %v913_v28  ;;  %v6448_v34 = vcombine.high %v910_v29, %v914_v30  ;;  %v6234_v28 = vcombine.high %v695_v18, %v699_v21  ;;  %v703_v30 = vld [vmem:[%s10488_s5 + $0x90] sm:$0xff] }
 0x1ec   :  { %2314 = vmatprep.subr.bf16.mxu1 %v6390_v35  ;;  %2396 = vmatprep.subr.bf16.mxu0 %v6392_v37  ;;  %v917_v35 = vld [vmem:[%s10488_s5 + $0x740] sm:$0xff] }
 0x1ed   :  { %v921_v37 = vld [vmem:[%s10488_s5 + $0x760] sm:$0xff] }
 0x1ee   :  { %v6453_v52 = vcombine.low %v917_v35, %v921_v37 }
 0x1ef   :  { %2315 = vmatpush1.bf16.msra.mxu1 %v6389_v43  ;;  %2397 = vmatpush1.bf16.msra.mxu0 %v6391_v45  ;;  %v6454_v43 = vcombine.high %v917_v35, %v921_v37  ;;  %v6456_v45 = vcombine.high %v918_v38, %v922_v39 }
 0x1f0   :  { %2316 = vmatprep.subr.bf16.mxu1 %v6398_v46  ;;  %2398 = vmatprep.subr.bf16.mxu0 %v6400_v47  ;;  %v925_v46 = vld [vmem:[%s10488_s5 + $0x780] sm:$0xff] }
 0x1f1   :  { %v929_v47 = vld [vmem:[%s10488_s5 + $0x7a0] sm:$0xff] }
 0x1f3   :  { %2317 = vmatpush1.bf16.msra.mxu1 %v6397_v53  ;;  %2399 = vmatpush1.bf16.msra.mxu0 %v6399_v54  ;;  %v6455_v53 = vcombine.low %v918_v38, %v922_v39  ;;  %v8606_v54 = vsub.s32 3, %v8153_v36  ;;  %v711_v39 = vld [vmem:[%s10488_s5 + $0xd0] sm:$0xff] }
 0x1f4   :  { %2318 = vmatprep.subr.bf16.mxu1 %v6406_v55  ;;  %2400 = vmatprep.subr.bf16.mxu0 %v6408_v56  ;;  %v6462_v55 = vcombine.high %v925_v46, %v929_v47  ;;  %v6464_v56 = vcombine.high %v926_v48, %v930_v49 }
 0x1f7   :  { %2319 = vmatpush1.bf16.msra.mxu1 %v6405_v61  ;;  %2401 = vmatpush1.bf16.msra.mxu0 %v6407_v62  ;;  %v266_v61 = vrot.slane %v8414_v50, %v8603_v51  ;;  %v270_v62 = vrot.slane %v8414_v50, %v8606_v54  ;;  %v692_v50 = vld [vmem:[%s10488_s5 + $0x38] sm:$0xff] }
 0x1f8   :  { %2320 = vmatprep.subr.bf16.mxu1 %v6414_v63  ;;  %2402 = vmatprep.subr.bf16.mxu0 %v6416_v0  ;;  %v6461_v63 = vcombine.low %v925_v46, %v929_v47  ;;  %v6463_v0 = vcombine.low %v926_v48, %v930_v49  ;;  %v719_v48 = vld [vmem:[%s10488_s5 + $0x110] sm:$0xff] }
 0x1f9   :  { %v723_v49 = vld [vmem:[%s10488_s5 + $0x130] sm:$0xff] }
 0x1fa   :  { %v6258_v57 = vcombine.high %v719_v48, %v723_v49 }
 0x1fb   :  { %2321 = vmatpush1.bf16.msra.mxu1 %v6413_v7  ;;  %2403 = vmatpush1.bf16.msra.mxu0 %v6415_v8  ;;  %v691_v7 = vld [vmem:[%s10488_s5 + $0x30] sm:$0xff]  ;;  %v688_v8 = vld [vmem:[%s10488_s5 + $0x18] sm:$0xff] }
 0x1fc   :  { %2322 = vmatprep.subr.bf16.mxu1 %v6422_v12  ;;  %2404 = vmatprep.subr.bf16.mxu0 %v6424_v13  ;;  %v6227_v27 = vcombine.low %v688_v8, %v692_v50 }
 0x1ff   :  { %2323 = vmatpush1.bf16.msra.mxu1 %v6421_v9  ;;  %2405 = vmatpush1.bf16.msra.mxu0 %v6423_v10 }
 0x200   :  { %2324 = vmatprep.subr.bf16.mxu1 %v6430_v11  ;;  %2406 = vmatprep.subr.bf16.mxu0 %v6432_v14  ;;  %v6226_v11 = vcombine.high %v687_v5, %v691_v7  ;;  %v6228_v14 = vcombine.high %v688_v8, %v692_v50  ;;  %v740_v8 = vld [vmem:[%s10488_s5 + $0x1b8] sm:$0xff]  ;;  %v6265_v50 = vcombine.low %v727_v59, %v731_v60 }
 0x203   :  { %2325 = vmatpush1.bf16.msra.mxu1 %v6429_v23  ;;  %2407 = vmatpush1.bf16.msra.mxu0 %v6431_v24  ;;  %v700_v23 = vld [vmem:[%s10488_s5 + $0x78] sm:$0xff] }
 0x204   :  { %2326 = vmatprep.subr.bf16.mxu1 %v6438_v25  ;;  %2408 = vmatprep.subr.bf16.mxu0 %v6440_v26  ;;  %v6225_v25 = vcombine.low %v687_v5, %v691_v7  ;;  %v6236_v29 = vcombine.high %v696_v22, %v700_v23  ;;  %v6235_v35 = vcombine.low %v696_v22, %v700_v23  ;;  %v735_v5 = vld [vmem:[%s10488_s5 + $0x190] sm:$0xff]  ;;  %v736_v7 = vld [vmem:[%s10488_s5 + $0x198] sm:$0xff] }
 0x205   :  { %v752_v22 = vld [vmem:[%s10488_s5 + $0x218] sm:$0xff] }
 0x206   :  { %v756_v23 = vld [vmem:[%s10488_s5 + $0x238] sm:$0xff] }
 0x207   :  { %2327 = vmatpush1.bf16.msra.mxu1 %v6437_v31  ;;  %2409 = vmatpush1.bf16.msra.mxu0 %v6439_v32  ;;  %v707_v31 = vld [vmem:[%s10488_s5 + $0xb0] sm:$0xff]  ;;  %v704_v32 = vld [vmem:[%s10488_s5 + $0x98] sm:$0xff] }
 0x208   :  { %2328 = vmatprep.subr.bf16.mxu1 %v6446_v33  ;;  %2410 = vmatprep.subr.bf16.mxu0 %v6448_v34  ;;  %v708_v33 = vld [vmem:[%s10488_s5 + $0xb8] sm:$0xff]  ;;  %v6233_v34 = vcombine.low %v695_v18, %v699_v21  ;;  %v6242_v37 = vcombine.high %v703_v30, %v707_v31  ;;  %v751_v18 = vld [vmem:[%s10488_s5 + $0x210] sm:$0xff] }
 0x209   :  { %v6244_v38 = vcombine.high %v704_v32, %v708_v33  ;;  %v755_v21 = vld [vmem:[%s10488_s5 + $0x230] sm:$0xff] }
 0x20b   :  { %2329 = vmatpush1.bf16.msra.mxu1 %v6445_v40  ;;  %2411 = vmatpush1.bf16.msra.mxu0 %v6447_v42  ;;  %v715_v40 = vld [vmem:[%s10488_s5 + $0xf0] sm:$0xff]  ;;  %v712_v42 = vld [vmem:[%s10488_s5 + $0xd8] sm:$0xff] }
 0x20c   :  { %2330 = vmatprep.subr.bf16.mxu1 %v6454_v43  ;;  %2412 = vmatprep.subr.bf16.mxu0 %v6456_v45  ;;  %v6241_v43 = vcombine.low %v703_v30, %v707_v31  ;;  %v6243_v45 = vcombine.low %v704_v32, %v708_v33  ;;  %v6250_v46 = vcombine.high %v711_v39, %v715_v40  ;;  %v759_v30 = vld [vmem:[%s10488_s5 + $0x250] sm:$0xff]  ;;  %v760_v32 = vld [vmem:[%s10488_s5 + $0x258] sm:$0xff] }
 0x20d   :  { %v763_v31 = vld [vmem:[%s10488_s5 + $0x270] sm:$0xff]  ;;  %v764_v33 = vld [vmem:[%s10488_s5 + $0x278] sm:$0xff] }
 0x20f   :  { %2331 = vmatpush1.bf16.msra.mxu1 %v6453_v52  ;;  %2413 = vmatpush1.bf16.msra.mxu0 %v6455_v53  ;;  %v720_v52 = vld [vmem:[%s10488_s5 + $0x118] sm:$0xff] }
 0x210   :  { %2332 = vmatprep.subr.bf16.mxu1 %v6462_v55  ;;  %2414 = vmatprep.subr.bf16.mxu0 %v6464_v56  ;;  %v724_v53 = vld [vmem:[%s10488_s5 + $0x138] sm:$0xff]  ;;  %v6249_v55 = vcombine.low %v711_v39, %v715_v40  ;;  %v767_v39 = vld [vmem:[%s10488_s5 + $0x290] sm:$0xff] }
 0x211   :  { %v670_v6 = vpop.f32.mrb[8].mxu0  ;;  %v6260_v58 = vcombine.high %v720_v52, %v724_v53  ;;  %v771_v40 = vld [vmem:[%s10488_s5 + $0x2b0] sm:$0xff] }
 0x212   :  { %v671_v12 = vadd.f32 %v670_v6, %v266_v61  ;;  %v672_v13 = vpop.f32.mrb[9].mxu0  ;;  %v728_v61 = vld [vmem:[%s10488_s5 + $0x158] sm:$0xff]  ;;  %v739_v6 = vld [vmem:[%s10488_s5 + $0x1b0] sm:$0xff] }
 0x213   :  { %v673_v15 = vadd.f32 %v672_v13, %v270_v62  ;;  %v674_v16 = vpop.f32.mrb[10].mxu0  ;;  %2333 = vmatpush1.bf16.msra.mxu1 %v6461_v63  ;;  %2415 = vmatpush1.bf16.msra.mxu0 %v6463_v0  ;;  %v732_v62 = vld [vmem:[%s10488_s5 + $0x178] sm:$0xff]  ;;  %v6257_v63 = vcombine.low %v719_v48, %v723_v49  ;;  %v6259_v0 = vcombine.low %v720_v52, %v724_v53  ;;  %v775_v48 = vld [vmem:[%s10488_s5 + $0x2d0] sm:$0xff] }
 0x214   :  { %v679_v9 = vmax.f32 %v671_v12, 0.0  ;;  %v675_v10 = vpop.f32.mrb[11].mxu0  ;;  %2334 = vmatprep.subr.bf16.mxu1 %v6470_v3  ;;  %2416 = vmatprep.subr.bf16.mxu0 %v6472_v4  ;;  %v6266_v3 = vcombine.high %v727_v59, %v731_v60  ;;  %v6268_v4 = vcombine.high %v728_v61, %v732_v62  ;;  %v6267_v12 = vcombine.low %v728_v61, %v732_v62  ;;  %v743_v16 = vld [vmem:[%s10488_s5 + $0x1d0] sm:$0xff]  ;;  %v776_v52 = vld [vmem:[%s10488_s5 + $0x2d8] sm:$0xff] }
 0x215   :  { %v680_v17 = vmax.f32 %v673_v15, 0.0  ;;  %v6274_v13 = vcombine.high %v735_v5, %v739_v6  ;;  %v6276_v15 = vcombine.high %v736_v7, %v740_v8  ;;  %v6273_v10 = vcombine.low %v735_v5, %v739_v6  ;;  %v779_v49 = vld [vmem:[%s10488_s5 + $0x2f0] sm:$0xff]  ;;  %v780_v53 = vld [vmem:[%s10488_s5 + $0x2f8] sm:$0xff] }
 0x216   :  { %v8650_v26 = vpack.c.bf16 %v679_v9, %v679_v9  ;;  %v748_v9 = vld [vmem:[%s10488_s5 + $0x1f8] sm:$0xff]  ;;  %v783_v59 = vld [vmem:[%s10488_s5 + $0x310] sm:$0xff] }
 0x217   :  { %v8648_v24 = vpack.c.bf16 %v680_v17, %v680_v17  ;;  %2335 = vmatpush1.bf16.msra.mxu1 %v6469_v19  ;;  %2417 = vmatpush1.bf16.msra.mxu0 %v6471_v20  ;;  %v747_v19 = vld [vmem:[%s10488_s5 + $0x1f0] sm:$0xff]  ;;  %v744_v20 = vld [vmem:[%s10488_s5 + $0x1d8] sm:$0xff] }
 0x218   :  { %2427 = vmatprep.subr.bf16.mxu1 %v6226_v11  ;;  %2509 = vmatprep.subr.bf16.mxu0 %v6228_v14  ;;  %v6275_v11 = vcombine.low %v736_v7, %v740_v8  ;;  %v6282_v14 = vcombine.high %v743_v16, %v747_v19  ;;  %v6284_v17 = vcombine.high %v744_v20, %v748_v9  ;;  %v787_v60 = vld [vmem:[%s10488_s5 + $0x330] sm:$0xff]  ;;  %v784_v61 = vld [vmem:[%s10488_s5 + $0x318] sm:$0xff] }
 0x219   :  { %2336 = vmatprep.mubr.bf16.mxu1 %v8648_v24  ;;  %2418 = vmatprep.mubr.bf16.mxu0 %v8648_v24  ;;  %v788_v62 = vld [vmem:[%s10488_s5 + $0x338] sm:$0xff]  ;;  %v791_v5 = vld [vmem:[%s10488_s5 + $0x350] sm:$0xff] }
 0x21a   :  { %2337 = vmatmul.mubr.bf16.vlgmr.msra.gmra.mrb[0].mxu1 %v8650_v26  ;;  %2419 = vmatmul.mubr.bf16.vlgmr.msra.gmra.mrb[12].mxu0 %v8650_v26  ;;  %v795_v6 = vld [vmem:[%s10488_s5 + $0x370] sm:$0xff]  ;;  %v792_v7 = vld [vmem:[%s10488_s5 + $0x358] sm:$0xff] }
 0x21b   :  { %2428 = vmatpush1.bf16.msra.mxu1 %v6225_v25  ;;  %2459 = vmatprep.mubr.bf16.mxu1 %v8432_v1  ;;  %v6281_v25 = vcombine.low %v743_v16, %v747_v19  ;;  %v796_v8 = vld [vmem:[%s10488_s5 + $0x378] sm:$0xff]  ;;  %v799_v16 = vld [vmem:[%s10488_s5 + $0x390] sm:$0xff] }
 0x21c   :  { %2510 = vmatpush1.bf16.msra.mxu0 %v6227_v27  ;;  %2541 = vmatprep.mubr.bf16.mxu0 %v8432_v1  ;;  %v716_v1 = vld [vmem:[%s10488_s5 + $0xf8] sm:$0xff]  ;;  %v6283_v27 = vcombine.low %v744_v20, %v748_v9  ;;  %v803_v19 = vld [vmem:[%s10488_s5 + $0x3b0] sm:$0xff] }
 0x21d   :  { %2429 = vmatprep.subr.bf16.mxu1 %v6234_v28  ;;  %2511 = vmatprep.subr.bf16.mxu0 %v6236_v29  ;;  %v6252_v47 = vcombine.high %v712_v42, %v716_v1  ;;  %v6251_v56 = vcombine.low %v712_v42, %v716_v1  ;;  %v6290_v28 = vcombine.high %v751_v18, %v755_v21  ;;  %v768_v42 = vld [vmem:[%s10488_s5 + $0x298] sm:$0xff] }
 0x21e   :  { %v6292_v29 = vcombine.high %v752_v22, %v756_v23  ;;  %v772_v1 = vld [vmem:[%s10488_s5 + $0x2b8] sm:$0xff] }
 0x21f   :  { %2430 = vmatpush1.bf16.msra.mxu1 %v6233_v34  ;;  %v6289_v34 = vcombine.low %v751_v18, %v755_v21  ;;  %v800_v20 = vld [vmem:[%s10488_s5 + $0x398] sm:$0xff]  ;;  %v807_v18 = vld [vmem:[%s10488_s5 + $0x3d0] sm:$0xff] }
 0x220   :  { %2512 = vmatpush1.bf16.msra.mxu0 %v6235_v35  ;;  %2431 = vmatprep.subr.bf16.mxu1 %v6242_v37  ;;  %v6291_v35 = vcombine.low %v752_v22, %v756_v23  ;;  %v6298_v37 = vcombine.high %v759_v30, %v763_v31  ;;  %v804_v9 = vld [vmem:[%s10488_s5 + $0x3b8] sm:$0xff]  ;;  %v811_v21 = vld [vmem:[%s10488_s5 + $0x3f0] sm:$0xff] }
 0x221   :  { %2513 = vmatprep.subr.bf16.mxu0 %v6244_v38  ;;  %v6300_v38 = vcombine.high %v760_v32, %v764_v33  ;;  %v808_v22 = vld [vmem:[%s10488_s5 + $0x3d8] sm:$0xff] }
 0x222   :  { %v812_v23 = vld [vmem:[%s10488_s5 + $0x3f8] sm:$0xff] }
 0x223   :  { %2432 = vmatpush1.bf16.msra.mxu1 %v6241_v43  ;;  %v6297_v43 = vcombine.low %v759_v30, %v763_v31  ;;  %v815_v30 = vld [vmem:[%s10488_s5 + $0x410] sm:$0xff] }
 0x224   :  { %2514 = vmatpush1.bf16.msra.mxu0 %v6243_v45  ;;  %2433 = vmatprep.subr.bf16.mxu1 %v6250_v46  ;;  %v6299_v45 = vcombine.low %v760_v32, %v764_v33  ;;  %v6306_v46 = vcombine.high %v767_v39, %v771_v40  ;;  %v819_v31 = vld [vmem:[%s10488_s5 + $0x430] sm:$0xff]  ;;  %v816_v32 = vld [vmem:[%s10488_s5 + $0x418] sm:$0xff] }
 0x225   :  { %2515 = vmatprep.subr.bf16.mxu0 %v6252_v47  ;;  %v6308_v47 = vcombine.high %v768_v42, %v772_v1  ;;  %v820_v33 = vld [vmem:[%s10488_s5 + $0x438] sm:$0xff] }
 0x227   :  { %2434 = vmatpush1.bf16.msra.mxu1 %v6249_v55  ;;  %v6305_v55 = vcombine.low %v767_v39, %v771_v40  ;;  %v823_v39 = vld [vmem:[%s10488_s5 + $0x450] sm:$0xff] }
 0x228   :  { %2516 = vmatpush1.bf16.msra.mxu0 %v6251_v56  ;;  %2435 = vmatprep.subr.bf16.mxu1 %v6258_v57  ;;  %v6307_v56 = vcombine.low %v768_v42, %v772_v1  ;;  %v6314_v57 = vcombine.high %v775_v48, %v779_v49  ;;  %v827_v40 = vld [vmem:[%s10488_s5 + $0x470] sm:$0xff]  ;;  %v6353_v42 = vcombine.low %v815_v30, %v819_v31  ;;  %v824_v1 = vld [vmem:[%s10488_s5 + $0x458] sm:$0xff] }
 0x229   :  { %2517 = vmatprep.subr.bf16.mxu0 %v6260_v58  ;;  %v6316_v58 = vcombine.high %v776_v52, %v780_v53 }
 0x22b   :  { %2436 = vmatpush1.bf16.msra.mxu1 %v6257_v63  ;;  %v6313_v63 = vcombine.low %v775_v48, %v779_v49  ;;  %v835_v48 = vld [vmem:[%s10488_s5 + $0x4b0] sm:$0xff] }
 0x22c   :  { %2518 = vmatpush1.bf16.msra.mxu0 %v6259_v0  ;;  %2437 = vmatprep.subr.bf16.mxu1 %v6266_v3  ;;  %v6315_v0 = vcombine.low %v776_v52, %v780_v53  ;;  %v6322_v3 = vcombine.high %v783_v59, %v787_v60  ;;  %v832_v52 = vld [vmem:[%s10488_s5 + $0x498] sm:$0xff] }
 0x22d   :  { %2519 = vmatprep.subr.bf16.mxu0 %v6268_v4  ;;  %v6324_v4 = vcombine.high %v784_v61, %v788_v62  ;;  %v836_v53 = vld [vmem:[%s10488_s5 + $0x4b8] sm:$0xff] }
 0x22f   :  { %2438 = vmatpush1.bf16.msra.mxu1 %v6265_v50  ;;  %v6321_v50 = vcombine.low %v783_v59, %v787_v60  ;;  %v839_v59 = vld [vmem:[%s10488_s5 + $0x4d0] sm:$0xff] }
 0x230   :  { %2520 = vmatpush1.bf16.msra.mxu0 %v6267_v12  ;;  %2439 = vmatprep.subr.bf16.mxu1 %v6274_v13  ;;  %v6323_v12 = vcombine.low %v784_v61, %v788_v62  ;;  %v6330_v13 = vcombine.high %v791_v5, %v795_v6  ;;  %v843_v60 = vld [vmem:[%s10488_s5 + $0x4f0] sm:$0xff]  ;;  %v844_v61 = vld [vmem:[%s10488_s5 + $0x4f8] sm:$0xff]  ;;  %v6371_v62 = vcombine.low %v832_v52, %v836_v53 }
 0x231   :  { %2521 = vmatprep.subr.bf16.mxu0 %v6276_v15  ;;  %v6332_v15 = vcombine.high %v792_v7, %v796_v8 }
 0x233   :  { %2440 = vmatpush1.bf16.msra.mxu1 %v6273_v10  ;;  %v6329_v10 = vcombine.low %v791_v5, %v795_v6  ;;  %v848_v5 = vld [vmem:[%s10488_s5 + $0x518] sm:$0xff] }
 0x234   :  { %2522 = vmatpush1.bf16.msra.mxu0 %v6275_v11  ;;  %2441 = vmatprep.subr.bf16.mxu1 %v6282_v14  ;;  %v6331_v11 = vcombine.low %v792_v7, %v796_v8  ;;  %v6338_v14 = vcombine.high %v799_v16, %v803_v19  ;;  %v852_v6 = vld [vmem:[%s10488_s5 + $0x538] sm:$0xff]  ;;  %v6377_v7 = vcombine.low %v839_v59, %v843_v60 }
 0x235   :  { %2523 = vmatprep.subr.bf16.mxu0 %v6284_v17  ;;  %v6340_v17 = vcombine.high %v800_v20, %v804_v9 }
 0x237   :  { %2442 = vmatpush1.bf16.msra.mxu1 %v6281_v25  ;;  %v6337_v25 = vcombine.low %v799_v16, %v803_v19  ;;  %v856_v16 = vld [vmem:[%s10488_s5 + $0x558] sm:$0xff] }
 0x238   :  { %2524 = vmatpush1.bf16.msra.mxu0 %v6283_v27  ;;  %2443 = vmatprep.subr.bf16.mxu1 %v6290_v28  ;;  %v6339_v27 = vcombine.low %v800_v20, %v804_v9  ;;  %v6346_v28 = vcombine.high %v807_v18, %v811_v21  ;;  %v860_v19 = vld [vmem:[%s10488_s5 + $0x578] sm:$0xff]  ;;  %v6387_v9 = vcombine.low %v848_v5, %v852_v6 }
 0x239   :  { %2525 = vmatprep.subr.bf16.mxu0 %v6292_v29  ;;  %v6348_v29 = vcombine.high %v808_v22, %v812_v23 }
 0x23b   :  { %2444 = vmatpush1.bf16.msra.mxu1 %v6289_v34  ;;  %v6345_v34 = vcombine.low %v807_v18, %v811_v21  ;;  %v864_v18 = vld [vmem:[%s10488_s5 + $0x598] sm:$0xff] }
 0x23c   :  { %2526 = vmatpush1.bf16.msra.mxu0 %v6291_v35  ;;  %2445 = vmatprep.subr.bf16.mxu1 %v6298_v37  ;;  %v6347_v35 = vcombine.low %v808_v22, %v812_v23  ;;  %v6354_v37 = vcombine.high %v815_v30, %v819_v31  ;;  %v868_v21 = vld [vmem:[%s10488_s5 + $0x5b8] sm:$0xff]  ;;  %v6395_v23 = vcombine.low %v856_v16, %v860_v19 }
 0x23d   :  { %2527 = vmatprep.subr.bf16.mxu0 %v6300_v38  ;;  %v6356_v38 = vcombine.high %v816_v32, %v820_v33  ;;  %v872_v30 = vld [vmem:[%s10488_s5 + $0x5d8] sm:$0xff] }
 0x23e   :  { %v876_v31 = vld [vmem:[%s10488_s5 + $0x5f8] sm:$0xff] }
 0x23f   :  { %2446 = vmatpush1.bf16.msra.mxu1 %v6297_v43  ;;  %v828_v43 = vld [vmem:[%s10488_s5 + $0x478] sm:$0xff] }
 0x240   :  { %2528 = vmatpush1.bf16.msra.mxu0 %v6299_v45  ;;  %2447 = vmatprep.subr.bf16.mxu1 %v6306_v46  ;;  %v6355_v45 = vcombine.low %v816_v32, %v820_v33  ;;  %v6362_v46 = vcombine.high %v823_v39, %v827_v40  ;;  %v6364_v49 = vcombine.high %v824_v1, %v828_v43 }
 0x241   :  { %2529 = vmatprep.subr.bf16.mxu0 %v6308_v47  ;;  %v831_v47 = vld [vmem:[%s10488_s5 + $0x490] sm:$0xff]  ;;  %v6403_v33 = vcombine.low %v864_v18, %v868_v21 }
 0x243   :  { %2448 = vmatpush1.bf16.msra.mxu1 %v6305_v55  ;;  %v6361_v55 = vcombine.low %v823_v39, %v827_v40  ;;  %v880_v39 = vld [vmem:[%s10488_s5 + $0x618] sm:$0xff] }
 0x244   :  { %2530 = vmatpush1.bf16.msra.mxu0 %v6307_v56  ;;  %2449 = vmatprep.subr.bf16.mxu1 %v6314_v57  ;;  %v6363_v56 = vcombine.low %v824_v1, %v828_v43  ;;  %v6370_v57 = vcombine.high %v831_v47, %v835_v48  ;;  %v884_v40 = vld [vmem:[%s10488_s5 + $0x638] sm:$0xff]  ;;  %v6411_v1 = vcombine.low %v872_v30, %v876_v31 }
 0x245   :  { %2531 = vmatprep.subr.bf16.mxu0 %v6316_v58  ;;  %v6372_v58 = vcombine.high %v832_v52, %v836_v53  ;;  %v6419_v53 = vcombine.low %v880_v39, %v884_v40 }
 0x247   :  { %2450 = vmatpush1.bf16.msra.mxu1 %v6313_v63  ;;  %v6378_v63 = vcombine.high %v839_v59, %v843_v60  ;;  %v896_v59 = vld [vmem:[%s10488_s5 + $0x698] sm:$0xff] }
 0x248   :  { %2532 = vmatpush1.bf16.msra.mxu0 %v6315_v0  ;;  %2451 = vmatprep.subr.bf16.mxu1 %v6322_v3  ;;  %v847_v3 = vld [vmem:[%s10488_s5 + $0x510] sm:$0xff]  ;;  %v900_v60 = vld [vmem:[%s10488_s5 + $0x6b8] sm:$0xff] }
 0x249   :  { %2533 = vmatprep.subr.bf16.mxu0 %v6324_v4  ;;  %v851_v4 = vld [vmem:[%s10488_s5 + $0x530] sm:$0xff] }
 0x24a   :  { %v6385_v20 = vcombine.low %v847_v3, %v851_v4 }
 0x24b   :  { %2452 = vmatpush1.bf16.msra.mxu1 %v6321_v50  ;;  %v6386_v50 = vcombine.high %v847_v3, %v851_v4  ;;  %v904_v3 = vld [vmem:[%s10488_s5 + $0x6d8] sm:$0xff] }
 0x24c   :  { %2534 = vmatpush1.bf16.msra.mxu0 %v6323_v12  ;;  %2453 = vmatprep.subr.bf16.mxu1 %v6330_v13  ;;  %v6388_v12 = vcombine.high %v848_v5, %v852_v6  ;;  %v855_v13 = vld [vmem:[%s10488_s5 + $0x550] sm:$0xff]  ;;  %v908_v4 = vld [vmem:[%s10488_s5 + $0x6f8] sm:$0xff]  ;;  %v6435_v6 = vcombine.low %v896_v59, %v900_v60 }
 0x24d   :  { %2535 = vmatprep.subr.bf16.mxu0 %v6332_v15  ;;  %v859_v15 = vld [vmem:[%s10488_s5 + $0x570] sm:$0xff] }
 0x24e   :  { %v6393_v22 = vcombine.low %v855_v13, %v859_v15 }
 0x24f   :  { %2454 = vmatpush1.bf16.msra.mxu1 %v6329_v10  ;;  %v6394_v10 = vcombine.high %v855_v13, %v859_v15  ;;  %v912_v13 = vld [vmem:[%s10488_s5 + $0x718] sm:$0xff] }
 0x250   :  { %2536 = vmatpush1.bf16.msra.mxu0 %v6331_v11  ;;  %2455 = vmatprep.subr.bf16.mxu1 %v6338_v14  ;;  %v6396_v11 = vcombine.high %v856_v16, %v860_v19  ;;  %v863_v14 = vld [vmem:[%s10488_s5 + $0x590] sm:$0xff]  ;;  %v916_v15 = vld [vmem:[%s10488_s5 + $0x738] sm:$0xff]  ;;  %v6443_v19 = vcombine.low %v904_v3, %v908_v4 }
 0x251   :  { %2537 = vmatprep.subr.bf16.mxu0 %v6340_v17  ;;  %v867_v17 = vld [vmem:[%s10488_s5 + $0x5b0] sm:$0xff] }
 0x252   :  { %v6401_v32 = vcombine.low %v863_v14, %v867_v17 }
 0x253   :  { %2456 = vmatpush1.bf16.msra.mxu1 %v6337_v25  ;;  %v6402_v25 = vcombine.high %v863_v14, %v867_v17  ;;  %v920_v14 = vld [vmem:[%s10488_s5 + $0x758] sm:$0xff] }
 0x254   :  { %2538 = vmatpush1.bf16.msra.mxu0 %v6339_v27  ;;  %2457 = vmatprep.subr.bf16.mxu1 %v6346_v28  ;;  %v6404_v27 = vcombine.high %v864_v18, %v868_v21  ;;  %v871_v28 = vld [vmem:[%s10488_s5 + $0x5d0] sm:$0xff]  ;;  %v924_v17 = vld [vmem:[%s10488_s5 + $0x778] sm:$0xff]  ;;  %v6451_v21 = vcombine.low %v912_v13, %v916_v15 }
 0x255   :  { %2539 = vmatprep.subr.bf16.mxu0 %v6348_v29  ;;  %v875_v29 = vld [vmem:[%s10488_s5 + $0x5f0] sm:$0xff] }
 0x257   :  { %2458 = vmatpush1.bf16.msra.mxu1 %v6345_v34  ;;  %v6410_v34 = vcombine.high %v871_v28, %v875_v29 }
 0x258   :  { %2540 = vmatpush1.bf16.msra.mxu0 %v6347_v35  ;;  %2468 = vmatprep.subr.bf16.mxu1 %v6354_v37  ;;  %v6412_v35 = vcombine.high %v872_v30, %v876_v31  ;;  %v879_v37 = vld [vmem:[%s10488_s5 + $0x610] sm:$0xff]  ;;  %v6459_v31 = vcombine.low %v920_v14, %v924_v17 }
 0x259   :  { %2550 = vmatprep.subr.bf16.mxu0 %v6356_v38  ;;  %v883_v38 = vld [vmem:[%s10488_s5 + $0x630] sm:$0xff] }
 0x25a   :  { %2460 = vmatmul.mubr.bf16.vlgmr.msra.gmra.mrb[4].mxu1 %v8434_v2  ;;  %v6418_v43 = vcombine.high %v879_v37, %v883_v38  ;;  %v6417_v52 = vcombine.low %v879_v37, %v883_v38  ;;  %v936_v37 = vld [vmem:[%s10488_s5 + $0x7d8] sm:$0xff] }
 0x25b   :  { %2542 = vmatmul.mubr.bf16.vlgmr.msra.gmra.mrb[16].mxu0 %v8434_v2  ;;  %2469 = vmatpush1.bf16.msra.mxu1 %v6353_v42  ;;  %v840_v2 = vld [vmem:[%s10488_s5 + $0x4d8] sm:$0xff]  ;;  %v6409_v42 = vcombine.low %v871_v28, %v875_v29 }
 0x25c   :  { %2500 = vmatprep.mubr.bf16.mxu1 %v8648_v24  ;;  %2551 = vmatpush1.bf16.msra.mxu0 %v6355_v45  ;;  %v6380_v0 = vcombine.high %v840_v2, %v844_v61  ;;  %v6379_v8 = vcombine.low %v840_v2, %v844_v61  ;;  %v6420_v45 = vcombine.high %v880_v39, %v884_v40  ;;  %v928_v28 = vld [vmem:[%s10488_s5 + $0x798] sm:$0xff] }
 0x25d   :  { %2582 = vmatprep.mubr.bf16.mxu0 %v8648_v24  ;;  %2470 = vmatprep.subr.bf16.mxu1 %v6362_v46  ;;  %v6369_v24 = vcombine.low %v831_v47, %v835_v48  ;;  %v887_v46 = vld [vmem:[%s10488_s5 + $0x650] sm:$0xff]  ;;  %v888_v48 = vld [vmem:[%s10488_s5 + $0x658] sm:$0xff] }
 0x25e   :  { %2552 = vmatprep.subr.bf16.mxu0 %v6364_v49  ;;  %v891_v47 = vld [vmem:[%s10488_s5 + $0x670] sm:$0xff]  ;;  %v892_v49 = vld [vmem:[%s10488_s5 + $0x678] sm:$0xff] }
 0x25f   :  { %2471 = vmatpush1.bf16.msra.mxu1 %v6361_v55  ;;  %v6426_v55 = vcombine.high %v887_v46, %v891_v47  ;;  %v6425_v2 = vcombine.low %v887_v46, %v891_v47  ;;  %v6427_v61 = vcombine.low %v888_v48, %v892_v49  ;;  %v932_v29 = vld [vmem:[%s10488_s5 + $0x7b8] sm:$0xff]  ;;  %v7203_v46 = vld [vmem:[%s10490_s7 + $0x4] ss:$28 sps:$4 sm:$0xff]   ;;  %v7206_v47 = vld [vmem:[%s10490_s7 + $0xc] ss:$28 sps:$4 sm:$0xff]  }
 0x260   :  { %2553 = vmatpush1.bf16.msra.mxu0 %v6363_v56  ;;  %2472 = vmatprep.subr.bf16.mxu1 %v6370_v57  ;;  %v6428_v56 = vcombine.high %v888_v48, %v892_v49  ;;  %v895_v57 = vld [vmem:[%s10488_s5 + $0x690] sm:$0xff]  ;;  %v940_v38 = vld [vmem:[%s10488_s5 + $0x7f8] sm:$0xff]  ;;  %v6467_v40 = vcombine.low %v928_v28, %v932_v29  ;;  %v7204_v49 = vld [vmem:[%s10490_s7 + $0x8] ss:$28 sps:$4 sm:$0xff]  }
 0x261   :  { %2554 = vmatprep.subr.bf16.mxu0 %v6372_v58  ;;  %v899_v58 = vld [vmem:[%s10488_s5 + $0x6b0] sm:$0xff]  ;;  %v7201_v48 = vld [vmem:[%s10490_s7] ss:$28 sps:$4 sm:$0xff]  }
 0x262   :  { %v6433_v5 = vcombine.low %v895_v57, %v899_v58 }
 0x263   :  { %2473 = vmatpush1.bf16.msra.mxu1 %v6369_v24  ;;  %v6434_v24 = vcombine.high %v895_v57, %v899_v58  ;;  %v7215_v57 = vld [vmem:[%s10490_s7 + $0x74] ss:$28 sps:$4 sm:$0xff]  }
 0x264   :  { %2555 = vmatpush1.bf16.msra.mxu0 %v6371_v62  ;;  %2474 = vmatprep.subr.bf16.mxu1 %v6378_v63  ;;  %v6436_v62 = vcombine.high %v896_v59, %v900_v60  ;;  %v903_v63 = vld [vmem:[%s10488_s5 + $0x6d0] sm:$0xff]  ;;  %v7221_v60 = vld [vmem:[%s10490_s7 + $0xac] ss:$28 sps:$4 sm:$0xff]  }
 0x265   :  { %2556 = vmatprep.subr.bf16.mxu0 %v6380_v0  ;;  %v907_v0 = vld [vmem:[%s10488_s5 + $0x6f0] sm:$0xff] }
 0x266   :  { %v6441_v16 = vcombine.low %v903_v63, %v907_v0  ;;  %v7213_v58 = vld [vmem:[%s10490_s7 + $0x70] ss:$28 sps:$4 sm:$0xff]   ;;  %v7216_v59 = vld [vmem:[%s10490_s7 + $0x78] ss:$28 sps:$4 sm:$0xff]  }
 0x267   :  { %2475 = vmatpush1.bf16.msra.mxu1 %v6377_v7  ;;  %v6442_v7 = vcombine.high %v903_v63, %v907_v0  ;;  %v7230_v63 = vld [vmem:[%s10490_s7 + $0xec] ss:$28 sps:$4 sm:$0xff]   ;;  %v7225_v0 = vld [vmem:[%s10490_s7 + $0xe0] ss:$28 sps:$4 sm:$0xff]  }
 0x268   :  { %2557 = vmatpush1.bf16.msra.mxu0 %v6379_v8  ;;  %2476 = vmatprep.subr.bf16.mxu1 %v6386_v50  ;;  %v6444_v8 = vcombine.high %v904_v3, %v908_v4  ;;  %v911_v50 = vld [vmem:[%s10488_s5 + $0x710] sm:$0xff]  ;;  %v7228_v3 = vld [vmem:[%s10490_s7 + $0xe8] ss:$28 sps:$4 sm:$0xff]   ;;  %v7233_v4 = vld [vmem:[%s10490_s7 + $0x11c] ss:$28 sps:$4 sm:$0xff]  }
 0x269   :  { %2558 = vmatprep.subr.bf16.mxu0 %v6388_v12  ;;  %v915_v12 = vld [vmem:[%s10488_s5 + $0x730] sm:$0xff] }
 0x26a   :  { %v6449_v18 = vcombine.low %v911_v50, %v915_v12 }
 0x26b   :  { %2477 = vmatpush1.bf16.msra.mxu1 %v6385_v20  ;;  %v6450_v20 = vcombine.high %v911_v50, %v915_v12  ;;  %v7242_v50 = vld [vmem:[%s10490_s7 + $0x15c] ss:$28 sps:$4 sm:$0xff]   ;;  %v7237_v12 = vld [vmem:[%s10490_s7 + $0x150] ss:$28 sps:$4 sm:$0xff]  }
 0x26c   :  { %2559 = vmatpush1.bf16.msra.mxu0 %v6387_v9  ;;  %2478 = vmatprep.subr.bf16.mxu1 %v6394_v10  ;;  %v6452_v9 = vcombine.high %v912_v13, %v916_v15  ;;  %v919_v10 = vld [vmem:[%s10488_s5 + $0x750] sm:$0xff]  ;;  %v7245_v15 = vld [vmem:[%s10490_s7 + $0x18c] ss:$28 sps:$4 sm:$0xff]  }
 0x26d   :  { %2560 = vmatprep.subr.bf16.mxu0 %v6396_v11  ;;  %v923_v11 = vld [vmem:[%s10488_s5 + $0x770] sm:$0xff] }
 0x26e   :  { %v6457_v30 = vcombine.low %v919_v10, %v923_v11  ;;  %v7240_v13 = vld [vmem:[%s10490_s7 + $0x158] ss:$28 sps:$4 sm:$0xff]  }
 0x26f   :  { %2479 = vmatpush1.bf16.msra.mxu1 %v6393_v22  ;;  %v6458_v22 = vcombine.high %v919_v10, %v923_v11  ;;  %v7254_v10 = vld [vmem:[%s10490_s7 + $0x1cc] ss:$28 sps:$4 sm:$0xff]   ;;  %v7249_v11 = vld [vmem:[%s10490_s7 + $0x1c0] ss:$28 sps:$4 sm:$0xff]  }
 0x270   :  { %2561 = vmatpush1.bf16.msra.mxu0 %v6395_v23  ;;  %2480 = vmatprep.subr.bf16.mxu1 %v6402_v25  ;;  %v6460_v23 = vcombine.high %v920_v14, %v924_v17  ;;  %v927_v25 = vld [vmem:[%s10488_s5 + $0x790] sm:$0xff]  ;;  %v7252_v14 = vld [vmem:[%s10490_s7 + $0x1c8] ss:$28 sps:$4 sm:$0xff]   ;;  %v7257_v17 = vld [vmem:[%s10490_s7 + $0x1fc] ss:$28 sps:$4 sm:$0xff]  }
 0x271   :  { %2562 = vmatprep.subr.bf16.mxu0 %v6404_v27  ;;  %v931_v27 = vld [vmem:[%s10488_s5 + $0x7b0] sm:$0xff] }
 0x272   :  { %v6465_v39 = vcombine.low %v927_v25, %v931_v27 }
 0x273   :  { %2481 = vmatpush1.bf16.msra.mxu1 %v6401_v32  ;;  %v6466_v32 = vcombine.high %v927_v25, %v931_v27  ;;  %v7266_v25 = vld [vmem:[%s10490_s7 + $0x23c] ss:$28 sps:$4 sm:$0xff]   ;;  %v7261_v27 = vld [vmem:[%s10490_s7 + $0x230] ss:$28 sps:$4 sm:$0xff]  }
 0x274   :  { %2563 = vmatpush1.bf16.msra.mxu0 %v6403_v33  ;;  %2482 = vmatprep.subr.bf16.mxu1 %v6410_v34  ;;  %v6468_v33 = vcombine.high %v928_v28, %v932_v29  ;;  %v935_v34 = vld [vmem:[%s10488_s5 + $0x7d0] sm:$0xff]  ;;  %v7269_v29 = vld [vmem:[%s10490_s7 + $0x26c] ss:$28 sps:$4 sm:$0xff]  }
 0x275   :  { %2564 = vmatprep.subr.bf16.mxu0 %v6412_v35  ;;  %v939_v35 = vld [vmem:[%s10488_s5 + $0x7f0] sm:$0xff] }
 0x276   :  { %v7264_v28 = vld [vmem:[%s10490_s7 + $0x238] ss:$28 sps:$4 sm:$0xff]  }
 0x277   :  { %2483 = vmatpush1.bf16.msra.mxu1 %v6409_v42  ;;  %v6474_v42 = vcombine.high %v935_v34, %v939_v35 }
 0x278   :  { %2565 = vmatpush1.bf16.msra.mxu0 %v6411_v1  ;;  %2484 = vmatprep.subr.bf16.mxu1 %v6418_v43  ;;  %v6476_v1 = vcombine.high %v936_v37, %v940_v38  ;;  %v6473_v43 = vcombine.low %v935_v34, %v939_v35  ;;  %v7278_v34 = vld [vmem:[%s10490_s7 + $0x2ac] ss:$28 sps:$4 sm:$0xff]   ;;  %v7273_v35 = vld [vmem:[%s10490_s7 + $0x2a0] ss:$28 sps:$4 sm:$0xff]  }
 0x279   :  { %2566 = vmatprep.subr.bf16.mxu0 %v6420_v45  ;;  %v6475_v45 = vcombine.low %v936_v37, %v940_v38  ;;  %v7276_v37 = vld [vmem:[%s10490_s7 + $0x2a8] ss:$28 sps:$4 sm:$0xff]   ;;  %v7281_v38 = vld [vmem:[%s10490_s7 + $0x2dc] ss:$28 sps:$4 sm:$0xff]  }
 0x27b   :  { %2485 = vmatpush1.bf16.msra.mxu1 %v6417_v52  ;;  %v7209_v52 = vld [vmem:[%s10490_s7 + $0x3c] ss:$28 sps:$4 sm:$0xff]  }
 0x27c   :  { %2567 = vmatpush1.bf16.msra.mxu0 %v6419_v53  ;;  %2486 = vmatprep.subr.bf16.mxu1 %v6426_v55  ;;  %v7212_v53 = vld [vmem:[%s10490_s7 + $0x44] ss:$28 sps:$4 sm:$0xff]   ;;  %v7207_v55 = vld [vmem:[%s10490_s7 + $0x38] ss:$28 sps:$4 sm:$0xff]  }
 0x27d   :  { %2568 = vmatprep.subr.bf16.mxu0 %v6428_v56  ;;  %v7210_v56 = vld [vmem:[%s10490_s7 + $0x40] ss:$28 sps:$4 sm:$0xff]  }
 0x27f   :  { %2487 = vmatpush1.bf16.msra.mxu1 %v6425_v2  ;;  %v7224_v2 = vld [vmem:[%s10490_s7 + $0xb4] ss:$28 sps:$4 sm:$0xff]  }
 0x280   :  { %2569 = vmatpush1.bf16.msra.mxu0 %v6427_v61  ;;  %2488 = vmatprep.subr.bf16.mxu1 %v6434_v24  ;;  %v7219_v61 = vld [vmem:[%s10490_s7 + $0xa8] ss:$28 sps:$4 sm:$0xff]   ;;  %v7222_v24 = vld [vmem:[%s10490_s7 + $0xb0] ss:$28 sps:$4 sm:$0xff]  }
 0x281   :  { %2570 = vmatprep.subr.bf16.mxu0 %v6436_v62  ;;  %v7227_v62 = vld [vmem:[%s10490_s7 + $0xe4] ss:$28 sps:$4 sm:$0xff]  }
 0x283   :  { %2489 = vmatpush1.bf16.msra.mxu1 %v6433_v5  ;;  %v7236_v5 = vld [vmem:[%s10490_s7 + $0x124] ss:$28 sps:$4 sm:$0xff]  }
 0x284   :  { %2571 = vmatpush1.bf16.msra.mxu0 %v6435_v6  ;;  %2490 = vmatprep.subr.bf16.mxu1 %v6442_v7  ;;  %v7231_v6 = vld [vmem:[%s10490_s7 + $0x118] ss:$28 sps:$4 sm:$0xff]   ;;  %v7234_v7 = vld [vmem:[%s10490_s7 + $0x120] ss:$28 sps:$4 sm:$0xff]  }
 0x285   :  { %2572 = vmatprep.subr.bf16.mxu0 %v6444_v8  ;;  %v7239_v8 = vld [vmem:[%s10490_s7 + $0x154] ss:$28 sps:$4 sm:$0xff]  }
 0x287   :  { %2491 = vmatpush1.bf16.msra.mxu1 %v6441_v16  ;;  %v7248_v16 = vld [vmem:[%s10490_s7 + $0x194] ss:$28 sps:$4 sm:$0xff]  }
 0x288   :  { %2573 = vmatpush1.bf16.msra.mxu0 %v6443_v19  ;;  %2492 = vmatprep.subr.bf16.mxu1 %v6450_v20  ;;  %v7243_v19 = vld [vmem:[%s10490_s7 + $0x188] ss:$28 sps:$4 sm:$0xff]   ;;  %v7246_v20 = vld [vmem:[%s10490_s7 + $0x190] ss:$28 sps:$4 sm:$0xff]  }
 0x289   :  { %2574 = vmatprep.subr.bf16.mxu0 %v6452_v9  ;;  %v7251_v9 = vld [vmem:[%s10490_s7 + $0x1c4] ss:$28 sps:$4 sm:$0xff]  }
 0x28b   :  { %2493 = vmatpush1.bf16.msra.mxu1 %v6449_v18  ;;  %v7260_v18 = vld [vmem:[%s10490_s7 + $0x204] ss:$28 sps:$4 sm:$0xff]  }
 0x28c   :  { %2575 = vmatpush1.bf16.msra.mxu0 %v6451_v21  ;;  %2494 = vmatprep.subr.bf16.mxu1 %v6458_v22  ;;  %v7255_v21 = vld [vmem:[%s10490_s7 + $0x1f8] ss:$28 sps:$4 sm:$0xff]   ;;  %v7258_v22 = vld [vmem:[%s10490_s7 + $0x200] ss:$28 sps:$4 sm:$0xff]  }
 0x28d   :  { %2576 = vmatprep.subr.bf16.mxu0 %v6460_v23  ;;  %v7263_v23 = vld [vmem:[%s10490_s7 + $0x234] ss:$28 sps:$4 sm:$0xff]  }
 0x28f   :  { %2495 = vmatpush1.bf16.msra.mxu1 %v6457_v30  ;;  %v7272_v30 = vld [vmem:[%s10490_s7 + $0x274] ss:$28 sps:$4 sm:$0xff]  }
 0x290   :  { %2577 = vmatpush1.bf16.msra.mxu0 %v6459_v31  ;;  %2496 = vmatprep.subr.bf16.mxu1 %v6466_v32  ;;  %v7267_v31 = vld [vmem:[%s10490_s7 + $0x268] ss:$28 sps:$4 sm:$0xff]   ;;  %v7270_v32 = vld [vmem:[%s10490_s7 + $0x270] ss:$28 sps:$4 sm:$0xff]  }
 0x291   :  { %2578 = vmatprep.subr.bf16.mxu0 %v6468_v33  ;;  %v7275_v33 = vld [vmem:[%s10490_s7 + $0x2a4] ss:$28 sps:$4 sm:$0xff]  }
 0x293   :  { %2497 = vmatpush1.bf16.msra.mxu1 %v6465_v39  ;;  %v7284_v39 = vld [vmem:[%s10490_s7 + $0x2e4] ss:$28 sps:$4 sm:$0xff]  }
 0x294   :  { %2579 = vmatpush1.bf16.msra.mxu0 %v6467_v40  ;;  %2498 = vmatprep.subr.bf16.mxu1 %v6474_v42  ;;  %v7279_v40 = vld [vmem:[%s10490_s7 + $0x2d8] ss:$28 sps:$4 sm:$0xff]   ;;  %v7282_v42 = vld [vmem:[%s10490_s7 + $0x2e0] ss:$28 sps:$4 sm:$0xff]  }
 0x295   :  { %2580 = vmatprep.subr.bf16.mxu0 %v6476_v1  ;;  %v7287_v1 = vld [vmem:[%s10490_s7 + $0x314] ss:$28 sps:$4 sm:$0xff]  }
 0x297   :  { %2499 = vmatpush1.bf16.msra.mxu1 %v6473_v43  ;;  %v7290_v43 = vld [vmem:[%s10490_s7 + $0x31c] ss:$28 sps:$4 sm:$0xff]  }
 0x298   :  { %2581 = vmatpush1.bf16.msra.mxu0 %v6475_v45  ;;  %5460 = vmatprep.subr.bf16.mxu1 %v7203_v46  ;;  %v7285_v45 = vld [vmem:[%s10490_s7 + $0x310] ss:$28 sps:$4 sm:$0xff]   ;;  %v7288_v46 = vld [vmem:[%s10490_s7 + $0x318] ss:$28 sps:$4 sm:$0xff]  }
 0x299   :  { %5624 = vmatprep.subr.bf16.mxu0 %v7206_v47  ;;  %v7293_v47 = vld [vmem:[%s10490_s7 + $0x34c] ss:$28 sps:$4 sm:$0xff]  }
 0x29a   :  { %2501 = vmatmul.mubr.bf16.vlgmr.msra.gmra.mrb[4].mxu1 %v8650_v26 }
 0x29b   :  { %2583 = vmatmul.mubr.bf16.vlgmr.msra.gmra.mrb[16].mxu0 %v8650_v26  ;;  %5461 = vmatpush1.bf16.msra.mxu1 %v7201_v48  ;;  %v7218_v26 = vld [vmem:[%s10490_s7 + $0x7c] ss:$28 sps:$4 sm:$0xff]   ;;  %v7296_v48 = vld [vmem:[%s10490_s7 + $0x354] ss:$28 sps:$4 sm:$0xff]  }
 0x29c   :  { %5625 = vmatpush1.bf16.msra.mxu0 %v7204_v49  ;;  %5462 = vmatprep.subr.bf16.mxu1 %v7209_v52  ;;  %v7291_v49 = vld [vmem:[%s10490_s7 + $0x348] ss:$28 sps:$4 sm:$0xff]   ;;  %v7294_v52 = vld [vmem:[%s10490_s7 + $0x350] ss:$28 sps:$4 sm:$0xff]  }
 0x29d   :  { %5626 = vmatprep.subr.bf16.mxu0 %v7212_v53  ;;  %v7299_v53 = vld [vmem:[%s10490_s7 + $0x384] ss:$28 sps:$4 sm:$0xff]  }
 0x29f   :  { %5463 = vmatpush1.bf16.msra.mxu1 %v7207_v55  ;;  %v7302_v55 = vld [vmem:[%s10490_s7 + $0x38c] ss:$28 sps:$4 sm:$0xff]  }
 0x2a0   :  { %5627 = vmatpush1.bf16.msra.mxu0 %v7210_v56  ;;  %5464 = vmatprep.subr.bf16.mxu1 %v7215_v57  ;;  %v9225_v56 = vld [vmem:[%s10489_s6] sm:$0xff] }
 0x2a1   :  { %5628 = vmatprep.subr.bf16.mxu0 %v7218_v26  ;;  %v946_v57 = vrot.slane %v9225_v56, %v8162_v41  ;;  %v950_v26 = vrot.slane %v9225_v56, %v8168_v44 }
 0x2a3   :  { %5465 = vmatpush1.bf16.msra.mxu1 %v7213_v58  ;;  %v958_v58 = vrot.slane %v9225_v56, %v8606_v54 }
 0x2a4   :  { %5629 = vmatpush1.bf16.msra.mxu0 %v7216_v59  ;;  %5466 = vmatprep.subr.bf16.mxu1 %v7221_v60 }
 0x2a5   :  { %5630 = vmatprep.subr.bf16.mxu0 %v7224_v2 }
 0x2a7   :  { %5467 = vmatpush1.bf16.msra.mxu1 %v7219_v61 }
 0x2a8   :  { %5631 = vmatpush1.bf16.msra.mxu0 %v7222_v24  ;;  %5468 = vmatprep.subr.bf16.mxu1 %v7227_v62 }
 0x2a9   :  { %5632 = vmatprep.subr.bf16.mxu0 %v7230_v63 }
 0x2ab   :  { %5469 = vmatpush1.bf16.msra.mxu1 %v7225_v0 }
 0x2ac   :  { %5633 = vmatpush1.bf16.msra.mxu0 %v7228_v3  ;;  %5470 = vmatprep.subr.bf16.mxu1 %v7233_v4 }
 0x2ad   :  { %5634 = vmatprep.subr.bf16.mxu0 %v7236_v5 }
 0x2af   :  { %5471 = vmatpush1.bf16.msra.mxu1 %v7231_v6 }
 0x2b0   :  { %5635 = vmatpush1.bf16.msra.mxu0 %v7234_v7  ;;  %5472 = vmatprep.subr.bf16.mxu1 %v7239_v8 }
 0x2b1   :  { %5636 = vmatprep.subr.bf16.mxu0 %v7242_v50 }
 0x2b3   :  { %5473 = vmatpush1.bf16.msra.mxu1 %v7237_v12  ;;  %v7297_v12 = vld [vmem:[%s10490_s7 + $0x380] ss:$28 sps:$4 sm:$0xff]  }
 0x2b4   :  { %5637 = vmatpush1.bf16.msra.mxu0 %v7240_v13  ;;  %5474 = vmatprep.subr.bf16.mxu1 %v7245_v15  ;;  %v7300_v13 = vld [vmem:[%s10490_s7 + $0x388] ss:$28 sps:$4 sm:$0xff]  }
 0x2b5   :  { %5638 = vmatprep.subr.bf16.mxu0 %v7248_v16  ;;  %v7305_v16 = vld [vmem:[%s10490_s7 + $0x3bc] ss:$28 sps:$4 sm:$0xff]  }
 0x2b7   :  { %5475 = vmatpush1.bf16.msra.mxu1 %v7243_v19  ;;  %v7308_v19 = vld [vmem:[%s10490_s7 + $0x3c4] ss:$28 sps:$4 sm:$0xff]  }
 0x2b8   :  { %5639 = vmatpush1.bf16.msra.mxu0 %v7246_v20  ;;  %5476 = vmatprep.subr.bf16.mxu1 %v7251_v9  ;;  %v7303_v9 = vld [vmem:[%s10490_s7 + $0x3b8] ss:$28 sps:$4 sm:$0xff]  }
 0x2b9   :  { %5640 = vmatprep.subr.bf16.mxu0 %v7254_v10  ;;  %v7306_v10 = vld [vmem:[%s10490_s7 + $0x3c0] ss:$28 sps:$4 sm:$0xff]  }
 0x2bb   :  { %5477 = vmatpush1.bf16.msra.mxu1 %v7249_v11  ;;  %v7311_v11 = vld [vmem:[%s10490_s7 + $0x3f4] ss:$28 sps:$4 sm:$0xff]  }
 0x2bc   :  { %5641 = vmatpush1.bf16.msra.mxu0 %v7252_v14  ;;  %5478 = vmatprep.subr.bf16.mxu1 %v7257_v17  ;;  %v7314_v14 = vld [vmem:[%s10490_s7 + $0x3fc] ss:$28 sps:$4 sm:$0xff]   ;;  %v7309_v17 = vld [vmem:[%s10490_s7 + $0x3f0] ss:$28 sps:$4 sm:$0xff]  }
 0x2bd   :  { %5642 = vmatprep.subr.bf16.mxu0 %v7260_v18  ;;  %v7312_v18 = vld [vmem:[%s10490_s7 + $0x3f8] ss:$28 sps:$4 sm:$0xff]  }
 0x2bf   :  { %5479 = vmatpush1.bf16.msra.mxu1 %v7255_v21  ;;  %v7317_v21 = vld [vmem:[%s10490_s7 + $0x42c] ss:$28 sps:$4 sm:$0xff]  }
 0x2c0   :  { %5643 = vmatpush1.bf16.msra.mxu0 %v7258_v22  ;;  %5480 = vmatprep.subr.bf16.mxu1 %v7263_v23  ;;  %v7320_v22 = vld [vmem:[%s10490_s7 + $0x434] ss:$28 sps:$4 sm:$0xff]   ;;  %v7315_v23 = vld [vmem:[%s10490_s7 + $0x428] ss:$28 sps:$4 sm:$0xff]  }
 0x2c1   :  { %5644 = vmatprep.subr.bf16.mxu0 %v7266_v25  ;;  %v7318_v25 = vld [vmem:[%s10490_s7 + $0x430] ss:$28 sps:$4 sm:$0xff]  }
 0x2c3   :  { %5481 = vmatpush1.bf16.msra.mxu1 %v7261_v27  ;;  %v7323_v27 = vld [vmem:[%s10490_s7 + $0x464] ss:$28 sps:$4 sm:$0xff]  }
 0x2c4   :  { %5645 = vmatpush1.bf16.msra.mxu0 %v7264_v28  ;;  %5482 = vmatprep.subr.bf16.mxu1 %v7269_v29  ;;  %v7326_v28 = vld [vmem:[%s10490_s7 + $0x46c] ss:$28 sps:$4 sm:$0xff]   ;;  %v7321_v29 = vld [vmem:[%s10490_s7 + $0x460] ss:$28 sps:$4 sm:$0xff]  }
 0x2c5   :  { %5646 = vmatprep.subr.bf16.mxu0 %v7272_v30  ;;  %v7324_v30 = vld [vmem:[%s10490_s7 + $0x468] ss:$28 sps:$4 sm:$0xff]  }
 0x2c7   :  { %5483 = vmatpush1.bf16.msra.mxu1 %v7267_v31  ;;  %v7329_v31 = vld [vmem:[%s10490_s7 + $0x49c] ss:$28 sps:$4 sm:$0xff]  }
 0x2c8   :  { %5647 = vmatpush1.bf16.msra.mxu0 %v7270_v32  ;;  %5484 = vmatprep.subr.bf16.mxu1 %v7275_v33  ;;  %v7332_v32 = vld [vmem:[%s10490_s7 + $0x4a4] ss:$28 sps:$4 sm:$0xff]   ;;  %v7327_v33 = vld [vmem:[%s10490_s7 + $0x498] ss:$28 sps:$4 sm:$0xff]  }
 0x2c9   :  { %5648 = vmatprep.subr.bf16.mxu0 %v7278_v34  ;;  %v7330_v34 = vld [vmem:[%s10490_s7 + $0x4a0] ss:$28 sps:$4 sm:$0xff]  }
 0x2cb   :  { %5485 = vmatpush1.bf16.msra.mxu1 %v7273_v35  ;;  %v7335_v35 = vld [vmem:[%s10490_s7 + $0x4d4] ss:$28 sps:$4 sm:$0xff]  }
 0x2cc   :  { %5649 = vmatpush1.bf16.msra.mxu0 %v7276_v37  ;;  %5486 = vmatprep.subr.bf16.mxu1 %v7281_v38  ;;  %v7338_v37 = vld [vmem:[%s10490_s7 + $0x4dc] ss:$28 sps:$4 sm:$0xff]   ;;  %v7333_v38 = vld [vmem:[%s10490_s7 + $0x4d0] ss:$28 sps:$4 sm:$0xff]  }
 0x2cd   :  { %5650 = vmatprep.subr.bf16.mxu0 %v7284_v39  ;;  %v7336_v39 = vld [vmem:[%s10490_s7 + $0x4d8] ss:$28 sps:$4 sm:$0xff]  }
 0x2cf   :  { %5487 = vmatpush1.bf16.msra.mxu1 %v7279_v40  ;;  %v7341_v40 = vld [vmem:[%s10490_s7 + $0x50c] ss:$28 sps:$4 sm:$0xff]  }
 0x2d0   :  { %5651 = vmatpush1.bf16.msra.mxu0 %v7282_v42  ;;  %5488 = vmatprep.subr.bf16.mxu1 %v7287_v1  ;;  %v7344_v42 = vld [vmem:[%s10490_s7 + $0x514] ss:$28 sps:$4 sm:$0xff]   ;;  %v7339_v1 = vld [vmem:[%s10490_s7 + $0x508] ss:$28 sps:$4 sm:$0xff]  }
 0x2d1   :  { %5652 = vmatprep.subr.bf16.mxu0 %v7290_v43  ;;  %v7342_v43 = vld [vmem:[%s10490_s7 + $0x510] ss:$28 sps:$4 sm:$0xff]  }
 0x2d3   :  { %5489 = vmatpush1.bf16.msra.mxu1 %v7285_v45  ;;  %v7347_v45 = vld [vmem:[%s10490_s7 + $0x544] ss:$28 sps:$4 sm:$0xff]  }
 0x2d4   :  { %5653 = vmatpush1.bf16.msra.mxu0 %v7288_v46  ;;  %5490 = vmatprep.subr.bf16.mxu1 %v7293_v47  ;;  %v7350_v46 = vld [vmem:[%s10490_s7 + $0x54c] ss:$28 sps:$4 sm:$0xff]   ;;  %v7345_v47 = vld [vmem:[%s10490_s7 + $0x540] ss:$28 sps:$4 sm:$0xff]  }
 0x2d5   :  { %5654 = vmatprep.subr.bf16.mxu0 %v7296_v48  ;;  %v7348_v48 = vld [vmem:[%s10490_s7 + $0x548] ss:$28 sps:$4 sm:$0xff]  }
 0x2d7   :  { %5491 = vmatpush1.bf16.msra.mxu1 %v7291_v49  ;;  %v7353_v49 = vld [vmem:[%s10490_s7 + $0x57c] ss:$28 sps:$4 sm:$0xff]  }
 0x2d8   :  { %5655 = vmatpush1.bf16.msra.mxu0 %v7294_v52  ;;  %5501 = vmatprep.subr.bf16.mxu1 %v7299_v53  ;;  %v7356_v52 = vld [vmem:[%s10490_s7 + $0x584] ss:$28 sps:$4 sm:$0xff]   ;;  %v7351_v53 = vld [vmem:[%s10490_s7 + $0x578] ss:$28 sps:$4 sm:$0xff]  }
 0x2d9   :  { %5665 = vmatprep.subr.bf16.mxu0 %v7302_v55  ;;  %v7354_v55 = vld [vmem:[%s10490_s7 + $0x580] ss:$28 sps:$4 sm:$0xff]  }
 0x2ed   :  { %v2338_v59 = vpop.f32.mrb[0].mxu1  ;;  %v9233_v60 = vpop.f32.mrb[12].mxu0 }
 0x2ee   :  { %v7013_v2 = vadd.f32 %v2338_v59, %v946_v57  ;;  %v2340_v61 = vpop.f32.mrb[1].mxu1  ;;  %v2422_v24 = vpop.f32.mrb[13].mxu0  ;;  %v7359_v57 = vld [vmem:[%s10490_s7 + $0x5b4] ss:$28 sps:$4 sm:$0xff]  }
 0x2ef   :  { %v7014_v62 = vadd.f32 %v2340_v61, %v950_v26  ;;  %v7016_v63 = vadd.f32 %v2422_v24, %v958_v58  ;;  %v2342_v0 = vpop.f32.mrb[2].mxu1  ;;  %v2424_v3 = vpop.f32.mrb[14].mxu0  ;;  %v7362_v26 = vld [vmem:[%s10490_s7 + $0x5bc] ss:$28 sps:$4 sm:$0xff]   ;;  %v7357_v58 = vld [vmem:[%s10490_s7 + $0x5b0] ss:$28 sps:$4 sm:$0xff]  }
 0x2f0   :  { %v2591_v4 = vmax.f32 %v7013_v2, 0.0  ;;  %v2343_v5 = vpop.f32.mrb[3].mxu1  ;;  %v2425_v6 = vpop.f32.mrb[15].mxu0  ;;  %v7360_v59 = vld [vmem:[%s10490_s7 + $0x5b8] ss:$28 sps:$4 sm:$0xff]  }
 0x2f1   :  { %v2592_v7 = vmax.f32 %v7014_v62, 0.0  ;;  %v2594_v8 = vmax.f32 %v7016_v63, 0.0  ;;  %v7365_v2 = vld [vmem:[%s10490_s7 + $0x5ec] ss:$28 sps:$4 sm:$0xff]   ;;  %v7368_v61 = vld [vmem:[%s10490_s7 + $0x5f4] ss:$28 sps:$4 sm:$0xff]  }
 0x2f2   :  { %v9243_v15 = vpack.c.bf16 %v2591_v4, %v2591_v4  ;;  %v7363_v24 = vld [vmem:[%s10490_s7 + $0x5e8] ss:$28 sps:$4 sm:$0xff]   ;;  %v7366_v62 = vld [vmem:[%s10490_s7 + $0x5f0] ss:$28 sps:$4 sm:$0xff]   ;;  %v7369_v3 = vld [vmem:[%s10490_s7 + $0x620] ss:$28 sps:$4 sm:$0xff]  }
 0x2f3   :  { %v9235_v50 = vpack.c.bf16 %v2592_v7, %v2592_v7  ;;  %v9253_v20 = vpack.c.bf16 %v2594_v8, %v2594_v8  ;;  %v7371_v63 = vld [vmem:[%s10490_s7 + $0x624] ss:$28 sps:$4 sm:$0xff]   ;;  %v7374_v0 = vld [vmem:[%s10490_s7 + $0x62c] ss:$28 sps:$4 sm:$0xff]   ;;  %v7377_v5 = vld [vmem:[%s10490_s7 + $0x65c] ss:$28 sps:$4 sm:$0xff]  }
 0x2f4   :  { %v7372_v4 = vld [vmem:[%s10490_s7 + $0x628] ss:$28 sps:$4 sm:$0xff]   ;;  %v7375_v7 = vld [vmem:[%s10490_s7 + $0x658] ss:$28 sps:$4 sm:$0xff]   ;;  %v7378_v8 = vld [vmem:[%s10490_s7 + $0x660] ss:$28 sps:$4 sm:$0xff]  }
 0x2f5   :  { %5492 = vmatprep.mubr.bf16.mxu1 %v9235_v50  ;;  %5656 = vmatprep.mubr.bf16.mxu0 %v9235_v50  ;;  %v7380_v6 = vld [vmem:[%s10490_s7 + $0x664] ss:$28 sps:$4 sm:$0xff]  }
 0x2f6   :  { %5493 = vmatmul.mubr.bf16.vlgmr.msra.gmra.mrb[8].mxu1 %v9243_v15  ;;  %5657 = vmatmul.mubr.bf16.vlgmr.msra.gmra.mrb[20].mxu0 %v9243_v15 }
 0x2f7   :  { %5502 = vmatpush1.bf16.msra.mxu1 %v7297_v12  ;;  %5666 = vmatpush1.bf16.msra.mxu0 %v7300_v13  ;;  %v954_v12 = vrot.slane %v9225_v56, %v8603_v51  ;;  %v7383_v13 = vld [vmem:[%s10490_s7 + $0x694] ss:$28 sps:$4 sm:$0xff]  }
 0x2f8   :  { %5533 = vmatprep.mubr.bf16.mxu1 %v9253_v20  ;;  %5697 = vmatprep.mubr.bf16.mxu0 %v9253_v20 }
 0x2f9   :  { %5503 = vmatprep.subr.bf16.mxu1 %v7305_v16  ;;  %5667 = vmatprep.subr.bf16.mxu0 %v7308_v19  ;;  %v7386_v16 = vld [vmem:[%s10490_s7 + $0x69c] ss:$28 sps:$4 sm:$0xff]   ;;  %v7381_v19 = vld [vmem:[%s10490_s7 + $0x690] ss:$28 sps:$4 sm:$0xff]  }
 0x2fb   :  { %5504 = vmatpush1.bf16.msra.mxu1 %v7303_v9  ;;  %5668 = vmatpush1.bf16.msra.mxu0 %v7306_v10  ;;  %v7384_v9 = vld [vmem:[%s10490_s7 + $0x698] ss:$28 sps:$4 sm:$0xff]   ;;  %v7015_v10 = vadd.f32 %v9233_v60, %v954_v12  ;;  %v7390_v60 = vld [vmem:[%s10490_s7 + $0x6d0] ss:$28 sps:$4 sm:$0xff]  }
 0x2fc   :  { %5505 = vmatprep.subr.bf16.mxu1 %v7311_v11  ;;  %5669 = vmatprep.subr.bf16.mxu0 %v7314_v14  ;;  %v7389_v11 = vld [vmem:[%s10490_s7 + $0x6cc] ss:$28 sps:$4 sm:$0xff]   ;;  %v7392_v14 = vld [vmem:[%s10490_s7 + $0x6d4] ss:$28 sps:$4 sm:$0xff]  }
 0x2fd   :  { %v7456_v12 = vld [vmem:[%s10490_s7 + $0x938] ss:$28 sps:$4 sm:$0xff]  }
 0x2ff   :  { %5506 = vmatpush1.bf16.msra.mxu1 %v7309_v17  ;;  %5670 = vmatpush1.bf16.msra.mxu0 %v7312_v18  ;;  %v7387_v17 = vld [vmem:[%s10490_s7 + $0x6c8] ss:$28 sps:$4 sm:$0xff]   ;;  %v2593_v18 = vmax.f32 %v7015_v10, 0.0 }
 0x300   :  { %5507 = vmatprep.subr.bf16.mxu1 %v7317_v21  ;;  %5671 = vmatprep.subr.bf16.mxu0 %v7320_v22  ;;  %v7395_v21 = vld [vmem:[%s10490_s7 + $0x704] ss:$28 sps:$4 sm:$0xff]   ;;  %v7398_v22 = vld [vmem:[%s10490_s7 + $0x70c] ss:$28 sps:$4 sm:$0xff]  }
 0x301   :  { %v7467_v10 = vld [vmem:[%s10490_s7 + $0x9a4] ss:$28 sps:$4 sm:$0xff]  }
 0x303   :  { %5508 = vmatpush1.bf16.msra.mxu1 %v7315_v23  ;;  %5672 = vmatpush1.bf16.msra.mxu0 %v7318_v25  ;;  %v7393_v23 = vld [vmem:[%s10490_s7 + $0x700] ss:$28 sps:$4 sm:$0xff]   ;;  %v7396_v25 = vld [vmem:[%s10490_s7 + $0x708] ss:$28 sps:$4 sm:$0xff]  }
 0x304   :  { %5509 = vmatprep.subr.bf16.mxu1 %v7323_v27  ;;  %5673 = vmatprep.subr.bf16.mxu0 %v7326_v28  ;;  %v9448_v27 = vpack.c.bf16 %v2593_v18, %v2593_v18  ;;  %v7401_v28 = vld [vmem:[%s10490_s7 + $0x73c] ss:$28 sps:$4 sm:$0xff]   ;;  %v7476_v18 = vld [vmem:[%s10490_s7 + $0x9e4] ss:$28 sps:$4 sm:$0xff]  }
 0x307   :  { %5510 = vmatpush1.bf16.msra.mxu1 %v7321_v29  ;;  %5674 = vmatpush1.bf16.msra.mxu0 %v7324_v30  ;;  %v7404_v29 = vld [vmem:[%s10490_s7 + $0x744] ss:$28 sps:$4 sm:$0xff]   ;;  %v7399_v30 = vld [vmem:[%s10490_s7 + $0x738] ss:$28 sps:$4 sm:$0xff]  }
 0x308   :  { %5511 = vmatprep.subr.bf16.mxu1 %v7329_v31  ;;  %5675 = vmatprep.subr.bf16.mxu0 %v7332_v32  ;;  %v7402_v31 = vld [vmem:[%s10490_s7 + $0x740] ss:$28 sps:$4 sm:$0xff]   ;;  %v7407_v32 = vld [vmem:[%s10490_s7 + $0x774] ss:$28 sps:$4 sm:$0xff]  }
 0x30b   :  { %5512 = vmatpush1.bf16.msra.mxu1 %v7327_v33  ;;  %5676 = vmatpush1.bf16.msra.mxu0 %v7330_v34  ;;  %v7410_v33 = vld [vmem:[%s10490_s7 + $0x77c] ss:$28 sps:$4 sm:$0xff]   ;;  %v7405_v34 = vld [vmem:[%s10490_s7 + $0x770] ss:$28 sps:$4 sm:$0xff]  }
 0x30c   :  { %5513 = vmatprep.subr.bf16.mxu1 %v7335_v35  ;;  %5677 = vmatprep.subr.bf16.mxu0 %v7338_v37  ;;  %v7408_v35 = vld [vmem:[%s10490_s7 + $0x778] ss:$28 sps:$4 sm:$0xff]   ;;  %v7413_v37 = vld [vmem:[%s10490_s7 + $0x7ac] ss:$28 sps:$4 sm:$0xff]  }
 0x30f   :  { %5514 = vmatpush1.bf16.msra.mxu1 %v7333_v38  ;;  %5678 = vmatpush1.bf16.msra.mxu0 %v7336_v39  ;;  %v7416_v38 = vld [vmem:[%s10490_s7 + $0x7b4] ss:$28 sps:$4 sm:$0xff]   ;;  %v7411_v39 = vld [vmem:[%s10490_s7 + $0x7a8] ss:$28 sps:$4 sm:$0xff]  }
 0x310   :  { %5515 = vmatprep.subr.bf16.mxu1 %v7341_v40  ;;  %5679 = vmatprep.subr.bf16.mxu0 %v7344_v42  ;;  %v7414_v40 = vld [vmem:[%s10490_s7 + $0x7b0] ss:$28 sps:$4 sm:$0xff]   ;;  %v7419_v42 = vld [vmem:[%s10490_s7 + $0x7e4] ss:$28 sps:$4 sm:$0xff]  }
 0x313   :  { %5516 = vmatpush1.bf16.msra.mxu1 %v7339_v1  ;;  %5680 = vmatpush1.bf16.msra.mxu0 %v7342_v43  ;;  %v7422_v1 = vld [vmem:[%s10490_s7 + $0x7ec] ss:$28 sps:$4 sm:$0xff]   ;;  %v7417_v43 = vld [vmem:[%s10490_s7 + $0x7e0] ss:$28 sps:$4 sm:$0xff]  }
 0x314   :  { %5517 = vmatprep.subr.bf16.mxu1 %v7347_v45  ;;  %5681 = vmatprep.subr.bf16.mxu0 %v7350_v46  ;;  %v7420_v45 = vld [vmem:[%s10490_s7 + $0x7e8] ss:$28 sps:$4 sm:$0xff]   ;;  %v7425_v46 = vld [vmem:[%s10490_s7 + $0x81c] ss:$28 sps:$4 sm:$0xff]  }
 0x317   :  { %5518 = vmatpush1.bf16.msra.mxu1 %v7345_v47  ;;  %5682 = vmatpush1.bf16.msra.mxu0 %v7348_v48  ;;  %v7428_v47 = vld [vmem:[%s10490_s7 + $0x824] ss:$28 sps:$4 sm:$0xff]   ;;  %v7423_v48 = vld [vmem:[%s10490_s7 + $0x818] ss:$28 sps:$4 sm:$0xff]  }
 0x318   :  { %5519 = vmatprep.subr.bf16.mxu1 %v7353_v49  ;;  %5683 = vmatprep.subr.bf16.mxu0 %v7356_v52  ;;  %v7426_v49 = vld [vmem:[%s10490_s7 + $0x820] ss:$28 sps:$4 sm:$0xff]   ;;  %v7431_v52 = vld [vmem:[%s10490_s7 + $0x854] ss:$28 sps:$4 sm:$0xff]  }
 0x31b   :  { %5520 = vmatpush1.bf16.msra.mxu1 %v7351_v53  ;;  %5684 = vmatpush1.bf16.msra.mxu0 %v7354_v55  ;;  %v7434_v53 = vld [vmem:[%s10490_s7 + $0x85c] ss:$28 sps:$4 sm:$0xff]   ;;  %v7429_v55 = vld [vmem:[%s10490_s7 + $0x850] ss:$28 sps:$4 sm:$0xff]  }
 0x31c   :  { %5521 = vmatprep.subr.bf16.mxu1 %v7359_v57  ;;  %5685 = vmatprep.subr.bf16.mxu0 %v7362_v26  ;;  %v7432_v57 = vld [vmem:[%s10490_s7 + $0x858] ss:$28 sps:$4 sm:$0xff]   ;;  %v7437_v26 = vld [vmem:[%s10490_s7 + $0x88c] ss:$28 sps:$4 sm:$0xff]  }
 0x31f   :  { %5522 = vmatpush1.bf16.msra.mxu1 %v7357_v58  ;;  %5686 = vmatpush1.bf16.msra.mxu0 %v7360_v59  ;;  %v7440_v58 = vld [vmem:[%s10490_s7 + $0x894] ss:$28 sps:$4 sm:$0xff]   ;;  %v7435_v59 = vld [vmem:[%s10490_s7 + $0x888] ss:$28 sps:$4 sm:$0xff]  }
 0x320   :  { %5523 = vmatprep.subr.bf16.mxu1 %v7365_v2  ;;  %5687 = vmatprep.subr.bf16.mxu0 %v7368_v61  ;;  %v7438_v2 = vld [vmem:[%s10490_s7 + $0x890] ss:$28 sps:$4 sm:$0xff]   ;;  %v7443_v61 = vld [vmem:[%s10490_s7 + $0x8c4] ss:$28 sps:$4 sm:$0xff]  }
 0x323   :  { %5524 = vmatpush1.bf16.msra.mxu1 %v7363_v24  ;;  %5688 = vmatpush1.bf16.msra.mxu0 %v7366_v62  ;;  %v7446_v24 = vld [vmem:[%s10490_s7 + $0x8cc] ss:$28 sps:$4 sm:$0xff]   ;;  %v7441_v62 = vld [vmem:[%s10490_s7 + $0x8c0] ss:$28 sps:$4 sm:$0xff]  }
 0x324   :  { %5525 = vmatprep.subr.bf16.mxu1 %v7371_v63  ;;  %5689 = vmatprep.subr.bf16.mxu0 %v7374_v0  ;;  %v7444_v63 = vld [vmem:[%s10490_s7 + $0x8c8] ss:$28 sps:$4 sm:$0xff]   ;;  %v7449_v0 = vld [vmem:[%s10490_s7 + $0x8fc] ss:$28 sps:$4 sm:$0xff]  }
 0x327   :  { %5526 = vmatpush1.bf16.msra.mxu1 %v7369_v3  ;;  %5690 = vmatpush1.bf16.msra.mxu0 %v7372_v4  ;;  %v7452_v3 = vld [vmem:[%s10490_s7 + $0x904] ss:$28 sps:$4 sm:$0xff]   ;;  %v7447_v4 = vld [vmem:[%s10490_s7 + $0x8f8] ss:$28 sps:$4 sm:$0xff]  }
 0x328   :  { %5527 = vmatprep.subr.bf16.mxu1 %v7377_v5  ;;  %5691 = vmatprep.subr.bf16.mxu0 %v7380_v6  ;;  %v7450_v5 = vld [vmem:[%s10490_s7 + $0x900] ss:$28 sps:$4 sm:$0xff]   ;;  %v7455_v6 = vld [vmem:[%s10490_s7 + $0x934] ss:$28 sps:$4 sm:$0xff]  }
 0x32b   :  { %5528 = vmatpush1.bf16.msra.mxu1 %v7375_v7  ;;  %5692 = vmatpush1.bf16.msra.mxu0 %v7378_v8  ;;  %v7458_v7 = vld [vmem:[%s10490_s7 + $0x93c] ss:$28 sps:$4 sm:$0xff]   ;;  %v7453_v8 = vld [vmem:[%s10490_s7 + $0x930] ss:$28 sps:$4 sm:$0xff]  }
 0x32c   :  { %5529 = vmatprep.subr.bf16.mxu1 %v7383_v13  ;;  %5693 = vmatprep.subr.bf16.mxu0 %v7386_v16  ;;  %v7461_v13 = vld [vmem:[%s10490_s7 + $0x96c] ss:$28 sps:$4 sm:$0xff]   ;;  %v7464_v16 = vld [vmem:[%s10490_s7 + $0x974] ss:$28 sps:$4 sm:$0xff]  }
 0x32f   :  { %5530 = vmatpush1.bf16.msra.mxu1 %v7381_v19  ;;  %5694 = vmatpush1.bf16.msra.mxu0 %v7384_v9  ;;  %v7459_v19 = vld [vmem:[%s10490_s7 + $0x968] ss:$28 sps:$4 sm:$0xff]   ;;  %v7462_v9 = vld [vmem:[%s10490_s7 + $0x970] ss:$28 sps:$4 sm:$0xff]  }
 0x330   :  { %5531 = vmatprep.subr.bf16.mxu1 %v7389_v11  ;;  %5695 = vmatprep.subr.bf16.mxu0 %v7392_v14  ;;  %v7470_v11 = vld [vmem:[%s10490_s7 + $0x9ac] ss:$28 sps:$4 sm:$0xff]   ;;  %v7465_v14 = vld [vmem:[%s10490_s7 + $0x9a0] ss:$28 sps:$4 sm:$0xff]  }
 0x333   :  { %5532 = vmatpush1.bf16.msra.mxu1 %v7387_v17  ;;  %5696 = vmatpush1.bf16.msra.mxu0 %v7390_v60  ;;  %v7468_v17 = vld [vmem:[%s10490_s7 + $0x9a8] ss:$28 sps:$4 sm:$0xff]   ;;  %v7473_v60 = vld [vmem:[%s10490_s7 + $0x9dc] ss:$28 sps:$4 sm:$0xff]  }
 0x334   :  { %5542 = vmatprep.subr.bf16.mxu1 %v7395_v21  ;;  %5706 = vmatprep.subr.bf16.mxu0 %v7398_v22  ;;  %v961_v21 = vsub.s32 4, %v8153_v36  ;;  %v7471_v22 = vld [vmem:[%s10490_s7 + $0x9d8] ss:$28 sps:$4 sm:$0xff]  }
 0x336   :  { %5534 = vmatmul.mubr.bf16.vlgmr.msra.gmra.mrb[8].mxu1 %v9448_v27  ;;  %5698 = vmatmul.mubr.bf16.vlgmr.msra.gmra.mrb[20].mxu0 %v9448_v27 }
 0x337   :  { %5543 = vmatpush1.bf16.msra.mxu1 %v7393_v23  ;;  %5707 = vmatpush1.bf16.msra.mxu0 %v7396_v25  ;;  %v7474_v23 = vld [vmem:[%s10490_s7 + $0x9e0] ss:$28 sps:$4 sm:$0xff]   ;;  %v965_v25 = vsub.s32 5, %v8153_v36 }
 0x338   :  { %5544 = vmatprep.subr.bf16.mxu1 %v7401_v28  ;;  %5708 = vmatprep.subr.bf16.mxu0 %v7404_v29  ;;  %v7479_v28 = vld [vmem:[%s10490_s7 + $0xa14] ss:$28 sps:$4 sm:$0xff]   ;;  %v7482_v29 = vld [vmem:[%s10490_s7 + $0xa1c] ss:$28 sps:$4 sm:$0xff]  }
 0x33b   :  { %5545 = vmatpush1.bf16.msra.mxu1 %v7399_v30  ;;  %5709 = vmatpush1.bf16.msra.mxu0 %v7402_v31  ;;  %v973_v30 = vsub.s32 7, %v8153_v36  ;;  %v962_v31 = vrot.slane %v9225_v56, %v961_v21 }
 0x33c   :  { %5546 = vmatprep.subr.bf16.mxu1 %v7407_v32  ;;  %5710 = vmatprep.subr.bf16.mxu0 %v7410_v33  ;;  %v7477_v32 = vld [vmem:[%s10490_s7 + $0xa10] ss:$28 sps:$4 sm:$0xff]   ;;  %v7480_v33 = vld [vmem:[%s10490_s7 + $0xa18] ss:$28 sps:$4 sm:$0xff]  }
 0x33f   :  { %5547 = vmatpush1.bf16.msra.mxu1 %v7405_v34  ;;  %5711 = vmatpush1.bf16.msra.mxu0 %v7408_v35  ;;  %v966_v34 = vrot.slane %v9225_v56, %v965_v25  ;;  %v974_v35 = vrot.slane %v9225_v56, %v973_v30  ;;  %v7530_v30 = vld [vmem:[%s10490_s7 + $0xbdc] ss:$28 sps:$4 sm:$0xff]  }
 0x340   :  { %5548 = vmatprep.subr.bf16.mxu1 %v7413_v37  ;;  %5712 = vmatprep.subr.bf16.mxu0 %v7416_v38  ;;  %v7485_v37 = vld [vmem:[%s10490_s7 + $0xa4c] ss:$28 sps:$4 sm:$0xff]   ;;  %v7488_v38 = vld [vmem:[%s10490_s7 + $0xa54] ss:$28 sps:$4 sm:$0xff]  }
 0x343   :  { %5549 = vmatpush1.bf16.msra.mxu1 %v7411_v39  ;;  %5713 = vmatpush1.bf16.msra.mxu0 %v7414_v40 }
 0x344   :  { %5550 = vmatprep.subr.bf16.mxu1 %v7419_v42  ;;  %5714 = vmatprep.subr.bf16.mxu0 %v7422_v1 }
 0x347   :  { %5551 = vmatpush1.bf16.msra.mxu1 %v7417_v43  ;;  %5715 = vmatpush1.bf16.msra.mxu0 %v7420_v45  ;;  %v7483_v43 = vld [vmem:[%s10490_s7 + $0xa48] ss:$28 sps:$4 sm:$0xff]  }
 0x348   :  { %5552 = vmatprep.subr.bf16.mxu1 %v7425_v46  ;;  %5716 = vmatprep.subr.bf16.mxu0 %v7428_v47 }
 0x34b   :  { %5553 = vmatpush1.bf16.msra.mxu1 %v7423_v48  ;;  %5717 = vmatpush1.bf16.msra.mxu0 %v7426_v49  ;;  %v7486_v48 = vld [vmem:[%s10490_s7 + $0xa50] ss:$28 sps:$4 sm:$0xff]   ;;  %v7491_v49 = vld [vmem:[%s10490_s7 + $0xa84] ss:$28 sps:$4 sm:$0xff]  }
 0x34c   :  { %5554 = vmatprep.subr.bf16.mxu1 %v7431_v52  ;;  %5718 = vmatprep.subr.bf16.mxu0 %v7434_v53 }
 0x34f   :  { %5555 = vmatpush1.bf16.msra.mxu1 %v7429_v55  ;;  %5719 = vmatpush1.bf16.msra.mxu0 %v7432_v57 }
 0x350   :  { %5556 = vmatprep.subr.bf16.mxu1 %v7437_v26  ;;  %5720 = vmatprep.subr.bf16.mxu0 %v7440_v58  ;;  %v7494_v26 = vld [vmem:[%s10490_s7 + $0xa8c] ss:$28 sps:$4 sm:$0xff]  }
 0x353   :  { %5557 = vmatpush1.bf16.msra.mxu1 %v7435_v59  ;;  %5721 = vmatpush1.bf16.msra.mxu0 %v7438_v2 }
 0x354   :  { %5558 = vmatprep.subr.bf16.mxu1 %v7443_v61  ;;  %5722 = vmatprep.subr.bf16.mxu0 %v7446_v24  ;;  %v7489_v24 = vld [vmem:[%s10490_s7 + $0xa80] ss:$28 sps:$4 sm:$0xff]  }
 0x357   :  { %5559 = vmatpush1.bf16.msra.mxu1 %v7441_v62  ;;  %5723 = vmatpush1.bf16.msra.mxu0 %v7444_v63  ;;  %v7492_v62 = vld [vmem:[%s10490_s7 + $0xa88] ss:$28 sps:$4 sm:$0xff]  }
 0x358   :  { %5560 = vmatprep.subr.bf16.mxu1 %v7449_v0  ;;  %5724 = vmatprep.subr.bf16.mxu0 %v7452_v3  ;;  %v7497_v0 = vld [vmem:[%s10490_s7 + $0xabc] ss:$28 sps:$4 sm:$0xff]   ;;  %v7500_v3 = vld [vmem:[%s10490_s7 + $0xac4] ss:$28 sps:$4 sm:$0xff]  }
 0x35b   :  { %5561 = vmatpush1.bf16.msra.mxu1 %v7447_v4  ;;  %5725 = vmatpush1.bf16.msra.mxu0 %v7450_v5  ;;  %v7495_v5 = vld [vmem:[%s10490_s7 + $0xab8] ss:$28 sps:$4 sm:$0xff]  }
 0x35c   :  { %5562 = vmatprep.subr.bf16.mxu1 %v7455_v6  ;;  %5726 = vmatprep.subr.bf16.mxu0 %v7458_v7  ;;  %v7498_v6 = vld [vmem:[%s10490_s7 + $0xac0] ss:$28 sps:$4 sm:$0xff]   ;;  %v7503_v7 = vld [vmem:[%s10490_s7 + $0xaf4] ss:$28 sps:$4 sm:$0xff]  }
 0x35f   :  { %5563 = vmatpush1.bf16.msra.mxu1 %v7453_v8  ;;  %5727 = vmatpush1.bf16.msra.mxu0 %v7456_v12  ;;  %v7506_v8 = vld [vmem:[%s10490_s7 + $0xafc] ss:$28 sps:$4 sm:$0xff]   ;;  %v7501_v12 = vld [vmem:[%s10490_s7 + $0xaf0] ss:$28 sps:$4 sm:$0xff]  }
 0x360   :  { %5564 = vmatprep.subr.bf16.mxu1 %v7461_v13  ;;  %5728 = vmatprep.subr.bf16.mxu0 %v7464_v16  ;;  %v7504_v13 = vld [vmem:[%s10490_s7 + $0xaf8] ss:$28 sps:$4 sm:$0xff]   ;;  %v7509_v16 = vld [vmem:[%s10490_s7 + $0xb2c] ss:$28 sps:$4 sm:$0xff]  }
 0x363   :  { %5565 = vmatpush1.bf16.msra.mxu1 %v7459_v19  ;;  %5729 = vmatpush1.bf16.msra.mxu0 %v7462_v9  ;;  %v7512_v19 = vld [vmem:[%s10490_s7 + $0xb34] ss:$28 sps:$4 sm:$0xff]   ;;  %v7507_v9 = vld [vmem:[%s10490_s7 + $0xb28] ss:$28 sps:$4 sm:$0xff]  }
 0x364   :  { %5566 = vmatprep.subr.bf16.mxu1 %v7467_v10  ;;  %5730 = vmatprep.subr.bf16.mxu0 %v7470_v11  ;;  %v7510_v10 = vld [vmem:[%s10490_s7 + $0xb30] ss:$28 sps:$4 sm:$0xff]   ;;  %v7515_v11 = vld [vmem:[%s10490_s7 + $0xb64] ss:$28 sps:$4 sm:$0xff]  }
 0x367   :  { %5567 = vmatpush1.bf16.msra.mxu1 %v7465_v14  ;;  %5731 = vmatpush1.bf16.msra.mxu0 %v7468_v17  ;;  %v7518_v14 = vld [vmem:[%s10490_s7 + $0xb6c] ss:$28 sps:$4 sm:$0xff]   ;;  %v7513_v17 = vld [vmem:[%s10490_s7 + $0xb60] ss:$28 sps:$4 sm:$0xff]  }
 0x368   :  { %5568 = vmatprep.subr.bf16.mxu1 %v7473_v60  ;;  %5732 = vmatprep.subr.bf16.mxu0 %v7476_v18  ;;  %v7516_v60 = vld [vmem:[%s10490_s7 + $0xb68] ss:$28 sps:$4 sm:$0xff]   ;;  %v7521_v18 = vld [vmem:[%s10490_s7 + $0xb9c] ss:$28 sps:$4 sm:$0xff]  }
 0x36b   :  { %5569 = vmatpush1.bf16.msra.mxu1 %v7471_v22  ;;  %5733 = vmatpush1.bf16.msra.mxu0 %v7474_v23  ;;  %v7524_v22 = vld [vmem:[%s10490_s7 + $0xba4] ss:$28 sps:$4 sm:$0xff]   ;;  %v7519_v23 = vld [vmem:[%s10490_s7 + $0xb98] ss:$28 sps:$4 sm:$0xff]  }
 0x36c   :  { %5570 = vmatprep.subr.bf16.mxu1 %v7479_v28  ;;  %5734 = vmatprep.subr.bf16.mxu0 %v7482_v29  ;;  %v7522_v28 = vld [vmem:[%s10490_s7 + $0xba0] ss:$28 sps:$4 sm:$0xff]   ;;  %v7527_v29 = vld [vmem:[%s10490_s7 + $0xbd4] ss:$28 sps:$4 sm:$0xff]  }
 0x36d   :  { %v2502_v39 = vpop.f32.mrb[4].mxu1 }
 0x36e   :  { %v7017_v40 = vadd.f32 %v2502_v39, %v962_v31  ;;  %v9636_v42 = vpop.f32.mrb[16].mxu0  ;;  %v2504_v1 = vpop.f32.mrb[5].mxu1  ;;  %v7525_v31 = vld [vmem:[%s10490_s7 + $0xbd0] ss:$28 sps:$4 sm:$0xff]  }
 0x36f   :  { %v7018_v45 = vadd.f32 %v2504_v1, %v966_v34  ;;  %v2586_v46 = vpop.f32.mrb[17].mxu0  ;;  %5571 = vmatpush1.bf16.msra.mxu1 %v7477_v32  ;;  %5735 = vmatpush1.bf16.msra.mxu0 %v7480_v33  ;;  %v2506_v47 = vpop.f32.mrb[6].mxu1  ;;  %v7528_v32 = vld [vmem:[%s10490_s7 + $0xbd8] ss:$28 sps:$4 sm:$0xff]   ;;  %v7533_v33 = vld [vmem:[%s10490_s7 + $0xc0c] ss:$28 sps:$4 sm:$0xff]  }
 0x370   :  { %v2595_v52 = vmax.f32 %v7017_v40, 0.0  ;;  %v7020_v53 = vadd.f32 %v2586_v46, %v974_v35  ;;  %v2588_v55 = vpop.f32.mrb[18].mxu0  ;;  %v2507_v57 = vpop.f32.mrb[7].mxu1  ;;  %5572 = vmatprep.subr.bf16.mxu1 %v7485_v37  ;;  %5736 = vmatprep.subr.bf16.mxu0 %v7488_v38  ;;  %v7536_v34 = vld [vmem:[%s10490_s7 + $0xc14] ss:$28 sps:$4 sm:$0xff]  }
 0x371   :  { %v2596_v58 = vmax.f32 %v7018_v45, 0.0  ;;  %v2589_v59 = vpop.f32.mrb[19].mxu0  ;;  %v7531_v35 = vld [vmem:[%s10490_s7 + $0xc08] ss:$28 sps:$4 sm:$0xff]   ;;  %v7534_v37 = vld [vmem:[%s10490_s7 + $0xc10] ss:$28 sps:$4 sm:$0xff]  }
 0x372   :  { %v2598_v2 = vmax.f32 %v7020_v53, 0.0  ;;  %v9658_v63 = vpack.c.bf16 %v2595_v52, %v2595_v52  ;;  %v7539_v38 = vld [vmem:[%s10490_s7 + $0xc44] ss:$28 sps:$4 sm:$0xff]   ;;  %v7542_v39 = vld [vmem:[%s10490_s7 + $0xc4c] ss:$28 sps:$4 sm:$0xff]  }
 0x373   :  { %v9650_v61 = vpack.c.bf16 %v2596_v58, %v2596_v58  ;;  %5573 = vmatpush1.bf16.msra.mxu1 %v7483_v43  ;;  %5737 = vmatpush1.bf16.msra.mxu0 %v7486_v48  ;;  %v7537_v40 = vld [vmem:[%s10490_s7 + $0xc40] ss:$28 sps:$4 sm:$0xff]   ;;  %v7540_v1 = vld [vmem:[%s10490_s7 + $0xc48] ss:$28 sps:$4 sm:$0xff]   ;;  %v7543_v46 = vld [vmem:[%s10490_s7 + $0xc78] ss:$28 sps:$4 sm:$0xff]  }
 0x374   :  { %5583 = vmatprep.subr.bf16.mxu1 %v7491_v49  ;;  %5747 = vmatprep.subr.bf16.mxu0 %v7494_v26  ;;  %v9668_v4 = vpack.c.bf16 %v2598_v2, %v2598_v2  ;;  %v7545_v43 = vld [vmem:[%s10490_s7 + $0xc7c] ss:$28 sps:$4 sm:$0xff]   ;;  %v7548_v45 = vld [vmem:[%s10490_s7 + $0xc84] ss:$28 sps:$4 sm:$0xff]   ;;  %v7551_v48 = vld [vmem:[%s10490_s7 + $0xcb4] ss:$28 sps:$4 sm:$0xff]  }
 0x375   :  { %5574 = vmatprep.mubr.bf16.mxu1 %v9650_v61  ;;  %5738 = vmatprep.mubr.bf16.mxu0 %v9650_v61  ;;  %v7546_v47 = vld [vmem:[%s10490_s7 + $0xc80] ss:$28 sps:$4 sm:$0xff]   ;;  %v7549_v52 = vld [vmem:[%s10490_s7 + $0xcb0] ss:$28 sps:$4 sm:$0xff]   ;;  %v7552_v53 = vld [vmem:[%s10490_s7 + $0xcb8] ss:$28 sps:$4 sm:$0xff]  }
 0x376   :  { %5575 = vmatmul.mubr.bf16.vlgmr.msra.gmra.mrb[8].mxu1 %v9658_v63  ;;  %5739 = vmatmul.mubr.bf16.vlgmr.msra.gmra.mrb[20].mxu0 %v9658_v63  ;;  %v7554_v49 = vld [vmem:[%s10490_s7 + $0xcbc] ss:$28 sps:$4 sm:$0xff]   ;;  %v7557_v55 = vld [vmem:[%s10490_s7 + $0xcec] ss:$28 sps:$4 sm:$0xff]   ;;  %v7560_v57 = vld [vmem:[%s10490_s7 + $0xcf4] ss:$28 sps:$4 sm:$0xff]  }
 0x377   :  { %5584 = vmatpush1.bf16.msra.mxu1 %v7489_v24  ;;  %5748 = vmatpush1.bf16.msra.mxu0 %v7492_v62  ;;  %v7555_v26 = vld [vmem:[%s10490_s7 + $0xce8] ss:$28 sps:$4 sm:$0xff]   ;;  %v7558_v58 = vld [vmem:[%s10490_s7 + $0xcf0] ss:$28 sps:$4 sm:$0xff]   ;;  %v7561_v24 = vld [vmem:[%s10490_s7 + $0xd20] ss:$28 sps:$4 sm:$0xff]  }
 0x378   :  { %5615 = vmatprep.mubr.bf16.mxu1 %v9668_v4  ;;  %5779 = vmatprep.mubr.bf16.mxu0 %v9668_v4  ;;  %v7563_v59 = vld [vmem:[%s10490_s7 + $0xd24] ss:$28 sps:$4 sm:$0xff]   ;;  %v7566_v2 = vld [vmem:[%s10490_s7 + $0xd2c] ss:$28 sps:$4 sm:$0xff]  }
 0x379   :  { %5585 = vmatprep.subr.bf16.mxu1 %v7497_v0  ;;  %5749 = vmatprep.subr.bf16.mxu0 %v7500_v3  ;;  %v7564_v62 = vld [vmem:[%s10490_s7 + $0xd28] ss:$28 sps:$4 sm:$0xff]   ;;  %v969_v0 = vsub.s32 6, %v8153_v36  ;;  %v7569_v3 = vld [vmem:[%s10490_s7 + $0xd5c] ss:$28 sps:$4 sm:$0xff]  }
 0x37b   :  { %5586 = vmatpush1.bf16.msra.mxu1 %v7495_v5  ;;  %5750 = vmatpush1.bf16.msra.mxu0 %v7498_v6  ;;  %v7572_v5 = vld [vmem:[%s10490_s7 + $0xd64] ss:$28 sps:$4 sm:$0xff]   ;;  %v7567_v6 = vld [vmem:[%s10490_s7 + $0xd58] ss:$28 sps:$4 sm:$0xff]  }
 0x37c   :  { %5587 = vmatprep.subr.bf16.mxu1 %v7503_v7  ;;  %5751 = vmatprep.subr.bf16.mxu0 %v7506_v8  ;;  %v7570_v7 = vld [vmem:[%s10490_s7 + $0xd60] ss:$28 sps:$4 sm:$0xff]   ;;  %v970_v8 = vrot.slane %v9225_v56, %v969_v0  ;;  %v7576_v56 = vld [vmem:[%s10490_s7 + $0xd98] ss:$28 sps:$4 sm:$0xff]  }
 0x37f   :  { %5588 = vmatpush1.bf16.msra.mxu1 %v7501_v12  ;;  %5752 = vmatpush1.bf16.msra.mxu0 %v7504_v13  ;;  %v7575_v12 = vld [vmem:[%s10490_s7 + $0xd94] ss:$28 sps:$4 sm:$0xff]   ;;  %v7578_v13 = vld [vmem:[%s10490_s7 + $0xd9c] ss:$28 sps:$4 sm:$0xff]  }
 0x380   :  { %5589 = vmatprep.subr.bf16.mxu1 %v7509_v16  ;;  %5753 = vmatprep.subr.bf16.mxu0 %v7512_v19  ;;  %v7573_v16 = vld [vmem:[%s10490_s7 + $0xd90] ss:$28 sps:$4 sm:$0xff]   ;;  %v7019_v19 = vadd.f32 %v9636_v42, %v970_v8  ;;  %v7630_v8 = vld [vmem:[%s10490_s7 + $0x208] ss:$28 sps:$4 sm:$0xff]  }
 0x381   :  { %v7582_v42 = vld [vmem:[%s10490_s7 + $0xdd0] ss:$28 sps:$4 sm:$0xff]  }
 0x383   :  { %5590 = vmatpush1.bf16.msra.mxu1 %v7507_v9  ;;  %5754 = vmatpush1.bf16.msra.mxu0 %v7510_v10  ;;  %v7581_v9 = vld [vmem:[%s10490_s7 + $0xdcc] ss:$28 sps:$4 sm:$0xff]   ;;  %v7584_v10 = vld [vmem:[%s10490_s7 + $0xdd4] ss:$28 sps:$4 sm:$0xff]  }
 0x384   :  { %5591 = vmatprep.subr.bf16.mxu1 %v7515_v11  ;;  %5755 = vmatprep.subr.bf16.mxu0 %v7518_v14  ;;  %v7579_v11 = vld [vmem:[%s10490_s7 + $0xdc8] ss:$28 sps:$4 sm:$0xff]   ;;  %v2597_v14 = vmax.f32 %v7019_v19, 0.0 }
 0x385   :  { %v7639_v19 = vld [vmem:[%s10490_s7 + $0x408] ss:$28 sps:$4 sm:$0xff]  }
 0x387   :  { %5592 = vmatpush1.bf16.msra.mxu1 %v7513_v17  ;;  %5756 = vmatpush1.bf16.msra.mxu0 %v7516_v60  ;;  %v7587_v17 = vld [vmem:[%s10490_s7 + $0x14] ss:$28 sps:$4 sm:$0xff]  }
 0x388   :  { %5593 = vmatprep.subr.bf16.mxu1 %v7521_v18  ;;  %5757 = vmatprep.subr.bf16.mxu0 %v7524_v22  ;;  %v7588_v60 = vld [vmem:[%s10490_s7 + $0x1d8] ss:$28 sps:$4 sm:$0xff]   ;;  %v7585_v18 = vld [vmem:[%s10490_s7 + $0x10] ss:$28 sps:$4 sm:$0xff]   ;;  %v9862_v22 = vpack.c.bf16 %v2597_v14, %v2597_v14 }
 0x389   :  { %v7647_v14 = vld [vmem:[%s10490_s7 + $0x2b4] ss:$28 sps:$4 sm:$0xff]  }
 0x38b   :  { %5594 = vmatpush1.bf16.msra.mxu1 %v7519_v23  ;;  %5758 = vmatpush1.bf16.msra.mxu0 %v7522_v28  ;;  %v7589_v23 = vld [vmem:[%s10490_s7 + $0x18] ss:$28 sps:$4 sm:$0xff]   ;;  %v7592_v28 = vld [vmem:[%s10490_s7 + $0x4c] ss:$28 sps:$4 sm:$0xff]  }
 0x38c   :  { %5595 = vmatprep.subr.bf16.mxu1 %v7527_v29  ;;  %5759 = vmatprep.subr.bf16.mxu0 %v7530_v30  ;;  %v7593_v29 = vld [vmem:[%s10490_s7 + $0x210] ss:$28 sps:$4 sm:$0xff]   ;;  %v7590_v30 = vld [vmem:[%s10490_s7 + $0x48] ss:$28 sps:$4 sm:$0xff]  }
 0x38f   :  { %5596 = vmatpush1.bf16.msra.mxu1 %v7525_v31  ;;  %5760 = vmatpush1.bf16.msra.mxu0 %v7528_v32  ;;  %v7594_v31 = vld [vmem:[%s10490_s7 + $0x50] ss:$28 sps:$4 sm:$0xff]   ;;  %v7597_v32 = vld [vmem:[%s10490_s7 + $0x84] ss:$28 sps:$4 sm:$0xff]  }
 0x390   :  { %5597 = vmatprep.subr.bf16.mxu1 %v7533_v33  ;;  %5761 = vmatprep.subr.bf16.mxu0 %v7536_v34  ;;  %v7598_v33 = vld [vmem:[%s10490_s7 + $0x248] ss:$28 sps:$4 sm:$0xff]   ;;  %v7595_v34 = vld [vmem:[%s10490_s7 + $0x80] ss:$28 sps:$4 sm:$0xff]  }
 0x393   :  { %5598 = vmatpush1.bf16.msra.mxu1 %v7531_v35  ;;  %5762 = vmatpush1.bf16.msra.mxu0 %v7534_v37  ;;  %v7602_v35 = vld [vmem:[%s10490_s7 + $0xbc] ss:$28 sps:$4 sm:$0xff]  }
 0x394   :  { %5599 = vmatprep.subr.bf16.mxu1 %v7539_v38  ;;  %5763 = vmatprep.subr.bf16.mxu0 %v7542_v39  ;;  %v7603_v37 = vld [vmem:[%s10490_s7 + $0x280] ss:$28 sps:$4 sm:$0xff]   ;;  %v7600_v38 = vld [vmem:[%s10490_s7 + $0xb8] ss:$28 sps:$4 sm:$0xff]  }
 0x395   :  { %v7604_v39 = vld [vmem:[%s10490_s7 + $0xc0] ss:$28 sps:$4 sm:$0xff]  }
 0x397   :  { %5600 = vmatpush1.bf16.msra.mxu1 %v7537_v40  ;;  %5764 = vmatpush1.bf16.msra.mxu0 %v7540_v1  ;;  %v7607_v40 = vld [vmem:[%s10490_s7 + $0xf4] ss:$28 sps:$4 sm:$0xff]  }
 0x398   :  { %5601 = vmatprep.subr.bf16.mxu1 %v7545_v43  ;;  %5765 = vmatprep.subr.bf16.mxu0 %v7548_v45  ;;  %v7608_v1 = vld [vmem:[%s10490_s7 + $0x2b8] ss:$28 sps:$4 sm:$0xff]   ;;  %v7605_v43 = vld [vmem:[%s10490_s7 + $0xf0] ss:$28 sps:$4 sm:$0xff]  }
 0x399   :  { %v7609_v45 = vld [vmem:[%s10490_s7 + $0xf8] ss:$28 sps:$4 sm:$0xff]  }
 0x39b   :  { %5602 = vmatpush1.bf16.msra.mxu1 %v7543_v46  ;;  %5766 = vmatpush1.bf16.msra.mxu0 %v7546_v47  ;;  %v7612_v46 = vld [vmem:[%s10490_s7 + $0x12c] ss:$28 sps:$4 sm:$0xff]  }
 0x39c   :  { %5603 = vmatprep.subr.bf16.mxu1 %v7551_v48  ;;  %5767 = vmatprep.subr.bf16.mxu0 %v7554_v49  ;;  %v7613_v47 = vld [vmem:[%s10490_s7 + $0x2f0] ss:$28 sps:$4 sm:$0xff]   ;;  %v7610_v48 = vld [vmem:[%s10490_s7 + $0x128] ss:$28 sps:$4 sm:$0xff]  }
 0x39d   :  { %v7614_v49 = vld [vmem:[%s10490_s7 + $0x130] ss:$28 sps:$4 sm:$0xff]  }
 0x39f   :  { %5604 = vmatpush1.bf16.msra.mxu1 %v7549_v52  ;;  %5768 = vmatpush1.bf16.msra.mxu0 %v7552_v53  ;;  %v7617_v52 = vld [vmem:[%s10490_s7 + $0x164] ss:$28 sps:$4 sm:$0xff]  }
 0x3a0   :  { %5605 = vmatprep.subr.bf16.mxu1 %v7557_v55  ;;  %5769 = vmatprep.subr.bf16.mxu0 %v7560_v57  ;;  %v7618_v53 = vld [vmem:[%s10490_s7 + $0x328] ss:$28 sps:$4 sm:$0xff]   ;;  %v7615_v55 = vld [vmem:[%s10490_s7 + $0x160] ss:$28 sps:$4 sm:$0xff]  }
 0x3a1   :  { %v7619_v57 = vld [vmem:[%s10490_s7 + $0x168] ss:$28 sps:$4 sm:$0xff]  }
 0x3a3   :  { %5606 = vmatpush1.bf16.msra.mxu1 %v7555_v26  ;;  %5770 = vmatpush1.bf16.msra.mxu0 %v7558_v58  ;;  %v7622_v26 = vld [vmem:[%s10490_s7 + $0x19c] ss:$28 sps:$4 sm:$0xff]  }
 0x3a4   :  { %5607 = vmatprep.subr.bf16.mxu1 %v7563_v59  ;;  %5771 = vmatprep.subr.bf16.mxu0 %v7566_v2  ;;  %v7623_v58 = vld [vmem:[%s10490_s7 + $0x360] ss:$28 sps:$4 sm:$0xff]   ;;  %v7620_v59 = vld [vmem:[%s10490_s7 + $0x198] ss:$28 sps:$4 sm:$0xff]  }
 0x3a5   :  { %v7624_v2 = vld [vmem:[%s10490_s7 + $0x1a0] ss:$28 sps:$4 sm:$0xff]  }
 0x3a7   :  { %5608 = vmatpush1.bf16.msra.mxu1 %v7561_v24  ;;  %5772 = vmatpush1.bf16.msra.mxu0 %v7564_v62  ;;  %v7627_v24 = vld [vmem:[%s10490_s7 + $0x1d4] ss:$28 sps:$4 sm:$0xff]  }
 0x3a8   :  { %5609 = vmatprep.subr.bf16.mxu1 %v7569_v3  ;;  %5773 = vmatprep.subr.bf16.mxu0 %v7572_v5  ;;  %v7628_v62 = vld [vmem:[%s10490_s7 + $0x558] ss:$28 sps:$4 sm:$0xff]   ;;  %v7625_v3 = vld [vmem:[%s10490_s7 + $0x1d0] ss:$28 sps:$4 sm:$0xff]  }
 0x3a9   :  { %v7629_v5 = vld [vmem:[%s10490_s7 + $0x398] ss:$28 sps:$4 sm:$0xff]  }
 0x3ab   :  { %5610 = vmatpush1.bf16.msra.mxu1 %v7567_v6  ;;  %5774 = vmatpush1.bf16.msra.mxu0 %v7570_v7  ;;  %v7632_v6 = vld [vmem:[%s10490_s7 + $0x20c] ss:$28 sps:$4 sm:$0xff]  }
 0x3ac   :  { %5611 = vmatprep.subr.bf16.mxu1 %v7575_v12  ;;  %5775 = vmatprep.subr.bf16.mxu0 %v7578_v13  ;;  %v7633_v7 = vld [vmem:[%s10490_s7 + $0x590] ss:$28 sps:$4 sm:$0xff]   ;;  %v7637_v13 = vld [vmem:[%s10490_s7 + $0x244] ss:$28 sps:$4 sm:$0xff]  }
 0x3ad   :  { %v7634_v12 = vld [vmem:[%s10490_s7 + $0x3d0] ss:$28 sps:$4 sm:$0xff]  }
 0x3af   :  { %5612 = vmatpush1.bf16.msra.mxu1 %v7573_v16  ;;  %5776 = vmatpush1.bf16.msra.mxu0 %v7576_v56  ;;  %v7638_v16 = vld [vmem:[%s10490_s7 + $0x5c8] ss:$28 sps:$4 sm:$0xff]   ;;  %v7635_v56 = vld [vmem:[%s10490_s7 + $0x240] ss:$28 sps:$4 sm:$0xff]  }
 0x3b0   :  { %5613 = vmatprep.subr.bf16.mxu1 %v7581_v9  ;;  %5777 = vmatprep.subr.bf16.mxu0 %v7584_v10  ;;  %v7642_v9 = vld [vmem:[%s10490_s7 + $0x27c] ss:$28 sps:$4 sm:$0xff]  }
 0x3b1   :  { %v7643_v10 = vld [vmem:[%s10490_s7 + $0x600] ss:$28 sps:$4 sm:$0xff]  }
 0x3b3   :  { %5614 = vmatpush1.bf16.msra.mxu1 %v7579_v11  ;;  %5778 = vmatpush1.bf16.msra.mxu0 %v7582_v42  ;;  %v7640_v11 = vld [vmem:[%s10490_s7 + $0x278] ss:$28 sps:$4 sm:$0xff]   ;;  %v7644_v42 = vld [vmem:[%s10490_s7 + $0x440] ss:$28 sps:$4 sm:$0xff]  }
 0x3b4   :  { %5788 = vmatprep.subr.bf16.mxu1 %v7587_v17  ;;  %6925 = vmatprep.subr.bf16.mxu0 %v7588_v60  ;;  %v7648_v17 = vld [vmem:[%s10490_s7 + $0x638] ss:$28 sps:$4 sm:$0xff]   ;;  %v7645_v60 = vld [vmem:[%s10490_s7 + $0x2b0] ss:$28 sps:$4 sm:$0xff]  }
 0x3b6   :  { %5616 = vmatmul.mubr.bf16.vlgmr.msra.gmra.mrb[8].mxu1 %v9862_v22  ;;  %5780 = vmatmul.mubr.bf16.vlgmr.msra.gmra.mrb[20].mxu0 %v9862_v22 }
 0x3b7   :  { %5789 = vmatpush1.bf16.msra.mxu1 %v7585_v18  ;;  %5820 = vmatprep.mubr.bf16.mxu1 %v9235_v50  ;;  %v7649_v18 = vld [vmem:[%s10490_s7 + $0x478] ss:$28 sps:$4 sm:$0xff]  }
 0x3b8   :  { %6926 = vmatpush3.bf16.msra.mxu0 %v7589_v23  ;;  %5984 = vmatprep.mubr.bf16.mxu0 %v9235_v50  ;;  %v7599_v50 = vld [vmem:[%s10490_s7 + $0x88] ss:$28 sps:$4 sm:$0xff]  }
 0x3b9   :  { %5790 = vmatprep.subr.bf16.mxu1 %v7592_v28  ;;  %6927 = vmatprep.subr.bf16.mxu0 %v7593_v29  ;;  %v7652_v23 = vld [vmem:[%s10490_s7 + $0x2ec] ss:$28 sps:$4 sm:$0xff]  }
 0x3ba   :  { %v7653_v28 = vld [vmem:[%s10490_s7 + $0x670] ss:$28 sps:$4 sm:$0xff]   ;;  %v7650_v29 = vld [vmem:[%s10490_s7 + $0x2e8] ss:$28 sps:$4 sm:$0xff]  }
 0x3bb   :  { %5791 = vmatpush1.bf16.msra.mxu1 %v7590_v30  ;;  %v7654_v30 = vld [vmem:[%s10490_s7 + $0x4b0] ss:$28 sps:$4 sm:$0xff]  }
 0x3bc   :  { %6928 = vmatpush3.bf16.msra.mxu0 %v7594_v31  ;;  %5792 = vmatprep.subr.bf16.mxu1 %v7597_v32  ;;  %v7657_v31 = vld [vmem:[%s10490_s7 + $0x324] ss:$28 sps:$4 sm:$0xff]  }
 0x3bd   :  { %6929 = vmatprep.subr.bf16.mxu0 %v7598_v33  ;;  %v7658_v32 = vld [vmem:[%s10490_s7 + $0x6a8] ss:$28 sps:$4 sm:$0xff]   ;;  %v7655_v33 = vld [vmem:[%s10490_s7 + $0x320] ss:$28 sps:$4 sm:$0xff]  }
 0x3bf   :  { %5793 = vmatpush1.bf16.msra.mxu1 %v7595_v34  ;;  %v7659_v34 = vld [vmem:[%s10490_s7 + $0x4e8] ss:$28 sps:$4 sm:$0xff]  }
 0x3c0   :  { %6930 = vmatpush3.bf16.msra.mxu0 %v7599_v50  ;;  %5794 = vmatprep.subr.bf16.mxu1 %v7602_v35  ;;  %v7662_v50 = vld [vmem:[%s10490_s7 + $0x35c] ss:$28 sps:$4 sm:$0xff]  }
 0x3c1   :  { %6931 = vmatprep.subr.bf16.mxu0 %v7603_v37  ;;  %v7663_v35 = vld [vmem:[%s10490_s7 + $0x6e0] ss:$28 sps:$4 sm:$0xff]   ;;  %v7660_v37 = vld [vmem:[%s10490_s7 + $0x358] ss:$28 sps:$4 sm:$0xff]  }
 0x3c3   :  { %5795 = vmatpush1.bf16.msra.mxu1 %v7600_v38  ;;  %v7664_v38 = vld [vmem:[%s10490_s7 + $0x520] ss:$28 sps:$4 sm:$0xff]  }
 0x3c4   :  { %6932 = vmatpush3.bf16.msra.mxu0 %v7604_v39  ;;  %5796 = vmatprep.subr.bf16.mxu1 %v7607_v40  ;;  %v7667_v39 = vld [vmem:[%s10490_s7 + $0x394] ss:$28 sps:$4 sm:$0xff]  }
 0x3c5   :  { %6933 = vmatprep.subr.bf16.mxu0 %v7608_v1  ;;  %v7668_v40 = vld [vmem:[%s10490_s7 + $0x8d8] ss:$28 sps:$4 sm:$0xff]   ;;  %v7665_v1 = vld [vmem:[%s10490_s7 + $0x390] ss:$28 sps:$4 sm:$0xff]  }
 0x3c7   :  { %5797 = vmatpush1.bf16.msra.mxu1 %v7605_v43  ;;  %v7669_v43 = vld [vmem:[%s10490_s7 + $0x718] ss:$28 sps:$4 sm:$0xff]  }
 0x3c8   :  { %6934 = vmatpush3.bf16.msra.mxu0 %v7609_v45  ;;  %5798 = vmatprep.subr.bf16.mxu1 %v7612_v46  ;;  %v7672_v45 = vld [vmem:[%s10490_s7 + $0x3cc] ss:$28 sps:$4 sm:$0xff]  }
 0x3c9   :  { %6935 = vmatprep.subr.bf16.mxu0 %v7613_v47  ;;  %v7673_v46 = vld [vmem:[%s10490_s7 + $0x910] ss:$28 sps:$4 sm:$0xff]   ;;  %v7670_v47 = vld [vmem:[%s10490_s7 + $0x3c8] ss:$28 sps:$4 sm:$0xff]  }
 0x3cb   :  { %5799 = vmatpush1.bf16.msra.mxu1 %v7610_v48  ;;  %v7674_v48 = vld [vmem:[%s10490_s7 + $0x750] ss:$28 sps:$4 sm:$0xff]  }
 0x3cc   :  { %6936 = vmatpush3.bf16.msra.mxu0 %v7614_v49  ;;  %5800 = vmatprep.subr.bf16.mxu1 %v7617_v52  ;;  %v7678_v49 = vld [vmem:[%s10490_s7 + $0x948] ss:$28 sps:$4 sm:$0xff]  }
 0x3cd   :  { %6937 = vmatprep.subr.bf16.mxu0 %v7618_v53  ;;  %v7679_v52 = vld [vmem:[%s10490_s7 + $0x788] ss:$28 sps:$4 sm:$0xff]   ;;  %v7682_v53 = vld [vmem:[%s10490_s7 + $0x43c] ss:$28 sps:$4 sm:$0xff]  }
 0x3cf   :  { %5801 = vmatpush1.bf16.msra.mxu1 %v7615_v55  ;;  %v7683_v55 = vld [vmem:[%s10490_s7 + $0x980] ss:$28 sps:$4 sm:$0xff]  }
 0x3d0   :  { %6938 = vmatpush3.bf16.msra.mxu0 %v7619_v57  ;;  %5802 = vmatprep.subr.bf16.mxu1 %v7622_v26  ;;  %v7680_v57 = vld [vmem:[%s10490_s7 + $0x438] ss:$28 sps:$4 sm:$0xff]   ;;  %v7684_v26 = vld [vmem:[%s10490_s7 + $0x7c0] ss:$28 sps:$4 sm:$0xff]  }
 0x3d1   :  { %6939 = vmatprep.subr.bf16.mxu0 %v7623_v58  ;;  %v7687_v58 = vld [vmem:[%s10490_s7 + $0x474] ss:$28 sps:$4 sm:$0xff]  }
 0x3d3   :  { %5803 = vmatpush1.bf16.msra.mxu1 %v7620_v59  ;;  %v7688_v59 = vld [vmem:[%s10490_s7 + $0x9b8] ss:$28 sps:$4 sm:$0xff]  }
 0x3d4   :  { %6940 = vmatpush3.bf16.msra.mxu0 %v7624_v2  ;;  %5804 = vmatprep.subr.bf16.mxu1 %v7627_v24  ;;  %v7685_v2 = vld [vmem:[%s10490_s7 + $0x470] ss:$28 sps:$4 sm:$0xff]   ;;  %v7689_v24 = vld [vmem:[%s10490_s7 + $0x7f8] ss:$28 sps:$4 sm:$0xff]  }
 0x3d5   :  { %6947 = vmatprep.subr.bf16.mxu0 %v7628_v62  ;;  %v7692_v62 = vld [vmem:[%s10490_s7 + $0x4ac] ss:$28 sps:$4 sm:$0xff]  }
 0x3d7   :  { %5985 = vmatmul.mubr.bf16.vlgmr.msra.gmra.mrb[24].mxu0 %v9243_v15  ;;  %5805 = vmatpush1.bf16.msra.mxu1 %v7625_v3  ;;  %v7693_v3 = vld [vmem:[%s10490_s7 + $0x9f0] ss:$28 sps:$4 sm:$0xff]  }
 0x3d8   :  { %6948 = vmatpush3.bf16.msra.mxu0 %v7629_v5  ;;  %6024 = vmatprep.mubr.bf16.mxu0 %v9253_v20  ;;  %v7690_v5 = vld [vmem:[%s10490_s7 + $0x4a8] ss:$28 sps:$4 sm:$0xff]  }
 0x3d9   :  { %5806 = vmatprep.subr.bf16.mxu1 %v7632_v6  ;;  %6949 = vmatprep.subr.bf16.mxu0 %v7633_v7  ;;  %v7694_v6 = vld [vmem:[%s10490_s7 + $0x830] ss:$28 sps:$4 sm:$0xff]   ;;  %v7697_v7 = vld [vmem:[%s10490_s7 + $0x4e4] ss:$28 sps:$4 sm:$0xff]  }
 0x3db   :  { %5807 = vmatpush1.bf16.msra.mxu1 %v7630_v8  ;;  %v7698_v8 = vld [vmem:[%s10490_s7 + $0xa28] ss:$28 sps:$4 sm:$0xff]  }
 0x3dc   :  { %6950 = vmatpush3.bf16.msra.mxu0 %v7634_v12  ;;  %5808 = vmatprep.subr.bf16.mxu1 %v7637_v13  ;;  %v7695_v12 = vld [vmem:[%s10490_s7 + $0x4e0] ss:$28 sps:$4 sm:$0xff]   ;;  %v7699_v13 = vld [vmem:[%s10490_s7 + $0x868] ss:$28 sps:$4 sm:$0xff]  }
 0x3dd   :  { %6951 = vmatprep.subr.bf16.mxu0 %v7638_v16  ;;  %v7702_v16 = vld [vmem:[%s10490_s7 + $0x51c] ss:$28 sps:$4 sm:$0xff]  }
 0x3df   :  { %5809 = vmatpush1.bf16.msra.mxu1 %v7635_v56  ;;  %v7703_v56 = vld [vmem:[%s10490_s7 + $0xa60] ss:$28 sps:$4 sm:$0xff]  }
 0x3e0   :  { %6952 = vmatpush3.bf16.msra.mxu0 %v7639_v19  ;;  %5810 = vmatprep.subr.bf16.mxu1 %v7642_v9  ;;  %v7700_v19 = vld [vmem:[%s10490_s7 + $0x518] ss:$28 sps:$4 sm:$0xff]   ;;  %v7704_v9 = vld [vmem:[%s10490_s7 + $0x8a0] ss:$28 sps:$4 sm:$0xff]  }
 0x3e1   :  { %6953 = vmatprep.subr.bf16.mxu0 %v7643_v10  ;;  %v7707_v10 = vld [vmem:[%s10490_s7 + $0x554] ss:$28 sps:$4 sm:$0xff]  }
 0x3e3   :  { %5811 = vmatpush1.bf16.msra.mxu1 %v7640_v11  ;;  %v7708_v11 = vld [vmem:[%s10490_s7 + $0xc58] ss:$28 sps:$4 sm:$0xff]  }
 0x3e4   :  { %6954 = vmatpush3.bf16.msra.mxu0 %v7644_v42  ;;  %5812 = vmatprep.subr.bf16.mxu1 %v7647_v14  ;;  %v7705_v42 = vld [vmem:[%s10490_s7 + $0x550] ss:$28 sps:$4 sm:$0xff]   ;;  %v7709_v14 = vld [vmem:[%s10490_s7 + $0xa98] ss:$28 sps:$4 sm:$0xff]  }
 0x3e5   :  { %6955 = vmatprep.subr.bf16.mxu0 %v7648_v17  ;;  %v7712_v17 = vld [vmem:[%s10490_s7 + $0x58c] ss:$28 sps:$4 sm:$0xff]  }
 0x3e7   :  { %5813 = vmatpush1.bf16.msra.mxu1 %v7645_v60  ;;  %v7713_v60 = vld [vmem:[%s10490_s7 + $0xc90] ss:$28 sps:$4 sm:$0xff]  }
 0x3e8   :  { %6956 = vmatpush3.bf16.msra.mxu0 %v7649_v18  ;;  %5814 = vmatprep.subr.bf16.mxu1 %v7652_v23  ;;  %v7710_v18 = vld [vmem:[%s10490_s7 + $0x588] ss:$28 sps:$4 sm:$0xff]   ;;  %v7714_v23 = vld [vmem:[%s10490_s7 + $0xad0] ss:$28 sps:$4 sm:$0xff]  }
 0x3e9   :  { %6957 = vmatprep.subr.bf16.mxu0 %v7653_v28  ;;  %v7717_v28 = vld [vmem:[%s10490_s7 + $0x5c4] ss:$28 sps:$4 sm:$0xff]  }
 0x3eb   :  { %5815 = vmatpush1.bf16.msra.mxu1 %v7650_v29  ;;  %v7718_v29 = vld [vmem:[%s10490_s7 + $0xcc8] ss:$28 sps:$4 sm:$0xff]  }
 0x3ec   :  { %6958 = vmatpush3.bf16.msra.mxu0 %v7654_v30  ;;  %5816 = vmatprep.subr.bf16.mxu1 %v7657_v31  ;;  %v7715_v30 = vld [vmem:[%s10490_s7 + $0x5c0] ss:$28 sps:$4 sm:$0xff]   ;;  %v7719_v31 = vld [vmem:[%s10490_s7 + $0xb08] ss:$28 sps:$4 sm:$0xff]  }
 0x3ed   :  { %6959 = vmatprep.subr.bf16.mxu0 %v7658_v32  ;;  %v7722_v32 = vld [vmem:[%s10490_s7 + $0x5fc] ss:$28 sps:$4 sm:$0xff]  }
 0x3ef   :  { %5817 = vmatpush1.bf16.msra.mxu1 %v7655_v33  ;;  %v7723_v33 = vld [vmem:[%s10490_s7 + $0xd00] ss:$28 sps:$4 sm:$0xff]  }
 0x3f0   :  { %6960 = vmatpush3.bf16.msra.mxu0 %v7659_v34  ;;  %5818 = vmatprep.subr.bf16.mxu1 %v7662_v50  ;;  %v7720_v34 = vld [vmem:[%s10490_s7 + $0x5f8] ss:$28 sps:$4 sm:$0xff]   ;;  %v7724_v50 = vld [vmem:[%s10490_s7 + $0xb40] ss:$28 sps:$4 sm:$0xff]  }
 0x3f1   :  { %6961 = vmatprep.subr.bf16.mxu0 %v7663_v35  ;;  %v7727_v35 = vld [vmem:[%s10490_s7 + $0x634] ss:$28 sps:$4 sm:$0xff]  }
 0x3f3   :  { %5819 = vmatpush1.bf16.msra.mxu1 %v7660_v37  ;;  %v7728_v37 = vld [vmem:[%s10490_s7 + $0xd38] ss:$28 sps:$4 sm:$0xff]  }
 0x3f4   :  { %6962 = vmatpush3.bf16.msra.mxu0 %v7664_v38  ;;  %5829 = vmatprep.subr.bf16.mxu1 %v7667_v39  ;;  %v7725_v38 = vld [vmem:[%s10490_s7 + $0x630] ss:$28 sps:$4 sm:$0xff]   ;;  %v7729_v39 = vld [vmem:[%s10490_s7 + $0xb78] ss:$28 sps:$4 sm:$0xff]  }
 0x3f5   :  { %6969 = vmatprep.subr.bf16.mxu0 %v7668_v40  ;;  %v7732_v40 = vld [vmem:[%s10490_s7 + $0x66c] ss:$28 sps:$4 sm:$0xff]  }
 0x3f6   :  { %5821 = vmatmul.mubr.bf16.vlgmr.msra.gmra.mrb[12].mxu1 %v9243_v15  ;;  %v7677_v15 = vld [vmem:[%s10490_s7 + $0x404] ss:$28 sps:$4 sm:$0xff]  }
 0x3f7   :  { %6025 = vmatmul.mubr.bf16.vlgmr.msra.gmra.mrb[28].mxu0 %v9448_v27  ;;  %5830 = vmatpush1.bf16.msra.mxu1 %v7665_v1  ;;  %v7733_v1 = vld [vmem:[%s10490_s7 + $0xd70] ss:$28 sps:$4 sm:$0xff]  }
 0x3f8   :  { %5861 = vmatprep.mubr.bf16.mxu1 %v9253_v20  ;;  %6970 = vmatpush3.bf16.msra.mxu0 %v7669_v43  ;;  %v7675_v20 = vld [vmem:[%s10490_s7 + $0x400] ss:$28 sps:$4 sm:$0xff]   ;;  %v7730_v43 = vld [vmem:[%s10490_s7 + $0x668] ss:$28 sps:$4 sm:$0xff]  }
 0x3f9   :  { %6064 = vmatprep.mubr.bf16.mxu0 %v9650_v61  ;;  %5831 = vmatprep.subr.bf16.mxu1 %v7672_v45  ;;  %v7734_v45 = vld [vmem:[%s10490_s7 + $0xbb0] ss:$28 sps:$4 sm:$0xff]  }
 0x3fa   :  { %6971 = vmatprep.subr.bf16.mxu0 %v7673_v46  ;;  %v7737_v46 = vld [vmem:[%s10490_s7 + $0x6a4] ss:$28 sps:$4 sm:$0xff]  }
 0x3fb   :  { %5832 = vmatpush1.bf16.msra.mxu1 %v7670_v47  ;;  %v7738_v47 = vld [vmem:[%s10490_s7 + $0xda8] ss:$28 sps:$4 sm:$0xff]  }
 0x3fc   :  { %6972 = vmatpush3.bf16.msra.mxu0 %v7674_v48  ;;  %5833 = vmatprep.subr.bf16.mxu1 %v7677_v15  ;;  %v7735_v48 = vld [vmem:[%s10490_s7 + $0x6a0] ss:$28 sps:$4 sm:$0xff]   ;;  %v7739_v15 = vld [vmem:[%s10490_s7 + $0xbe8] ss:$28 sps:$4 sm:$0xff]  }
 0x3fd   :  { %6973 = vmatprep.subr.bf16.mxu0 %v7678_v49  ;;  %v7742_v49 = vld [vmem:[%s10490_s7 + $0x6dc] ss:$28 sps:$4 sm:$0xff]  }
 0x3ff   :  { %5834 = vmatpush1.bf16.msra.mxu1 %v7675_v20  ;;  %v7743_v20 = vld [vmem:[%s10490_s7 + $0xde0] ss:$28 sps:$4 sm:$0xff]  }
 0x400   :  { %6974 = vmatpush3.bf16.msra.mxu0 %v7679_v52  ;;  %5835 = vmatprep.subr.bf16.mxu1 %v7682_v53  ;;  %v7740_v52 = vld [vmem:[%s10490_s7 + $0x6d8] ss:$28 sps:$4 sm:$0xff]   ;;  %v7744_v53 = vld [vmem:[%s10490_s7 + $0xc20] ss:$28 sps:$4 sm:$0xff]  }
 0x401   :  { %6975 = vmatprep.subr.bf16.mxu0 %v7683_v55  ;;  %v7747_v55 = vld [vmem:[%s10490_s7 + $0x714] ss:$28 sps:$4 sm:$0xff]  }
 0x403   :  { %5836 = vmatpush1.bf16.msra.mxu1 %v7680_v57  ;;  %v7745_v57 = vld [vmem:[%s10490_s7 + $0x710] ss:$28 sps:$4 sm:$0xff]  }
 0x404   :  { %6976 = vmatpush3.bf16.msra.mxu0 %v7684_v26  ;;  %5837 = vmatprep.subr.bf16.mxu1 %v7687_v58  ;;  %v7750_v26 = vld [vmem:[%s10490_s7 + $0x74c] ss:$28 sps:$4 sm:$0xff]  }
 0x405   :  { %6977 = vmatprep.subr.bf16.mxu0 %v7688_v59  ;;  %v7748_v58 = vld [vmem:[%s10490_s7 + $0x748] ss:$28 sps:$4 sm:$0xff]  }
 0x406   :  { %v7753_v59 = vld [vmem:[%s10490_s7 + $0x784] ss:$28 sps:$4 sm:$0xff]  }
 0x407   :  { %5838 = vmatpush1.bf16.msra.mxu1 %v7685_v2  ;;  %v7751_v2 = vld [vmem:[%s10490_s7 + $0x780] ss:$28 sps:$4 sm:$0xff]  }
 0x408   :  { %6978 = vmatpush3.bf16.msra.mxu0 %v7689_v24  ;;  %5839 = vmatprep.subr.bf16.mxu1 %v7692_v62  ;;  %v7759_v24 = vld [vmem:[%s10490_s7 + $0x7f4] ss:$28 sps:$4 sm:$0xff]  }
 0x409   :  { %6979 = vmatprep.subr.bf16.mxu0 %v7693_v3  ;;  %v7757_v62 = vld [vmem:[%s10490_s7 + $0x7f0] ss:$28 sps:$4 sm:$0xff]  }
 0x40a   :  { %v7762_v3 = vld [vmem:[%s10490_s7 + $0x82c] ss:$28 sps:$4 sm:$0xff]  }
 0x40b   :  { %5840 = vmatpush1.bf16.msra.mxu1 %v7690_v5  ;;  %v7760_v5 = vld [vmem:[%s10490_s7 + $0x828] ss:$28 sps:$4 sm:$0xff]  }
 0x40c   :  { %6980 = vmatpush3.bf16.msra.mxu0 %v7694_v6  ;;  %5841 = vmatprep.subr.bf16.mxu1 %v7697_v7  ;;  %v7765_v6 = vld [vmem:[%s10490_s7 + $0x864] ss:$28 sps:$4 sm:$0xff]  }
 0x40d   :  { %6981 = vmatprep.subr.bf16.mxu0 %v7698_v8  ;;  %v7763_v7 = vld [vmem:[%s10490_s7 + $0x860] ss:$28 sps:$4 sm:$0xff]  }
 0x40e   :  { %v7768_v8 = vld [vmem:[%s10490_s7 + $0x89c] ss:$28 sps:$4 sm:$0xff]  }
 0x40f   :  { %5842 = vmatpush1.bf16.msra.mxu1 %v7695_v12  ;;  %v7766_v12 = vld [vmem:[%s10490_s7 + $0x898] ss:$28 sps:$4 sm:$0xff]  }
 0x410   :  { %6982 = vmatpush3.bf16.msra.mxu0 %v7699_v13  ;;  %5843 = vmatprep.subr.bf16.mxu1 %v7702_v16  ;;  %v7771_v13 = vld [vmem:[%s10490_s7 + $0x8d4] ss:$28 sps:$4 sm:$0xff]  }
 0x411   :  { %6983 = vmatprep.subr.bf16.mxu0 %v7703_v56  ;;  %v7769_v16 = vld [vmem:[%s10490_s7 + $0x8d0] ss:$28 sps:$4 sm:$0xff]  }
 0x412   :  { %v7774_v56 = vld [vmem:[%s10490_s7 + $0x90c] ss:$28 sps:$4 sm:$0xff]  }
 0x413   :  { %5844 = vmatpush1.bf16.msra.mxu1 %v7700_v19  ;;  %v7772_v19 = vld [vmem:[%s10490_s7 + $0x908] ss:$28 sps:$4 sm:$0xff]  }
 0x414   :  { %6984 = vmatpush3.bf16.msra.mxu0 %v7704_v9  ;;  %5845 = vmatprep.subr.bf16.mxu1 %v7707_v10  ;;  %v7777_v9 = vld [vmem:[%s10490_s7 + $0x944] ss:$28 sps:$4 sm:$0xff]  }
 0x415   :  { %6991 = vmatprep.subr.bf16.mxu0 %v7708_v11  ;;  %v7775_v10 = vld [vmem:[%s10490_s7 + $0x940] ss:$28 sps:$4 sm:$0xff]  }
 0x416   :  { %v7780_v11 = vld [vmem:[%s10490_s7 + $0x97c] ss:$28 sps:$4 sm:$0xff]  }
 0x417   :  { %6065 = vmatmul.mubr.bf16.vlgmr.msra.gmra.mrb[32].mxu0 %v9658_v63  ;;  %5846 = vmatpush1.bf16.msra.mxu1 %v7705_v42  ;;  %v7778_v42 = vld [vmem:[%s10490_s7 + $0x978] ss:$28 sps:$4 sm:$0xff]  }
 0x418   :  { %6992 = vmatpush3.bf16.msra.mxu0 %v7709_v14  ;;  %6104 = vmatprep.mubr.bf16.mxu0 %v9668_v4  ;;  %v7783_v14 = vld [vmem:[%s10490_s7 + $0x9b4] ss:$28 sps:$4 sm:$0xff]  }
 0x419   :  { %5847 = vmatprep.subr.bf16.mxu1 %v7712_v17  ;;  %6993 = vmatprep.subr.bf16.mxu0 %v7713_v60  ;;  %v7781_v17 = vld [vmem:[%s10490_s7 + $0x9b0] ss:$28 sps:$4 sm:$0xff]  }
 0x41a   :  { %v7786_v60 = vld [vmem:[%s10490_s7 + $0x9ec] ss:$28 sps:$4 sm:$0xff]  }
 0x41b   :  { %5848 = vmatpush1.bf16.msra.mxu1 %v7710_v18  ;;  %v7784_v18 = vld [vmem:[%s10490_s7 + $0x9e8] ss:$28 sps:$4 sm:$0xff]  }
 0x41c   :  { %6994 = vmatpush3.bf16.msra.mxu0 %v7714_v23  ;;  %5849 = vmatprep.subr.bf16.mxu1 %v7717_v28  ;;  %v7789_v23 = vld [vmem:[%s10490_s7 + $0xa24] ss:$28 sps:$4 sm:$0xff]  }
 0x41d   :  { %6995 = vmatprep.subr.bf16.mxu0 %v7718_v29  ;;  %v7787_v28 = vld [vmem:[%s10490_s7 + $0xa20] ss:$28 sps:$4 sm:$0xff]  }
 0x41e   :  { %v7792_v29 = vld [vmem:[%s10490_s7 + $0xa5c] ss:$28 sps:$4 sm:$0xff]  }
 0x41f   :  { %5850 = vmatpush1.bf16.msra.mxu1 %v7715_v30  ;;  %v7790_v30 = vld [vmem:[%s10490_s7 + $0xa58] ss:$28 sps:$4 sm:$0xff]  }
 0x420   :  { %6996 = vmatpush3.bf16.msra.mxu0 %v7719_v31  ;;  %5851 = vmatprep.subr.bf16.mxu1 %v7722_v32  ;;  %v7795_v31 = vld [vmem:[%s10490_s7 + $0xa94] ss:$28 sps:$4 sm:$0xff]  }
 0x421   :  { %6997 = vmatprep.subr.bf16.mxu0 %v7723_v33  ;;  %v7793_v32 = vld [vmem:[%s10490_s7 + $0xa90] ss:$28 sps:$4 sm:$0xff]  }
 0x422   :  { %v7798_v33 = vld [vmem:[%s10490_s7 + $0xacc] ss:$28 sps:$4 sm:$0xff]  }
 0x423   :  { %5852 = vmatpush1.bf16.msra.mxu1 %v7720_v34  ;;  %v7796_v34 = vld [vmem:[%s10490_s7 + $0xac8] ss:$28 sps:$4 sm:$0xff]  }
 0x424   :  { %6998 = vmatpush3.bf16.msra.mxu0 %v7724_v50  ;;  %5853 = vmatprep.subr.bf16.mxu1 %v7727_v35  ;;  %v7801_v50 = vld [vmem:[%s10490_s7 + $0xb04] ss:$28 sps:$4 sm:$0xff]  }
 0x425   :  { %6999 = vmatprep.subr.bf16.mxu0 %v7728_v37  ;;  %v7799_v35 = vld [vmem:[%s10490_s7 + $0xb00] ss:$28 sps:$4 sm:$0xff]   ;;  %v7807_v37 = vld [vmem:[%s10490_s7 + $0xb74] ss:$28 sps:$4 sm:$0xff]  }
 0x427   :  { %5854 = vmatpush1.bf16.msra.mxu1 %v7725_v38  ;;  %v7805_v38 = vld [vmem:[%s10490_s7 + $0xb70] ss:$28 sps:$4 sm:$0xff]  }
 0x428   :  { %7000 = vmatpush3.bf16.msra.mxu0 %v7729_v39  ;;  %5855 = vmatprep.subr.bf16.mxu1 %v7732_v40  ;;  %v10385_v39 = vld [vmem:[%s10491_s8] sm:$0x7f]  ;;  %v7810_v40 = vld [vmem:[%s10490_s7 + $0xbac] ss:$28 sps:$4 sm:$0xff]  }
 0x429   :  { %7001 = vmatprep.subr.bf16.mxu0 %v7733_v1  ;;  %v3124_v1 = vrot.slane %v10385_v39, %v8162_v41 }
 0x42b   :  { %5856 = vmatpush1.bf16.msra.mxu1 %v7730_v43  ;;  %v3132_v43 = vrot.slane %v10385_v39, %v8603_v51 }
 0x42c   :  { %7002 = vmatpush3.bf16.msra.mxu0 %v7734_v45  ;;  %5857 = vmatprep.subr.bf16.mxu1 %v7737_v46  ;;  %v3128_v45 = vrot.slane %v10385_v39, %v8168_v44  ;;  %v3136_v46 = vrot.slane %v10385_v39, %v8606_v54  ;;  %v7811_v54 = vld [vmem:[%s10490_s7 + $0xbe0] ss:$28 sps:$4 sm:$0xff]  }
 0x42d   :  { %7003 = vmatprep.subr.bf16.mxu0 %v7738_v47  ;;  %v7808_v47 = vld [vmem:[%s10490_s7 + $0xba8] ss:$28 sps:$4 sm:$0xff]  }
 0x42f   :  { %5858 = vmatpush1.bf16.msra.mxu1 %v7735_v48  ;;  %v7813_v48 = vld [vmem:[%s10490_s7 + $0xbe4] ss:$28 sps:$4 sm:$0xff]  }
 0x430   :  { %7004 = vmatpush3.bf16.msra.mxu0 %v7739_v15  ;;  %5859 = vmatprep.subr.bf16.mxu1 %v7742_v49 }
 0x431   :  { %7005 = vmatprep.subr.bf16.mxu0 %v7743_v20 }
 0x433   :  { %5860 = vmatpush1.bf16.msra.mxu1 %v7740_v52 }
 0x434   :  { %7006 = vmatpush3.bf16.msra.mxu0 %v7744_v53  ;;  %5870 = vmatprep.subr.bf16.mxu1 %v7747_v55 }
 0x436   :  { %5862 = vmatmul.mubr.bf16.vlgmr.msra.gmra.mrb[12].mxu1 %v9448_v27  ;;  %v7756_v27 = vld [vmem:[%s10490_s7 + $0x7bc] ss:$28 sps:$4 sm:$0xff]  }
 0x437   :  { %6105 = vmatmul.mubr.bf16.vlgmr.msra.gmra.mrb[36].mxu0 %v9862_v22  ;;  %5871 = vmatpush1.bf16.msra.mxu1 %v7745_v57 }
 0x438   :  { %5902 = vmatprep.mubr.bf16.mxu1 %v9650_v61  ;;  %5872 = vmatprep.subr.bf16.mxu1 %v7750_v26  ;;  %v7754_v61 = vld [vmem:[%s10490_s7 + $0x7b8] ss:$28 sps:$4 sm:$0xff]  }
 0x43b   :  { %5873 = vmatpush1.bf16.msra.mxu1 %v7748_v58 }
 0x43c   :  { %5874 = vmatprep.subr.bf16.mxu1 %v7753_v59  ;;  %v7816_v59 = vld [vmem:[%s10490_s7 + $0xc1c] ss:$28 sps:$4 sm:$0xff]  }
 0x43f   :  { %5875 = vmatpush1.bf16.msra.mxu1 %v7751_v2  ;;  %v7814_v2 = vld [vmem:[%s10490_s7 + $0xc18] ss:$28 sps:$4 sm:$0xff]  }
 0x440   :  { %5876 = vmatprep.subr.bf16.mxu1 %v7756_v27  ;;  %v7819_v27 = vld [vmem:[%s10490_s7 + $0xc54] ss:$28 sps:$4 sm:$0xff]  }
 0x443   :  { %5877 = vmatpush1.bf16.msra.mxu1 %v7754_v61  ;;  %v7817_v61 = vld [vmem:[%s10490_s7 + $0xc50] ss:$28 sps:$4 sm:$0xff]  }
 0x444   :  { %5878 = vmatprep.subr.bf16.mxu1 %v7759_v24  ;;  %v7822_v24 = vld [vmem:[%s10490_s7 + $0xc8c] ss:$28 sps:$4 sm:$0xff]  }
 0x447   :  { %5879 = vmatpush1.bf16.msra.mxu1 %v7757_v62 }
 0x448   :  { %5880 = vmatprep.subr.bf16.mxu1 %v7762_v3 }
 0x44b   :  { %5881 = vmatpush1.bf16.msra.mxu1 %v7760_v5  ;;  %v7820_v5 = vld [vmem:[%s10490_s7 + $0xc88] ss:$28 sps:$4 sm:$0xff]  }
 0x44c   :  { %5882 = vmatprep.subr.bf16.mxu1 %v7765_v6 }
 0x44f   :  { %5883 = vmatpush1.bf16.msra.mxu1 %v7763_v7  ;;  %v7825_v7 = vld [vmem:[%s10490_s7 + $0xcc4] ss:$28 sps:$4 sm:$0xff]  }
 0x450   :  { %5884 = vmatprep.subr.bf16.mxu1 %v7768_v8 }
 0x453   :  { %5885 = vmatpush1.bf16.msra.mxu1 %v7766_v12  ;;  %v7823_v12 = vld [vmem:[%s10490_s7 + $0xcc0] ss:$28 sps:$4 sm:$0xff]  }
 0x454   :  { %5886 = vmatprep.subr.bf16.mxu1 %v7771_v13  ;;  %v7828_v13 = vld [vmem:[%s10490_s7 + $0xcfc] ss:$28 sps:$4 sm:$0xff]  }
 0x457   :  { %5887 = vmatpush1.bf16.msra.mxu1 %v7769_v16  ;;  %v7826_v16 = vld [vmem:[%s10490_s7 + $0xcf8] ss:$28 sps:$4 sm:$0xff]  }
 0x458   :  { %5888 = vmatprep.subr.bf16.mxu1 %v7774_v56  ;;  %v7831_v56 = vld [vmem:[%s10490_s7 + $0xd34] ss:$28 sps:$4 sm:$0xff]  }
 0x45b   :  { %5889 = vmatpush1.bf16.msra.mxu1 %v7772_v19  ;;  %v7829_v19 = vld [vmem:[%s10490_s7 + $0xd30] ss:$28 sps:$4 sm:$0xff]  }
 0x45c   :  { %5890 = vmatprep.subr.bf16.mxu1 %v7777_v9  ;;  %v7834_v9 = vld [vmem:[%s10490_s7 + $0xd6c] ss:$28 sps:$4 sm:$0xff]  }
 0x45f   :  { %5891 = vmatpush1.bf16.msra.mxu1 %v7775_v10  ;;  %v7832_v10 = vld [vmem:[%s10490_s7 + $0xd68] ss:$28 sps:$4 sm:$0xff]  }
 0x460   :  { %5892 = vmatprep.subr.bf16.mxu1 %v7780_v11  ;;  %v7837_v11 = vld [vmem:[%s10490_s7 + $0xda4] ss:$28 sps:$4 sm:$0xff]  }
 0x463   :  { %5893 = vmatpush1.bf16.msra.mxu1 %v7778_v42 }
 0x464   :  { %5894 = vmatprep.subr.bf16.mxu1 %v7783_v14 }
 0x467   :  { %5895 = vmatpush1.bf16.msra.mxu1 %v7781_v17  ;;  %v7835_v17 = vld [vmem:[%s10490_s7 + $0xda0] ss:$28 sps:$4 sm:$0xff]  }
 0x468   :  { %5896 = vmatprep.subr.bf16.mxu1 %v7786_v60 }
 0x46b   :  { %5897 = vmatpush1.bf16.msra.mxu1 %v7784_v18 }
 0x46c   :  { %5898 = vmatprep.subr.bf16.mxu1 %v7789_v23  ;;  %v7840_v23 = vld [vmem:[%s10490_s7 + $0xddc] ss:$28 sps:$4 sm:$0xff]  }
 0x46f   :  { %5899 = vmatpush1.bf16.msra.mxu1 %v7787_v28 }
 0x470   :  { %5900 = vmatprep.subr.bf16.mxu1 %v7792_v29  ;;  %v7838_v29 = vld [vmem:[%s10490_s7 + $0xdd8] ss:$28 sps:$4 sm:$0xff]  }
 0x473   :  { %5901 = vmatpush1.bf16.msra.mxu1 %v7790_v30  ;;  %v3148_v30 = vrot.slane %v10385_v39, %v969_v0 }
 0x474   :  { %5911 = vmatprep.subr.bf16.mxu1 %v7795_v31 }
 0x476   :  { %5903 = vmatmul.mubr.bf16.vlgmr.msra.gmra.mrb[12].mxu1 %v9658_v63  ;;  %v7804_v63 = vld [vmem:[%s10490_s7 + $0xb3c] ss:$28 sps:$4 sm:$0xff]  }
 0x477   :  { %5912 = vmatpush1.bf16.msra.mxu1 %v7793_v32  ;;  %5943 = vmatprep.mubr.bf16.mxu1 %v9668_v4  ;;  %v7802_v4 = vld [vmem:[%s10490_s7 + $0xb38] ss:$28 sps:$4 sm:$0xff]   ;;  %s7880_s7 = smov [#allocation2]  }
 0x478   :  { %5913 = vmatprep.subr.bf16.mxu1 %v7798_v33  ;;  %s6133_s19 = sshll.u32 %s7880_s7, 4  ;;  %s6134_s19 = int_to_ptr.vmem [resolvable:$true] %s6133_s19 }
 0x479   :  { %s7855_s20 = scalar_lea.vmem %s6134_s19, 896  ;;  %p7860_p1 = scmp.lt.s32.totalorder %s6134_s19, %s6134_s19 }
 0x47a   :  { %p7856_p0 = scmp.ne.s32.totalorder %s6134_s19, %s7855_s20  ;;  %p7861_p2 = scmp.lt.s32.totalorder %s7855_s20, %s7855_s20 }
 0x47b   :  { %5914 = vmatpush1.bf16.msra.mxu1 %v7796_v34 }
 0x47c   :  { %5915 = vmatprep.subr.bf16.mxu1 %v7801_v50  ;;  %p7862_p3 = por %p7861_p2, %p7860_p1 }
 0x47e   :  { %p7863_p4 = pnand %p7862_p3, %p7856_p0 }
 0x47f   :  { %5916 = vmatpush1.bf16.msra.mxu1 %v7799_v35 }
 0x480   :  { %5917 = vmatprep.subr.bf16.mxu1 %v7804_v63 }
 0x483   :  { %5918 = vmatpush1.bf16.msra.mxu1 %v7802_v4 }
 0x484   :  { %5919 = vmatprep.subr.bf16.mxu1 %v7807_v37 }
 0x487   :  { %5920 = vmatpush1.bf16.msra.mxu1 %v7805_v38 }
 0x488   :  { %5921 = vmatprep.subr.bf16.mxu1 %v7810_v40 }
 0x489   :  { %v5617_v41 = vpop.f32.mrb[8].mxu1  ;;  %v5781_v15 = vpop.f32.mrb[20].mxu0 }
 0x48a   :  { %v7021_v49 = vadd.f32 %v5617_v41, %v3124_v1  ;;  %v7023_v51 = vadd.f32 %v5781_v15, %v3132_v43  ;;  %v5619_v20 = vpop.f32.mrb[9].mxu1  ;;  %v5783_v52 = vpop.f32.mrb[21].mxu0  ;;  %v3140_v15 = vrot.slane %v10385_v39, %v961_v21 }
 0x48b   :  { %v7022_v53 = vadd.f32 %v5619_v20, %v3128_v45  ;;  %v7024_v44 = vadd.f32 %v5783_v52, %v3136_v46  ;;  %v5621_v55 = vpop.f32.mrb[10].mxu1  ;;  %v5785_v57 = vpop.f32.mrb[22].mxu0  ;;  %5922 = vmatpush1.bf16.msra.mxu1 %v7808_v47 }
 0x48c   :  { %7841 = vtanh.f32 %v7021_v49  ;;  %v5622_v26 = vpop.f32.mrb[11].mxu1  ;;  %v5786_v58 = vpop.f32.mrb[23].mxu0  ;;  %5923 = vmatprep.subr.bf16.mxu1 %v7813_v48  ;;  %v3144_v49 = vrot.slane %v10385_v39, %v965_v25 }
 0x48d   :  { %7843 = vtanh.f32 %v7023_v51 }
 0x48e   :  { %7845 = vtanh.f32 %v7022_v53 }
 0x48f   :  { %7847 = vtanh.f32 %v7024_v44  ;;  %5924 = vmatpush1.bf16.msra.mxu1 %v7811_v54 }
 0x490   :  { %5925 = vmatprep.subr.bf16.mxu1 %v7816_v59 }
 0x493   :  { %5926 = vmatpush1.bf16.msra.mxu1 %v7814_v2 }
 0x494   :  { %5927 = vmatprep.subr.bf16.mxu1 %v7819_v27 }
 0x496   :  { %v7842_v62 = vpop.eup %7841 }
 0x497   :  { %v7844_v3 = vpop.eup %7843  ;;  %6119 = vst [vmem:[#allocation2] sm:$0xff] %v7842_v62  ;;  %5928 = vmatpush1.bf16.msra.mxu1 %v7817_v61 }
 0x498   :  { %v7846_v6 = vpop.eup %7845  ;;  %6121 = vst [vmem:[#allocation2 + $0x10] sm:$0xff] %v7844_v3  ;;  %5929 = vmatprep.subr.bf16.mxu1 %v7822_v24 }
 0x499   :  { %v7848_v8 = vpop.eup %7847  ;;  %6120 = vst [vmem:[#allocation2 + $0x8] sm:$0xff] %v7846_v6 }
 0x49a   :  { %6122 = vst [vmem:[#allocation2 + $0x18] sm:$0xff] %v7848_v8 }
 0x49b   :  { %5930 = vmatpush1.bf16.msra.mxu1 %v7820_v5 }
 0x49c   :  { %5931 = vmatprep.subr.bf16.mxu1 %v7825_v7 }
 0x49f   :  { %5932 = vmatpush1.bf16.msra.mxu1 %v7823_v12 }
 0x4a0   :  { %5933 = vmatprep.subr.bf16.mxu1 %v7828_v13 }
 0x4a3   :  { %5934 = vmatpush1.bf16.msra.mxu1 %v7826_v16 }
 0x4a4   :  { %5935 = vmatprep.subr.bf16.mxu1 %v7831_v56 }
 0x4a7   :  { %5936 = vmatpush1.bf16.msra.mxu1 %v7829_v19 }
 0x4a8   :  { %5937 = vmatprep.subr.bf16.mxu1 %v7834_v9 }
 0x4aa   :  { %v6941_v42 = vpop.f32.mrb[24].mxu0 }
 0x4ab   :  { %v6942_v14 = vpop.f32.mrb[25].mxu0  ;;  %5938 = vmatpush1.bf16.msra.mxu1 %v7832_v10 }
 0x4ac   :  { %v6943_v60 = vadd.f32 %v6942_v14, %v6941_v42  ;;  %v6944_v18 = vpop.f32.mrb[26].mxu0  ;;  %5939 = vmatprep.subr.bf16.mxu1 %v7837_v11 }
 0x4ad   :  { %v6945_v28 = vpop.f32.mrb[27].mxu0 }
 0x4ae   :  { %v5987_v33 = vadd.f32 %v6943_v60, %v3148_v30 }
 0x4af   :  { %5940 = vmatpush1.bf16.msra.mxu1 %v7835_v17 }
 0x4b0   :  { %5941 = vmatprep.subr.bf16.mxu1 %v7840_v23 }
 0x4b3   :  { %5942 = vmatpush1.bf16.msra.mxu1 %v7838_v29 }
 0x4b6   :  { %5944 = vmatmul.mubr.bf16.vlgmr.msra.gmra.mrb[12].mxu1 %v9862_v22 }
 0x4ca   :  { %v6963_v31 = vpop.f32.mrb[28].mxu0 }
 0x4cb   :  { %v6964_v32 = vpop.f32.mrb[29].mxu0 }
 0x4cc   :  { %v6965_v34 = vadd.f32 %v6964_v32, %v6963_v31  ;;  %v6966_v50 = vpop.f32.mrb[30].mxu0 }
 0x4cd   :  { %v6967_v35 = vpop.f32.mrb[31].mxu0 }
 0x4ce   :  { %v6027_v63 = vadd.f32 %v6965_v34, %v5987_v33 }
 0x4ea   :  { %v6985_v4 = vpop.f32.mrb[32].mxu0 }
 0x4eb   :  { %v6986_v37 = vpop.f32.mrb[33].mxu0 }
 0x4ec   :  { %v6987_v38 = vadd.f32 %v6986_v37, %v6985_v4  ;;  %v6988_v40 = vpop.f32.mrb[34].mxu0 }
 0x4ed   :  { %v6989_v1 = vpop.f32.mrb[35].mxu0 }
 0x4ee   :  { %v6067_v43 = vadd.f32 %v6987_v38, %v6027_v63 }
 0x50a   :  { %v7007_v45 = vpop.f32.mrb[36].mxu0 }
 0x50b   :  { %v7008_v46 = vpop.f32.mrb[37].mxu0 }
 0x50c   :  { %v7009_v22 = vadd.f32 %v7008_v46, %v7007_v45  ;;  %v7010_v47 = vpop.f32.mrb[38].mxu0 }
 0x50d   :  { %v7011_v48 = vpop.f32.mrb[39].mxu0 }
 0x50e   :  { %v6107_v41 = vadd.f32 %v7009_v22, %v6067_v43 }
 0x510   :  { %7849 = vtanh.f32 %v6107_v41 }
 0x51a   :  { %v7850_v0 = vpop.eup %7849 }
 0x51b   :  { %6126 = vst.msk [vmem:[#allocation2 + $0x30] sm:$0xff] %vm6125_vm0, %v7850_v0 }
 0x589   :  { %v5945_v51 = vpop.f32.mrb[12].mxu1 }
 0x58a   :  { %v7025_v20 = vadd.f32 %v5945_v51, %v3140_v15  ;;  %v5947_v52 = vpop.f32.mrb[13].mxu1 }
 0x58b   :  { %v7026_v53 = vadd.f32 %v5947_v52, %v3144_v49  ;;  %v5949_v44 = vpop.f32.mrb[14].mxu1 }
 0x58c   :  { %7851 = vtanh.f32 %v7025_v20  ;;  %v5950_v55 = vpop.f32.mrb[15].mxu1 }
 0x58d   :  { %7853 = vtanh.f32 %v7026_v53 }
 0x596   :  { %v7852_v57 = vpop.eup %7851 }
 0x597   :  { %v7854_v54 = vpop.eup %7853  ;;  %6123 = vst [vmem:[#allocation2 + $0x20] sm:$0xff] %v7852_v57 }
 0x598   :  { %6124 = vst [vmem:[#allocation2 + $0x28] sm:$0xff] %v7854_v54 }
 0x599   :  { %7866 = shalt.err (!%p7863_p4)
}
 0x59a   :  { %s7867_s23 = scalar_lea.hbm %s10492_s9, 896 }
 0x59b   :  { %p7868_p5 = scmp.ne.s32.totalorder %s10492_s9, %s7867_s23  ;;  %p7871_p6 = scmp.lt.u32.totalorder %s7867_s23, %s10492_s9 }
 0x59d   :  { %p7873_p7 = pnand %p7871_p6, %p7868_p5 }
 0x59f   :  { %7876 = shalt.err (!%p7873_p7)
}
 0x5a0   :  { %6136 = dma.vmem_to_hbm [thread:$0]  %s6134_s19, 896, %s10492_s9, [#allocation3]  }
 0x5a1   :  { %7877 = dma.done.wait [#allocation3], 896  }
 0x5a2   :  { %7878 = vsyncadd [#allocation3], 4294966400 }
 0x5a3   :  { %6140 = vsyncpa [#allocation3], 1 }

</bundles_post_ra>
